<compile_context>
chip_gen: v5e
topology: v5e:2x2
jax: 0.10.0
libtpu: 0.0.40
codegen_flags: <defaults>
</compile_context>

<pallas_src>
import jax
import jax.numpy as jnp
from jax.experimental import pallas as pl
from jax.experimental.pallas import tpu as pltpu


# ---------------------------------------------------------------------------
# Fused kernel.
#   gi0_ref : (T*B, 8H)  precomputed layer-0 input gates (incl. bias, g x2)
#   w0h_ref : (2H, 8H)   layer-0 hidden->gate weights (block-diag fwd|bwd)
#   w1t_ref : (2H, 8H)   layer-1 input rows multiplying hist0[s]
#   w1b_ref : (2H, 8H)   layer-1 input rows multiplying hist0[T-1-s]
#   w1h_ref : (2H, 8H)   layer-1 hidden->gate weights
#   b1_ref  : (1, 8H)    layer-1 packed bias
#   wfc_ref : (2H, O), bfc_ref: (1, O)
#   out_ref : (B, O)
# Gate columns are packed [i_f,i_b | f_f,f_b | g_f,g_b | o_f,o_b], H each.
# ---------------------------------------------------------------------------
def _mymodel_kernel(gi0_ref, w0h_ref, w1t_ref, w1b_ref, w1h_ref, b1_ref,
                    wfc_ref, bfc_ref, out_ref,
                    hist0_scr, g1f_scr, g1b_scr):
    TB, H8 = gi0_ref.shape
    H2 = hist0_scr.shape[1]          # 2H  (fwd | bwd halves)
    H = H2 // 2
    B = out_ref.shape[0]
    T = TB // B

    # Hoisted masks (JAX does not CSE broadcast_in_dim; build once, reuse 2T x).
    lane8 = jax.lax.broadcasted_iota(jnp.int32, (B, H8), 1)
    is_g = jnp.logical_and(lane8 >= 4 * H, lane8 < 6 * H)   # tanh (g) lanes
    lane2 = jax.lax.broadcasted_iota(jnp.int32, (B, H2), 1)
    is_fwd_half = lane2 < H

    def lstm_steps(gates_in_fn, w_hh, store_fn):
        # h / c live in vregs as Python loop values; loop is fully unrolled.
        h = jnp.zeros((B, H2), jnp.float32)
        c = jnp.zeros((B, H2), jnp.float32)
        for s in range(T):
            gates = gates_in_fn(s) + jnp.dot(
                h, w_hh, preferred_element_type=jnp.float32)        # (B, 8H)
            # Single EUP pass: g columns were pre-scaled by 2 at pack time, so
            # tanh(z) == 2*sigmoid(2z) - 1 (masked VPU fix-up, no tanh slab).
            act = jax.nn.sigmoid(gates)
            act = jnp.where(is_g, 2.0 * act - 1.0, act)
            i = act[:, 0 * H2:1 * H2]                               # (B, 2H)
            f = act[:, 1 * H2:2 * H2]
            g = act[:, 2 * H2:3 * H2]
            o = act[:, 3 * H2:4 * H2]
            c = f * c + i * g
            h = o * jnp.tanh(c)
            store_fn(s, h)

    # ------------------------------ Layer 0 -------------------------------
    # Input gates fully precomputed in the wrapper; store one full-width h per
    # step into a step-major history (the bidirectional time re-interleave is
    # absorbed into the layer-1 weight packing).
    w0h = w0h_ref[...]

    def store0(s, h):
        hist0_scr[pl.ds(s * B, B), :] = h

    lstm_steps(lambda s: gi0_ref[pl.ds(s * B, B), :], w0h, store0)

    # Layer-1 input projections: two batched MXU dots (M = T*B), off the chain.
    hist0 = hist0_scr[...]                                           # (T*B, 2H)
    g1f_scr[...] = (jnp.dot(hist0, w1t_ref[...],
                            preferred_element_type=jnp.float32) + b1_ref[...])
    g1b_scr[...] = jnp.dot(hist0, w1b_ref[...],
                           preferred_element_type=jnp.float32)

    # ------------------------------ Layer 1 -------------------------------
    # Only lstm_out[:, -1, :] is consumed: fwd half from step T-1, bwd half
    # from step 0.  No layer-1 history buffer, no per-step stores.
    w1h = w1h_ref[...]
    saved = {}

    def store1(s, h):
        if s == T - 1:
            saved["fwd"] = h
        if s == 0:
            saved["bwd"] = h

    lstm_steps(lambda s: g1f_scr[pl.ds(s * B, B), :]
               + g1b_scr[pl.ds((T - 1 - s) * B, B), :],
               w1h, store1)

    last = jnp.where(is_fwd_half, saved["fwd"], saved["bwd"])        # (B, 2H)
    out_ref[...] = (jnp.dot(last, wfc_ref[...],
                            preferred_element_type=jnp.float32) + bfc_ref[...])


def my_model_forward(params, x):
    """x: (B, T, I) batch-first (or (B, I), unsqueezed like the torch module)."""
    if x.ndim == 2:                      # torch: x = x.unsqueeze(1)
        x = x[:, None, :]
    x_tm = jnp.transpose(x, (1, 0, 2)).astype(jnp.float32)           # (T, B, I)
    T, B, I = x_tm.shape
    H2, H8 = params["w0_hh"].shape                                    # 2H, 8H
    O = params["fc_w"].shape[1]

    # Layer-0 input->gate projection for all timesteps as one XLA matmul
    # (M = T*B); the kernel's serial chain only carries h @ W_hh.
    x_cat = jnp.concatenate([x_tm, x_tm[::-1]], axis=-1)             # (T, B, 2I)
    gi0 = (jnp.dot(x_cat.reshape(T * B, 2 * I), params["w0_ih"],
                   preferred_element_type=jnp.float32) + params["b0"])

    # Note: gridless kernel -> runs on one TensorCore; at B=4 that is optimal.
    # If batch grows (esp. v7x, 2 TCs), add a leading "parallel" batch grid axis.
    return pl.pallas_call(
        _mymodel_kernel,
        out_shape=jax.ShapeDtypeStruct((B, O), jnp.float32),
        scratch_shapes=[
            pltpu.VMEM((T * B, H2), jnp.float32),   # layer-0 h history
            pltpu.VMEM((T * B, H8), jnp.float32),   # layer-1 gates (step index)
            pltpu.VMEM((T * B, H8), jnp.float32),   # layer-1 gates (rev index)
        ],
    )(gi0, params["w0_hh"], params["w1_top"], params["w1_bot"],
      params["w1_hh"], params["b1"], params["fc_w"], params["fc_b"])


# ---------------------------------------------------------------------------
# Parameter init (PyTorch LSTM/Linear-style) + packing into the kernel layout.
# ---------------------------------------------------------------------------
def _pack_blockdiag(w_f, w_b, H):
    """w_f, w_b: (in_dim, 4H) with gate-order columns [i, f, g, o].
    Returns (2*in_dim, 8H) block-diagonal weights with columns packed as
    [i_f,i_b | f_f,f_b | g_f,g_b | o_f,o_b]; the g block is pre-scaled by 2 so
    the kernel can use tanh(z) = 2*sigmoid(2z) - 1 (single sigmoid pass)."""
    in_dim = w_f.shape[0]
    out = jnp.zeros((2 * in_dim, 8 * H), jnp.float32)
    for gb in range(4):
        scale = 2.0 if gb == 2 else 1.0
        out = out.at[:in_dim, gb * 2 * H: gb * 2 * H + H].set(
            scale * w_f[:, gb * H:(gb + 1) * H])
        out = out.at[in_dim:, gb * 2 * H + H:(gb + 1) * 2 * H].set(
            scale * w_b[:, gb * H:(gb + 1) * H])
    return out


def _pack_bias(b_f, b_b, H):
    out = jnp.zeros((8 * H,), jnp.float32)
    for gb in range(4):
        scale = 2.0 if gb == 2 else 1.0
        out = out.at[gb * 2 * H: gb * 2 * H + H].set(
            scale * b_f[gb * H:(gb + 1) * H])
        out = out.at[gb * 2 * H + H:(gb + 1) * 2 * H].set(
            scale * b_b[gb * H:(gb + 1) * H])
    return out[None, :]


def init_params(key, input_size, hidden_size, output_size):
    """Deterministic PyTorch-style init. Returns (packed_params, raw_params)."""
    H = hidden_size
    k_lstm = 1.0 / jnp.sqrt(jnp.float32(H))
    keys = jax.random.split(key, 2 * 2 * 4 + 2)
    idx = 0
    layer_in = input_size
    raw_layers = []
    for _layer in range(2):
        dirs = []
        for _direction in range(2):
            w_ih = jax.random.uniform(keys[idx], (4 * H, layer_in),
                                      minval=-k_lstm, maxval=k_lstm); idx += 1
            w_hh = jax.random.uniform(keys[idx], (4 * H, H),
                                      minval=-k_lstm, maxval=k_lstm); idx += 1
            b_ih = jax.random.uniform(keys[idx], (4 * H,),
                                      minval=-k_lstm, maxval=k_lstm); idx += 1
            b_hh = jax.random.uniform(keys[idx], (4 * H,),
                                      minval=-k_lstm, maxval=k_lstm); idx += 1
            dirs.append((w_ih.T.astype(jnp.float32),          # (in, 4H)
                         w_hh.T.astype(jnp.float32),          # (H, 4H)
                         (b_ih + b_hh).astype(jnp.float32)))  # (4H,)
        raw_layers.append(dirs)
        layer_in = 2 * H

    k_fc = 1.0 / jnp.sqrt(jnp.float32(2 * H))
    w_fc = jax.random.uniform(keys[idx], (output_size, 2 * H),
                              minval=-k_fc, maxval=k_fc); idx += 1
    b_fc = jax.random.uniform(keys[idx], (output_size,),
                              minval=-k_fc, maxval=k_fc)

    (w0f_ih, w0f_hh, b0f), (w0b_ih, w0b_hh, b0b) = raw_layers[0]
    (w1f_ih, w1f_hh, b1f), (w1b_ih, w1b_hh, b1b) = raw_layers[1]

    # Layer-1 input weights: block-diag pack, then split/permute its H-row
    # blocks [R0,R1,R2,R3] into [R0;R3] (multiplies hist0[s]) and [R2;R1]
    # (multiplies hist0[T-1-s]).  This absorbs the bidirectional time
    # re-interleave of the layer-0 output at pack time (free).
    w1_ih = _pack_blockdiag(w1f_ih, w1b_ih, H)                 # (4H, 8H)
    R = [w1_ih[i * H:(i + 1) * H] for i in range(4)]
    w1_top = jnp.concatenate([R[0], R[3]], axis=0)             # (2H, 8H)
    w1_bot = jnp.concatenate([R[2], R[1]], axis=0)             # (2H, 8H)

    packed = {
        "w0_ih": _pack_blockdiag(w0f_ih, w0b_ih, H),           # (2I, 8H)
        "w0_hh": _pack_blockdiag(w0f_hh, w0b_hh, H),           # (2H, 8H)
        "b0":    _pack_bias(b0f, b0b, H),                      # (1, 8H)
        "w1_top": w1_top,
        "w1_bot": w1_bot,
        "w1_hh": _pack_blockdiag(w1f_hh, w1b_hh, H),           # (2H, 8H)
        "b1":    _pack_bias(b1f, b1b, H),                      # (1, 8H)
        "fc_w":  w_fc.T.astype(jnp.float32),                   # (2H, O)
        "fc_b":  b_fc[None, :].astype(jnp.float32),            # (1, O)
    }
    raw = {"lstm": raw_layers, "fc_w": w_fc.T.astype(jnp.float32),
           "fc_b": b_fc.astype(jnp.float32)}
    return packed, raw


# ---------------------------------------------------------------------------
# Pure-JAX reference (PyTorch nn.LSTM semantics) for correctness check.
# ---------------------------------------------------------------------------
def reference_forward(raw, x):
    if x.ndim == 2:
        x = x[:, None, :]
    B = x.shape[0]
    H = raw["lstm"][0][0][1].shape[0]

    def run_dir(xs, w_ih, w_hh, b):
        def step(carry, xt):
            h, c = carry
            z = xt @ w_ih + h @ w_hh + b
            i = jax.nn.sigmoid(z[:, 0 * H:1 * H])
            f = jax.nn.sigmoid(z[:, 1 * H:2 * H])
            g = jnp.tanh(z[:, 2 * H:3 * H])
            o = jax.nn.sigmoid(z[:, 3 * H:4 * H])
            c = f * c + i * g
            h = o * jnp.tanh(c)
            return (h, c), h
        init = (jnp.zeros((B, H), jnp.float32), jnp.zeros((B, H), jnp.float32))
        _, hs = jax.lax.scan(step, init, xs)
        return hs

    seq = jnp.transpose(x, (1, 0, 2)).astype(jnp.float32)     # (T, B, in)
    for (wf_ih, wf_hh, bf), (wb_ih, wb_hh, bb) in raw["lstm"]:
        hs_f = run_dir(seq, wf_ih, wf_hh, bf)
        hs_b = run_dir(seq[::-1], wb_ih, wb_hh, bb)[::-1]
        seq = jnp.concatenate([hs_f, hs_b], axis=-1)
    return seq[-1] @ raw["fc_w"] + raw["fc_b"][None, :]


if __name__ == "__main__":
    key = jax.random.PRNGKey(0)
    kp, kx = jax.random.split(key)

    input_size, hidden_size, output_size = 16, 32, 2
    batch, seq_len = 4, 8

    params, raw = init_params(kp, input_size, hidden_size, output_size)
    # batch-first input, same convention as the PyTorch module
    x = jax.random.normal(kx, (batch, seq_len, input_size), dtype=jnp.float32)

    forward = jax.jit(my_model_forward)
    out = forward(params, x)
    jax.block_until_ready(out)

    ref = reference_forward(raw, x)
    assert out.shape == (batch, output_size)
    assert bool(jnp.all(jnp.isfinite(out)))
    assert bool(jnp.allclose(out, ref, atol=1e-3, rtol=1e-3)), (
        "mismatch vs reference, max abs err "
        f"{float(jnp.max(jnp.abs(out - ref)))}")
    print("KERNEL_OK")
</pallas_src>

<mosaic_0001>
module attributes {stable_mosaic.version = 11 : i64} {
  func.func @_mymodel_kernel(%arg0: memref<32x256xf32, #tpu.memory_space<vmem>>, %arg1: memref<64x256xf32, #tpu.memory_space<vmem>>, %arg2: memref<64x256xf32, #tpu.memory_space<vmem>>, %arg3: memref<64x256xf32, #tpu.memory_space<vmem>>, %arg4: memref<64x256xf32, #tpu.memory_space<vmem>>, %arg5: memref<1x256xf32, #tpu.memory_space<vmem>>, %arg6: memref<64x2xf32, #tpu.memory_space<vmem>>, %arg7: memref<1x2xf32, #tpu.memory_space<vmem>>, %arg8: memref<4x2xf32, #tpu.memory_space<vmem>>, %arg9: memref<32x64xf32, #tpu.memory_space<vmem>>, %arg10: memref<32x256xf32, #tpu.memory_space<vmem>>, %arg11: memref<32x256xf32, #tpu.memory_space<vmem>>) attributes {dimension_semantics = [], scalar_prefetch = 0 : i64, scratch_operands = 3 : i64, tpu.core_type = #tpu.core_type<tc>} {
    %0 = tpu.iota {dimensions = array<i32: 1>} : vector<4x256xi32>
    %c128_i32 = arith.constant 128 : i32
    %1 = vector.broadcast %c128_i32 : i32 to vector<4x256xi32>
    %2 = arith.cmpi sge, %0, %1 : vector<4x256xi32>
    %c192_i32 = arith.constant 192 : i32
    %3 = vector.broadcast %c192_i32 : i32 to vector<4x256xi32>
    %4 = arith.cmpi slt, %0, %3 : vector<4x256xi32>
    %5 = arith.andi %2, %4 : vector<4x256xi1>
    %6 = tpu.iota {dimensions = array<i32: 1>} : vector<4x64xi32>
    %c32_i32 = arith.constant 32 : i32
    %7 = vector.broadcast %c32_i32 : i32 to vector<4x64xi32>
    %8 = arith.cmpi slt, %6, %7 : vector<4x64xi32>
    %c0 = arith.constant 0 : index
    %c0_0 = arith.constant 0 : index
    %9 = vector.load %arg1[%c0, %c0_0] : memref<64x256xf32, #tpu.memory_space<vmem>>, vector<64x256xf32>
    %cst = arith.constant 0.000000e+00 : f32
    %10 = vector.broadcast %cst : f32 to vector<4x64xf32>
    %cst_1 = arith.constant 0.000000e+00 : f32
    %11 = vector.broadcast %cst_1 : f32 to vector<4x64xf32>
    %c0_2 = arith.constant 0 : index
    %c0_3 = arith.constant 0 : index
    %12 = vector.load %arg0[%c0_2, %c0_3] : memref<32x256xf32, #tpu.memory_space<vmem>>, vector<4x256xf32>
    %cst_4 = arith.constant dense<0.000000e+00> : vector<4x256xf32>
    %13 = tpu.matmul %10, %9, %cst_4 {dimension_numbers = #tpu.dot_dimension_numbers<[1], [0], [0], [1], [0, 0, 1, 1], [], []>} : vector<4x64xf32>, vector<64x256xf32>, vector<4x256xf32> -> vector<4x256xf32>
    %14 = arith.addf %12, %13 : vector<4x256xf32>
    %15 = arith.negf %14 : vector<4x256xf32>
    %16 = math.exp %15 : vector<4x256xf32>
    %cst_5 = arith.constant 1.000000e+00 : f32
    %17 = vector.broadcast %cst_5 : f32 to vector<4x256xf32>
    %18 = arith.addf %17, %16 : vector<4x256xf32>
    %19 = arith.divf %17, %18 : vector<4x256xf32>
    %cst_6 = arith.constant 2.000000e+00 : f32
    %20 = vector.broadcast %cst_6 : f32 to vector<4x256xf32>
    %21 = arith.mulf %20, %19 : vector<4x256xf32>
    %cst_7 = arith.constant 1.000000e+00 : f32
    %22 = vector.broadcast %cst_7 : f32 to vector<4x256xf32>
    %23 = arith.subf %21, %22 : vector<4x256xf32>
    %24 = arith.select %5, %23, %19 : vector<4x256xi1>, vector<4x256xf32>
    %25 = vector.extract_strided_slice %24 {offsets = [0, 0], sizes = [4, 64], strides = [1, 1]} : vector<4x256xf32> to vector<4x64xf32>
    %26 = vector.extract_strided_slice %24 {offsets = [0, 64], sizes = [4, 64], strides = [1, 1]} : vector<4x256xf32> to vector<4x64xf32>
    %27 = vector.extract_strided_slice %24 {offsets = [0, 128], sizes = [4, 64], strides = [1, 1]} : vector<4x256xf32> to vector<4x64xf32>
    %28 = vector.extract_strided_slice %24 {offsets = [0, 192], sizes = [4, 64], strides = [1, 1]} : vector<4x256xf32> to vector<4x64xf32>
    %29 = arith.mulf %26, %11 : vector<4x64xf32>
    %30 = arith.mulf %25, %27 : vector<4x64xf32>
    %31 = arith.addf %29, %30 : vector<4x64xf32>
    %32 = math.tanh %31 : vector<4x64xf32>
    %33 = arith.mulf %28, %32 : vector<4x64xf32>
    %c0_8 = arith.constant 0 : index
    %c0_9 = arith.constant 0 : index
    %34 = vector.load %arg9[%c0_8, %c0_9] : memref<32x64xf32, #tpu.memory_space<vmem>>, vector<4x64xf32>
    tpu.vector_store %arg9[%c0_8, %c0_9], %33 {strides = array<i32>} : memref<32x64xf32, #tpu.memory_space<vmem>>, vector<4x64xf32>,
    %c4 = arith.constant 4 : index
    %c0_10 = arith.constant 0 : index
    %35 = vector.load %arg0[%c4, %c0_10] : memref<32x256xf32, #tpu.memory_space<vmem>>, vector<4x256xf32>
    %cst_11 = arith.constant dense<0.000000e+00> : vector<4x256xf32>
    %36 = tpu.matmul %33, %9, %cst_11 {dimension_numbers = #tpu.dot_dimension_numbers<[1], [0], [0], [1], [0, 0, 1, 1], [], []>} : vector<4x64xf32>, vector<64x256xf32>, vector<4x256xf32> -> vector<4x256xf32>
    %37 = arith.addf %35, %36 : vector<4x256xf32>
    %38 = arith.negf %37 : vector<4x256xf32>
    %39 = math.exp %38 : vector<4x256xf32>
    %cst_12 = arith.constant 1.000000e+00 : f32
    %40 = vector.broadcast %cst_12 : f32 to vector<4x256xf32>
    %41 = arith.addf %40, %39 : vector<4x256xf32>
    %42 = arith.divf %40, %41 : vector<4x256xf32>
    %cst_13 = arith.constant 2.000000e+00 : f32
    %43 = vector.broadcast %cst_13 : f32 to vector<4x256xf32>
    %44 = arith.mulf %43, %42 : vector<4x256xf32>
    %cst_14 = arith.constant 1.000000e+00 : f32
    %45 = vector.broadcast %cst_14 : f32 to vector<4x256xf32>
    %46 = arith.subf %44, %45 : vector<4x256xf32>
    %47 = arith.select %5, %46, %42 : vector<4x256xi1>, vector<4x256xf32>
    %48 = vector.extract_strided_slice %47 {offsets = [0, 0], sizes = [4, 64], strides = [1, 1]} : vector<4x256xf32> to vector<4x64xf32>
    %49 = vector.extract_strided_slice %47 {offsets = [0, 64], sizes = [4, 64], strides = [1, 1]} : vector<4x256xf32> to vector<4x64xf32>
    %50 = vector.extract_strided_slice %47 {offsets = [0, 128], sizes = [4, 64], strides = [1, 1]} : vector<4x256xf32> to vector<4x64xf32>
    %51 = vector.extract_strided_slice %47 {offsets = [0, 192], sizes = [4, 64], strides = [1, 1]} : vector<4x256xf32> to vector<4x64xf32>
    %52 = arith.mulf %49, %31 : vector<4x64xf32>
    %53 = arith.mulf %48, %50 : vector<4x64xf32>
    %54 = arith.addf %52, %53 : vector<4x64xf32>
    %55 = math.tanh %54 : vector<4x64xf32>
    %56 = arith.mulf %51, %55 : vector<4x64xf32>
    %c4_15 = arith.constant 4 : index
    %c0_16 = arith.constant 0 : index
    %57 = vector.load %arg9[%c4_15, %c0_16] : memref<32x64xf32, #tpu.memory_space<vmem>>, vector<4x64xf32>
    tpu.vector_store %arg9[%c4_15, %c0_16], %56 {strides = array<i32>} : memref<32x64xf32, #tpu.memory_space<vmem>>, vector<4x64xf32>,
    %c8 = arith.constant 8 : index
    %c0_17 = arith.constant 0 : index
    %58 = vector.load %arg0[%c8, %c0_17] : memref<32x256xf32, #tpu.memory_space<vmem>>, vector<4x256xf32>
    %cst_18 = arith.constant dense<0.000000e+00> : vector<4x256xf32>
    %59 = tpu.matmul %56, %9, %cst_18 {dimension_numbers = #tpu.dot_dimension_numbers<[1], [0], [0], [1], [0, 0, 1, 1], [], []>} : vector<4x64xf32>, vector<64x256xf32>, vector<4x256xf32> -> vector<4x256xf32>
    %60 = arith.addf %58, %59 : vector<4x256xf32>
    %61 = arith.negf %60 : vector<4x256xf32>
    %62 = math.exp %61 : vector<4x256xf32>
    %cst_19 = arith.constant 1.000000e+00 : f32
    %63 = vector.broadcast %cst_19 : f32 to vector<4x256xf32>
    %64 = arith.addf %63, %62 : vector<4x256xf32>
    %65 = arith.divf %63, %64 : vector<4x256xf32>
    %cst_20 = arith.constant 2.000000e+00 : f32
    %66 = vector.broadcast %cst_20 : f32 to vector<4x256xf32>
    %67 = arith.mulf %66, %65 : vector<4x256xf32>
    %cst_21 = arith.constant 1.000000e+00 : f32
    %68 = vector.broadcast %cst_21 : f32 to vector<4x256xf32>
    %69 = arith.subf %67, %68 : vector<4x256xf32>
    %70 = arith.select %5, %69, %65 : vector<4x256xi1>, vector<4x256xf32>
    %71 = vector.extract_strided_slice %70 {offsets = [0, 0], sizes = [4, 64], strides = [1, 1]} : vector<4x256xf32> to vector<4x64xf32>
    %72 = vector.extract_strided_slice %70 {offsets = [0, 64], sizes = [4, 64], strides = [1, 1]} : vector<4x256xf32> to vector<4x64xf32>
    %73 = vector.extract_strided_slice %70 {offsets = [0, 128], sizes = [4, 64], strides = [1, 1]} : vector<4x256xf32> to vector<4x64xf32>
    %74 = vector.extract_strided_slice %70 {offsets = [0, 192], sizes = [4, 64], strides = [1, 1]} : vector<4x256xf32> to vector<4x64xf32>
    %75 = arith.mulf %72, %54 : vector<4x64xf32>
    %76 = arith.mulf %71, %73 : vector<4x64xf32>
    %77 = arith.addf %75, %76 : vector<4x64xf32>
    %78 = math.tanh %77 : vector<4x64xf32>
    %79 = arith.mulf %74, %78 : vector<4x64xf32>
    %c8_22 = arith.constant 8 : index
    %c0_23 = arith.constant 0 : index
    %80 = vector.load %arg9[%c8_22, %c0_23] : memref<32x64xf32, #tpu.memory_space<vmem>>, vector<4x64xf32>
    tpu.vector_store %arg9[%c8_22, %c0_23], %79 {strides = array<i32>} : memref<32x64xf32, #tpu.memory_space<vmem>>, vector<4x64xf32>,
    %c12 = arith.constant 12 : index
    %c0_24 = arith.constant 0 : index
    %81 = vector.load %arg0[%c12, %c0_24] : memref<32x256xf32, #tpu.memory_space<vmem>>, vector<4x256xf32>
    %cst_25 = arith.constant dense<0.000000e+00> : vector<4x256xf32>
    %82 = tpu.matmul %79, %9, %cst_25 {dimension_numbers = #tpu.dot_dimension_numbers<[1], [0], [0], [1], [0, 0, 1, 1], [], []>} : vector<4x64xf32>, vector<64x256xf32>, vector<4x256xf32> -> vector<4x256xf32>
    %83 = arith.addf %81, %82 : vector<4x256xf32>
    %84 = arith.negf %83 : vector<4x256xf32>
    %85 = math.exp %84 : vector<4x256xf32>
    %cst_26 = arith.constant 1.000000e+00 : f32
    %86 = vector.broadcast %cst_26 : f32 to vector<4x256xf32>
    %87 = arith.addf %86, %85 : vector<4x256xf32>
    %88 = arith.divf %86, %87 : vector<4x256xf32>
    %cst_27 = arith.constant 2.000000e+00 : f32
    %89 = vector.broadcast %cst_27 : f32 to vector<4x256xf32>
    %90 = arith.mulf %89, %88 : vector<4x256xf32>
    %cst_28 = arith.constant 1.000000e+00 : f32
    %91 = vector.broadcast %cst_28 : f32 to vector<4x256xf32>
    %92 = arith.subf %90, %91 : vector<4x256xf32>
    %93 = arith.select %5, %92, %88 : vector<4x256xi1>, vector<4x256xf32>
    %94 = vector.extract_strided_slice %93 {offsets = [0, 0], sizes = [4, 64], strides = [1, 1]} : vector<4x256xf32> to vector<4x64xf32>
    %95 = vector.extract_strided_slice %93 {offsets = [0, 64], sizes = [4, 64], strides = [1, 1]} : vector<4x256xf32> to vector<4x64xf32>
    %96 = vector.extract_strided_slice %93 {offsets = [0, 128], sizes = [4, 64], strides = [1, 1]} : vector<4x256xf32> to vector<4x64xf32>
    %97 = vector.extract_strided_slice %93 {offsets = [0, 192], sizes = [4, 64], strides = [1, 1]} : vector<4x256xf32> to vector<4x64xf32>
    %98 = arith.mulf %95, %77 : vector<4x64xf32>
    %99 = arith.mulf %94, %96 : vector<4x64xf32>
    %100 = arith.addf %98, %99 : vector<4x64xf32>
    %101 = math.tanh %100 : vector<4x64xf32>
    %102 = arith.mulf %97, %101 : vector<4x64xf32>
    %c12_29 = arith.constant 12 : index
    %c0_30 = arith.constant 0 : index
    %103 = vector.load %arg9[%c12_29, %c0_30] : memref<32x64xf32, #tpu.memory_space<vmem>>, vector<4x64xf32>
    tpu.vector_store %arg9[%c12_29, %c0_30], %102 {strides = array<i32>} : memref<32x64xf32, #tpu.memory_space<vmem>>, vector<4x64xf32>,
    %c16 = arith.constant 16 : index
    %c0_31 = arith.constant 0 : index
    %104 = vector.load %arg0[%c16, %c0_31] : memref<32x256xf32, #tpu.memory_space<vmem>>, vector<4x256xf32>
    %cst_32 = arith.constant dense<0.000000e+00> : vector<4x256xf32>
    %105 = tpu.matmul %102, %9, %cst_32 {dimension_numbers = #tpu.dot_dimension_numbers<[1], [0], [0], [1], [0, 0, 1, 1], [], []>} : vector<4x64xf32>, vector<64x256xf32>, vector<4x256xf32> -> vector<4x256xf32>
    %106 = arith.addf %104, %105 : vector<4x256xf32>
    %107 = arith.negf %106 : vector<4x256xf32>
    %108 = math.exp %107 : vector<4x256xf32>
    %cst_33 = arith.constant 1.000000e+00 : f32
    %109 = vector.broadcast %cst_33 : f32 to vector<4x256xf32>
    %110 = arith.addf %109, %108 : vector<4x256xf32>
    %111 = arith.divf %109, %110 : vector<4x256xf32>
    %cst_34 = arith.constant 2.000000e+00 : f32
    %112 = vector.broadcast %cst_34 : f32 to vector<4x256xf32>
    %113 = arith.mulf %112, %111 : vector<4x256xf32>
    %cst_35 = arith.constant 1.000000e+00 : f32
    %114 = vector.broadcast %cst_35 : f32 to vector<4x256xf32>
    %115 = arith.subf %113, %114 : vector<4x256xf32>
    %116 = arith.select %5, %115, %111 : vector<4x256xi1>, vector<4x256xf32>
    %117 = vector.extract_strided_slice %116 {offsets = [0, 0], sizes = [4, 64], strides = [1, 1]} : vector<4x256xf32> to vector<4x64xf32>
    %118 = vector.extract_strided_slice %116 {offsets = [0, 64], sizes = [4, 64], strides = [1, 1]} : vector<4x256xf32> to vector<4x64xf32>
    %119 = vector.extract_strided_slice %116 {offsets = [0, 128], sizes = [4, 64], strides = [1, 1]} : vector<4x256xf32> to vector<4x64xf32>
    %120 = vector.extract_strided_slice %116 {offsets = [0, 192], sizes = [4, 64], strides = [1, 1]} : vector<4x256xf32> to vector<4x64xf32>
    %121 = arith.mulf %118, %100 : vector<4x64xf32>
    %122 = arith.mulf %117, %119 : vector<4x64xf32>
    %123 = arith.addf %121, %122 : vector<4x64xf32>
    %124 = math.tanh %123 : vector<4x64xf32>
    %125 = arith.mulf %120, %124 : vector<4x64xf32>
    %c16_36 = arith.constant 16 : index
    %c0_37 = arith.constant 0 : index
    %126 = vector.load %arg9[%c16_36, %c0_37] : memref<32x64xf32, #tpu.memory_space<vmem>>, vector<4x64xf32>
    tpu.vector_store %arg9[%c16_36, %c0_37], %125 {strides = array<i32>} : memref<32x64xf32, #tpu.memory_space<vmem>>, vector<4x64xf32>,
    %c20 = arith.constant 20 : index
    %c0_38 = arith.constant 0 : index
    %127 = vector.load %arg0[%c20, %c0_38] : memref<32x256xf32, #tpu.memory_space<vmem>>, vector<4x256xf32>
    %cst_39 = arith.constant dense<0.000000e+00> : vector<4x256xf32>
    %128 = tpu.matmul %125, %9, %cst_39 {dimension_numbers = #tpu.dot_dimension_numbers<[1], [0], [0], [1], [0, 0, 1, 1], [], []>} : vector<4x64xf32>, vector<64x256xf32>, vector<4x256xf32> -> vector<4x256xf32>
    %129 = arith.addf %127, %128 : vector<4x256xf32>
    %130 = arith.negf %129 : vector<4x256xf32>
    %131 = math.exp %130 : vector<4x256xf32>
    %cst_40 = arith.constant 1.000000e+00 : f32
    %132 = vector.broadcast %cst_40 : f32 to vector<4x256xf32>
    %133 = arith.addf %132, %131 : vector<4x256xf32>
    %134 = arith.divf %132, %133 : vector<4x256xf32>
    %cst_41 = arith.constant 2.000000e+00 : f32
    %135 = vector.broadcast %cst_41 : f32 to vector<4x256xf32>
    %136 = arith.mulf %135, %134 : vector<4x256xf32>
    %cst_42 = arith.constant 1.000000e+00 : f32
    %137 = vector.broadcast %cst_42 : f32 to vector<4x256xf32>
    %138 = arith.subf %136, %137 : vector<4x256xf32>
    %139 = arith.select %5, %138, %134 : vector<4x256xi1>, vector<4x256xf32>
    %140 = vector.extract_strided_slice %139 {offsets = [0, 0], sizes = [4, 64], strides = [1, 1]} : vector<4x256xf32> to vector<4x64xf32>
    %141 = vector.extract_strided_slice %139 {offsets = [0, 64], sizes = [4, 64], strides = [1, 1]} : vector<4x256xf32> to vector<4x64xf32>
    %142 = vector.extract_strided_slice %139 {offsets = [0, 128], sizes = [4, 64], strides = [1, 1]} : vector<4x256xf32> to vector<4x64xf32>
    %143 = vector.extract_strided_slice %139 {offsets = [0, 192], sizes = [4, 64], strides = [1, 1]} : vector<4x256xf32> to vector<4x64xf32>
    %144 = arith.mulf %141, %123 : vector<4x64xf32>
    %145 = arith.mulf %140, %142 : vector<4x64xf32>
    %146 = arith.addf %144, %145 : vector<4x64xf32>
    %147 = math.tanh %146 : vector<4x64xf32>
    %148 = arith.mulf %143, %147 : vector<4x64xf32>
    %c20_43 = arith.constant 20 : index
    %c0_44 = arith.constant 0 : index
    %149 = vector.load %arg9[%c20_43, %c0_44] : memref<32x64xf32, #tpu.memory_space<vmem>>, vector<4x64xf32>
    tpu.vector_store %arg9[%c20_43, %c0_44], %148 {strides = array<i32>} : memref<32x64xf32, #tpu.memory_space<vmem>>, vector<4x64xf32>,
    %c24 = arith.constant 24 : index
    %c0_45 = arith.constant 0 : index
    %150 = vector.load %arg0[%c24, %c0_45] : memref<32x256xf32, #tpu.memory_space<vmem>>, vector<4x256xf32>
    %cst_46 = arith.constant dense<0.000000e+00> : vector<4x256xf32>
    %151 = tpu.matmul %148, %9, %cst_46 {dimension_numbers = #tpu.dot_dimension_numbers<[1], [0], [0], [1], [0, 0, 1, 1], [], []>} : vector<4x64xf32>, vector<64x256xf32>, vector<4x256xf32> -> vector<4x256xf32>
    %152 = arith.addf %150, %151 : vector<4x256xf32>
    %153 = arith.negf %152 : vector<4x256xf32>
    %154 = math.exp %153 : vector<4x256xf32>
    %cst_47 = arith.constant 1.000000e+00 : f32
    %155 = vector.broadcast %cst_47 : f32 to vector<4x256xf32>
    %156 = arith.addf %155, %154 : vector<4x256xf32>
    %157 = arith.divf %155, %156 : vector<4x256xf32>
    %cst_48 = arith.constant 2.000000e+00 : f32
    %158 = vector.broadcast %cst_48 : f32 to vector<4x256xf32>
    %159 = arith.mulf %158, %157 : vector<4x256xf32>
    %cst_49 = arith.constant 1.000000e+00 : f32
    %160 = vector.broadcast %cst_49 : f32 to vector<4x256xf32>
    %161 = arith.subf %159, %160 : vector<4x256xf32>
    %162 = arith.select %5, %161, %157 : vector<4x256xi1>, vector<4x256xf32>
    %163 = vector.extract_strided_slice %162 {offsets = [0, 0], sizes = [4, 64], strides = [1, 1]} : vector<4x256xf32> to vector<4x64xf32>
    %164 = vector.extract_strided_slice %162 {offsets = [0, 64], sizes = [4, 64], strides = [1, 1]} : vector<4x256xf32> to vector<4x64xf32>
    %165 = vector.extract_strided_slice %162 {offsets = [0, 128], sizes = [4, 64], strides = [1, 1]} : vector<4x256xf32> to vector<4x64xf32>
    %166 = vector.extract_strided_slice %162 {offsets = [0, 192], sizes = [4, 64], strides = [1, 1]} : vector<4x256xf32> to vector<4x64xf32>
    %167 = arith.mulf %164, %146 : vector<4x64xf32>
    %168 = arith.mulf %163, %165 : vector<4x64xf32>
    %169 = arith.addf %167, %168 : vector<4x64xf32>
    %170 = math.tanh %169 : vector<4x64xf32>
    %171 = arith.mulf %166, %170 : vector<4x64xf32>
    %c24_50 = arith.constant 24 : index
    %c0_51 = arith.constant 0 : index
    %172 = vector.load %arg9[%c24_50, %c0_51] : memref<32x64xf32, #tpu.memory_space<vmem>>, vector<4x64xf32>
    tpu.vector_store %arg9[%c24_50, %c0_51], %171 {strides = array<i32>} : memref<32x64xf32, #tpu.memory_space<vmem>>, vector<4x64xf32>,
    %c28 = arith.constant 28 : index
    %c0_52 = arith.constant 0 : index
    %173 = vector.load %arg0[%c28, %c0_52] : memref<32x256xf32, #tpu.memory_space<vmem>>, vector<4x256xf32>
    %cst_53 = arith.constant dense<0.000000e+00> : vector<4x256xf32>
    %174 = tpu.matmul %171, %9, %cst_53 {dimension_numbers = #tpu.dot_dimension_numbers<[1], [0], [0], [1], [0, 0, 1, 1], [], []>} : vector<4x64xf32>, vector<64x256xf32>, vector<4x256xf32> -> vector<4x256xf32>
    %175 = arith.addf %173, %174 : vector<4x256xf32>
    %176 = arith.negf %175 : vector<4x256xf32>
    %177 = math.exp %176 : vector<4x256xf32>
    %cst_54 = arith.constant 1.000000e+00 : f32
    %178 = vector.broadcast %cst_54 : f32 to vector<4x256xf32>
    %179 = arith.addf %178, %177 : vector<4x256xf32>
    %180 = arith.divf %178, %179 : vector<4x256xf32>
    %cst_55 = arith.constant 2.000000e+00 : f32
    %181 = vector.broadcast %cst_55 : f32 to vector<4x256xf32>
    %182 = arith.mulf %181, %180 : vector<4x256xf32>
    %cst_56 = arith.constant 1.000000e+00 : f32
    %183 = vector.broadcast %cst_56 : f32 to vector<4x256xf32>
    %184 = arith.subf %182, %183 : vector<4x256xf32>
    %185 = arith.select %5, %184, %180 : vector<4x256xi1>, vector<4x256xf32>
    %186 = vector.extract_strided_slice %185 {offsets = [0, 0], sizes = [4, 64], strides = [1, 1]} : vector<4x256xf32> to vector<4x64xf32>
    %187 = vector.extract_strided_slice %185 {offsets = [0, 64], sizes = [4, 64], strides = [1, 1]} : vector<4x256xf32> to vector<4x64xf32>
    %188 = vector.extract_strided_slice %185 {offsets = [0, 128], sizes = [4, 64], strides = [1, 1]} : vector<4x256xf32> to vector<4x64xf32>
    %189 = vector.extract_strided_slice %185 {offsets = [0, 192], sizes = [4, 64], strides = [1, 1]} : vector<4x256xf32> to vector<4x64xf32>
    %190 = arith.mulf %187, %169 : vector<4x64xf32>
    %191 = arith.mulf %186, %188 : vector<4x64xf32>
    %192 = arith.addf %190, %191 : vector<4x64xf32>
    %193 = math.tanh %192 : vector<4x64xf32>
    %194 = arith.mulf %189, %193 : vector<4x64xf32>
    %c28_57 = arith.constant 28 : index
    %c0_58 = arith.constant 0 : index
    %195 = vector.load %arg9[%c28_57, %c0_58] : memref<32x64xf32, #tpu.memory_space<vmem>>, vector<4x64xf32>
    tpu.vector_store %arg9[%c28_57, %c0_58], %194 {strides = array<i32>} : memref<32x64xf32, #tpu.memory_space<vmem>>, vector<4x64xf32>,
    %c0_59 = arith.constant 0 : index
    %c0_60 = arith.constant 0 : index
    %196 = vector.load %arg9[%c0_59, %c0_60] : memref<32x64xf32, #tpu.memory_space<vmem>>, vector<32x64xf32>
    %c0_61 = arith.constant 0 : index
    %c0_62 = arith.constant 0 : index
    %197 = vector.load %arg2[%c0_61, %c0_62] : memref<64x256xf32, #tpu.memory_space<vmem>>, vector<64x256xf32>
    %cst_63 = arith.constant dense<0.000000e+00> : vector<32x256xf32>
    %198 = tpu.matmul %196, %197, %cst_63 {dimension_numbers = #tpu.dot_dimension_numbers<[1], [0], [0], [1], [0, 0, 1, 1], [], []>} : vector<32x64xf32>, vector<64x256xf32>, vector<32x256xf32> -> vector<32x256xf32>
    %c0_64 = arith.constant 0 : index
    %c0_65 = arith.constant 0 : index
    %199 = vector.load %arg5[%c0_64, %c0_65] : memref<1x256xf32, #tpu.memory_space<vmem>>, vector<1x256xf32>
    %200 = vector.broadcast %199 : vector<1x256xf32> to vector<32x256xf32>
    %201 = arith.addf %198, %200 : vector<32x256xf32>
    %c0_66 = arith.constant 0 : index
    %c0_67 = arith.constant 0 : index
    %202 = vector.load %arg10[%c0_66, %c0_67] : memref<32x256xf32, #tpu.memory_space<vmem>>, vector<32x256xf32>
    tpu.vector_store %arg10[%c0_66, %c0_67], %201 {strides = array<i32>} : memref<32x256xf32, #tpu.memory_space<vmem>>, vector<32x256xf32>,
    %c0_68 = arith.constant 0 : index
    %c0_69 = arith.constant 0 : index
    %203 = vector.load %arg3[%c0_68, %c0_69] : memref<64x256xf32, #tpu.memory_space<vmem>>, vector<64x256xf32>
    %cst_70 = arith.constant dense<0.000000e+00> : vector<32x256xf32>
    %204 = tpu.matmul %196, %203, %cst_70 {dimension_numbers = #tpu.dot_dimension_numbers<[1], [0], [0], [1], [0, 0, 1, 1], [], []>} : vector<32x64xf32>, vector<64x256xf32>, vector<32x256xf32> -> vector<32x256xf32>
    %c0_71 = arith.constant 0 : index
    %c0_72 = arith.constant 0 : index
    %205 = vector.load %arg11[%c0_71, %c0_72] : memref<32x256xf32, #tpu.memory_space<vmem>>, vector<32x256xf32>
    tpu.vector_store %arg11[%c0_71, %c0_72], %204 {strides = array<i32>} : memref<32x256xf32, #tpu.memory_space<vmem>>, vector<32x256xf32>,
    %c0_73 = arith.constant 0 : index
    %c0_74 = arith.constant 0 : index
    %206 = vector.load %arg4[%c0_73, %c0_74] : memref<64x256xf32, #tpu.memory_space<vmem>>, vector<64x256xf32>
    %cst_75 = arith.constant 0.000000e+00 : f32
    %207 = vector.broadcast %cst_75 : f32 to vector<4x64xf32>
    %cst_76 = arith.constant 0.000000e+00 : f32
    %208 = vector.broadcast %cst_76 : f32 to vector<4x64xf32>
    %c0_77 = arith.constant 0 : index
    %c0_78 = arith.constant 0 : index
    %209 = vector.load %arg10[%c0_77, %c0_78] : memref<32x256xf32, #tpu.memory_space<vmem>>, vector<4x256xf32>
    %c28_79 = arith.constant 28 : index
    %c0_80 = arith.constant 0 : index
    %210 = vector.load %arg11[%c28_79, %c0_80] : memref<32x256xf32, #tpu.memory_space<vmem>>, vector<4x256xf32>
    %211 = arith.addf %209, %210 : vector<4x256xf32>
    %cst_81 = arith.constant dense<0.000000e+00> : vector<4x256xf32>
    %212 = tpu.matmul %207, %206, %cst_81 {dimension_numbers = #tpu.dot_dimension_numbers<[1], [0], [0], [1], [0, 0, 1, 1], [], []>} : vector<4x64xf32>, vector<64x256xf32>, vector<4x256xf32> -> vector<4x256xf32>
    %213 = arith.addf %211, %212 : vector<4x256xf32>
    %214 = arith.negf %213 : vector<4x256xf32>
    %215 = math.exp %214 : vector<4x256xf32>
    %cst_82 = arith.constant 1.000000e+00 : f32
    %216 = vector.broadcast %cst_82 : f32 to vector<4x256xf32>
    %217 = arith.addf %216, %215 : vector<4x256xf32>
    %218 = arith.divf %216, %217 : vector<4x256xf32>
    %cst_83 = arith.constant 2.000000e+00 : f32
    %219 = vector.broadcast %cst_83 : f32 to vector<4x256xf32>
    %220 = arith.mulf %219, %218 : vector<4x256xf32>
    %cst_84 = arith.constant 1.000000e+00 : f32
    %221 = vector.broadcast %cst_84 : f32 to vector<4x256xf32>
    %222 = arith.subf %220, %221 : vector<4x256xf32>
    %223 = arith.select %5, %222, %218 : vector<4x256xi1>, vector<4x256xf32>
    %224 = vector.extract_strided_slice %223 {offsets = [0, 0], sizes = [4, 64], strides = [1, 1]} : vector<4x256xf32> to vector<4x64xf32>
    %225 = vector.extract_strided_slice %223 {offsets = [0, 64], sizes = [4, 64], strides = [1, 1]} : vector<4x256xf32> to vector<4x64xf32>
    %226 = vector.extract_strided_slice %223 {offsets = [0, 128], sizes = [4, 64], strides = [1, 1]} : vector<4x256xf32> to vector<4x64xf32>
    %227 = vector.extract_strided_slice %223 {offsets = [0, 192], sizes = [4, 64], strides = [1, 1]} : vector<4x256xf32> to vector<4x64xf32>
    %228 = arith.mulf %225, %208 : vector<4x64xf32>
    %229 = arith.mulf %224, %226 : vector<4x64xf32>
    %230 = arith.addf %228, %229 : vector<4x64xf32>
    %231 = math.tanh %230 : vector<4x64xf32>
    %232 = arith.mulf %227, %231 : vector<4x64xf32>
    %c4_85 = arith.constant 4 : index
    %c0_86 = arith.constant 0 : index
    %233 = vector.load %arg10[%c4_85, %c0_86] : memref<32x256xf32, #tpu.memory_space<vmem>>, vector<4x256xf32>
    %c24_87 = arith.constant 24 : index
    %c0_88 = arith.constant 0 : index
    %234 = vector.load %arg11[%c24_87, %c0_88] : memref<32x256xf32, #tpu.memory_space<vmem>>, vector<4x256xf32>
    %235 = arith.addf %233, %234 : vector<4x256xf32>
    %cst_89 = arith.constant dense<0.000000e+00> : vector<4x256xf32>
    %236 = tpu.matmul %232, %206, %cst_89 {dimension_numbers = #tpu.dot_dimension_numbers<[1], [0], [0], [1], [0, 0, 1, 1], [], []>} : vector<4x64xf32>, vector<64x256xf32>, vector<4x256xf32> -> vector<4x256xf32>
    %237 = arith.addf %235, %236 : vector<4x256xf32>
    %238 = arith.negf %237 : vector<4x256xf32>
    %239 = math.exp %238 : vector<4x256xf32>
    %cst_90 = arith.constant 1.000000e+00 : f32
    %240 = vector.broadcast %cst_90 : f32 to vector<4x256xf32>
    %241 = arith.addf %240, %239 : vector<4x256xf32>
    %242 = arith.divf %240, %241 : vector<4x256xf32>
    %cst_91 = arith.constant 2.000000e+00 : f32
    %243 = vector.broadcast %cst_91 : f32 to vector<4x256xf32>
    %244 = arith.mulf %243, %242 : vector<4x256xf32>
    %cst_92 = arith.constant 1.000000e+00 : f32
    %245 = vector.broadcast %cst_92 : f32 to vector<4x256xf32>
    %246 = arith.subf %244, %245 : vector<4x256xf32>
    %247 = arith.select %5, %246, %242 : vector<4x256xi1>, vector<4x256xf32>
    %248 = vector.extract_strided_slice %247 {offsets = [0, 0], sizes = [4, 64], strides = [1, 1]} : vector<4x256xf32> to vector<4x64xf32>
    %249 = vector.extract_strided_slice %247 {offsets = [0, 64], sizes = [4, 64], strides = [1, 1]} : vector<4x256xf32> to vector<4x64xf32>
    %250 = vector.extract_strided_slice %247 {offsets = [0, 128], sizes = [4, 64], strides = [1, 1]} : vector<4x256xf32> to vector<4x64xf32>
    %251 = vector.extract_strided_slice %247 {offsets = [0, 192], sizes = [4, 64], strides = [1, 1]} : vector<4x256xf32> to vector<4x64xf32>
    %252 = arith.mulf %249, %230 : vector<4x64xf32>
    %253 = arith.mulf %248, %250 : vector<4x64xf32>
    %254 = arith.addf %252, %253 : vector<4x64xf32>
    %255 = math.tanh %254 : vector<4x64xf32>
    %256 = arith.mulf %251, %255 : vector<4x64xf32>
    %c8_93 = arith.constant 8 : index
    %c0_94 = arith.constant 0 : index
    %257 = vector.load %arg10[%c8_93, %c0_94] : memref<32x256xf32, #tpu.memory_space<vmem>>, vector<4x256xf32>
    %c20_95 = arith.constant 20 : index
    %c0_96 = arith.constant 0 : index
    %258 = vector.load %arg11[%c20_95, %c0_96] : memref<32x256xf32, #tpu.memory_space<vmem>>, vector<4x256xf32>
    %259 = arith.addf %257, %258 : vector<4x256xf32>
    %cst_97 = arith.constant dense<0.000000e+00> : vector<4x256xf32>
    %260 = tpu.matmul %256, %206, %cst_97 {dimension_numbers = #tpu.dot_dimension_numbers<[1], [0], [0], [1], [0, 0, 1, 1], [], []>} : vector<4x64xf32>, vector<64x256xf32>, vector<4x256xf32> -> vector<4x256xf32>
    %261 = arith.addf %259, %260 : vector<4x256xf32>
    %262 = arith.negf %261 : vector<4x256xf32>
    %263 = math.exp %262 : vector<4x256xf32>
    %cst_98 = arith.constant 1.000000e+00 : f32
    %264 = vector.broadcast %cst_98 : f32 to vector<4x256xf32>
    %265 = arith.addf %264, %263 : vector<4x256xf32>
    %266 = arith.divf %264, %265 : vector<4x256xf32>
    %cst_99 = arith.constant 2.000000e+00 : f32
    %267 = vector.broadcast %cst_99 : f32 to vector<4x256xf32>
    %268 = arith.mulf %267, %266 : vector<4x256xf32>
    %cst_100 = arith.constant 1.000000e+00 : f32
    %269 = vector.broadcast %cst_100 : f32 to vector<4x256xf32>
    %270 = arith.subf %268, %269 : vector<4x256xf32>
    %271 = arith.select %5, %270, %266 : vector<4x256xi1>, vector<4x256xf32>
    %272 = vector.extract_strided_slice %271 {offsets = [0, 0], sizes = [4, 64], strides = [1, 1]} : vector<4x256xf32> to vector<4x64xf32>
    %273 = vector.extract_strided_slice %271 {offsets = [0, 64], sizes = [4, 64], strides = [1, 1]} : vector<4x256xf32> to vector<4x64xf32>
    %274 = vector.extract_strided_slice %271 {offsets = [0, 128], sizes = [4, 64], strides = [1, 1]} : vector<4x256xf32> to vector<4x64xf32>
    %275 = vector.extract_strided_slice %271 {offsets = [0, 192], sizes = [4, 64], strides = [1, 1]} : vector<4x256xf32> to vector<4x64xf32>
    %276 = arith.mulf %273, %254 : vector<4x64xf32>
    %277 = arith.mulf %272, %274 : vector<4x64xf32>
    %278 = arith.addf %276, %277 : vector<4x64xf32>
    %279 = math.tanh %278 : vector<4x64xf32>
    %280 = arith.mulf %275, %279 : vector<4x64xf32>
    %c12_101 = arith.constant 12 : index
    %c0_102 = arith.constant 0 : index
    %281 = vector.load %arg10[%c12_101, %c0_102] : memref<32x256xf32, #tpu.memory_space<vmem>>, vector<4x256xf32>
    %c16_103 = arith.constant 16 : index
    %c0_104 = arith.constant 0 : index
    %282 = vector.load %arg11[%c16_103, %c0_104] : memref<32x256xf32, #tpu.memory_space<vmem>>, vector<4x256xf32>
    %283 = arith.addf %281, %282 : vector<4x256xf32>
    %cst_105 = arith.constant dense<0.000000e+00> : vector<4x256xf32>
    %284 = tpu.matmul %280, %206, %cst_105 {dimension_numbers = #tpu.dot_dimension_numbers<[1], [0], [0], [1], [0, 0, 1, 1], [], []>} : vector<4x64xf32>, vector<64x256xf32>, vector<4x256xf32> -> vector<4x256xf32>
    %285 = arith.addf %283, %284 : vector<4x256xf32>
    %286 = arith.negf %285 : vector<4x256xf32>
    %287 = math.exp %286 : vector<4x256xf32>
    %cst_106 = arith.constant 1.000000e+00 : f32
    %288 = vector.broadcast %cst_106 : f32 to vector<4x256xf32>
    %289 = arith.addf %288, %287 : vector<4x256xf32>
    %290 = arith.divf %288, %289 : vector<4x256xf32>
    %cst_107 = arith.constant 2.000000e+00 : f32
    %291 = vector.broadcast %cst_107 : f32 to vector<4x256xf32>
    %292 = arith.mulf %291, %290 : vector<4x256xf32>
    %cst_108 = arith.constant 1.000000e+00 : f32
    %293 = vector.broadcast %cst_108 : f32 to vector<4x256xf32>
    %294 = arith.subf %292, %293 : vector<4x256xf32>
    %295 = arith.select %5, %294, %290 : vector<4x256xi1>, vector<4x256xf32>
    %296 = vector.extract_strided_slice %295 {offsets = [0, 0], sizes = [4, 64], strides = [1, 1]} : vector<4x256xf32> to vector<4x64xf32>
    %297 = vector.extract_strided_slice %295 {offsets = [0, 64], sizes = [4, 64], strides = [1, 1]} : vector<4x256xf32> to vector<4x64xf32>
    %298 = vector.extract_strided_slice %295 {offsets = [0, 128], sizes = [4, 64], strides = [1, 1]} : vector<4x256xf32> to vector<4x64xf32>
    %299 = vector.extract_strided_slice %295 {offsets = [0, 192], sizes = [4, 64], strides = [1, 1]} : vector<4x256xf32> to vector<4x64xf32>
    %300 = arith.mulf %297, %278 : vector<4x64xf32>
    %301 = arith.mulf %296, %298 : vector<4x64xf32>
    %302 = arith.addf %300, %301 : vector<4x64xf32>
    %303 = math.tanh %302 : vector<4x64xf32>
    %304 = arith.mulf %299, %303 : vector<4x64xf32>
    %c16_109 = arith.constant 16 : index
    %c0_110 = arith.constant 0 : index
    %305 = vector.load %arg10[%c16_109, %c0_110] : memref<32x256xf32, #tpu.memory_space<vmem>>, vector<4x256xf32>
    %c12_111 = arith.constant 12 : index
    %c0_112 = arith.constant 0 : index
    %306 = vector.load %arg11[%c12_111, %c0_112] : memref<32x256xf32, #tpu.memory_space<vmem>>, vector<4x256xf32>
    %307 = arith.addf %305, %306 : vector<4x256xf32>
    %cst_113 = arith.constant dense<0.000000e+00> : vector<4x256xf32>
    %308 = tpu.matmul %304, %206, %cst_113 {dimension_numbers = #tpu.dot_dimension_numbers<[1], [0], [0], [1], [0, 0, 1, 1], [], []>} : vector<4x64xf32>, vector<64x256xf32>, vector<4x256xf32> -> vector<4x256xf32>
    %309 = arith.addf %307, %308 : vector<4x256xf32>
    %310 = arith.negf %309 : vector<4x256xf32>
    %311 = math.exp %310 : vector<4x256xf32>
    %cst_114 = arith.constant 1.000000e+00 : f32
    %312 = vector.broadcast %cst_114 : f32 to vector<4x256xf32>
    %313 = arith.addf %312, %311 : vector<4x256xf32>
    %314 = arith.divf %312, %313 : vector<4x256xf32>
    %cst_115 = arith.constant 2.000000e+00 : f32
    %315 = vector.broadcast %cst_115 : f32 to vector<4x256xf32>
    %316 = arith.mulf %315, %314 : vector<4x256xf32>
    %cst_116 = arith.constant 1.000000e+00 : f32
    %317 = vector.broadcast %cst_116 : f32 to vector<4x256xf32>
    %318 = arith.subf %316, %317 : vector<4x256xf32>
    %319 = arith.select %5, %318, %314 : vector<4x256xi1>, vector<4x256xf32>
    %320 = vector.extract_strided_slice %319 {offsets = [0, 0], sizes = [4, 64], strides = [1, 1]} : vector<4x256xf32> to vector<4x64xf32>
    %321 = vector.extract_strided_slice %319 {offsets = [0, 64], sizes = [4, 64], strides = [1, 1]} : vector<4x256xf32> to vector<4x64xf32>
    %322 = vector.extract_strided_slice %319 {offsets = [0, 128], sizes = [4, 64], strides = [1, 1]} : vector<4x256xf32> to vector<4x64xf32>
    %323 = vector.extract_strided_slice %319 {offsets = [0, 192], sizes = [4, 64], strides = [1, 1]} : vector<4x256xf32> to vector<4x64xf32>
    %324 = arith.mulf %321, %302 : vector<4x64xf32>
    %325 = arith.mulf %320, %322 : vector<4x64xf32>
    %326 = arith.addf %324, %325 : vector<4x64xf32>
    %327 = math.tanh %326 : vector<4x64xf32>
    %328 = arith.mulf %323, %327 : vector<4x64xf32>
    %c20_117 = arith.constant 20 : index
    %c0_118 = arith.constant 0 : index
    %329 = vector.load %arg10[%c20_117, %c0_118] : memref<32x256xf32, #tpu.memory_space<vmem>>, vector<4x256xf32>
    %c8_119 = arith.constant 8 : index
    %c0_120 = arith.constant 0 : index
    %330 = vector.load %arg11[%c8_119, %c0_120] : memref<32x256xf32, #tpu.memory_space<vmem>>, vector<4x256xf32>
    %331 = arith.addf %329, %330 : vector<4x256xf32>
    %cst_121 = arith.constant dense<0.000000e+00> : vector<4x256xf32>
    %332 = tpu.matmul %328, %206, %cst_121 {dimension_numbers = #tpu.dot_dimension_numbers<[1], [0], [0], [1], [0, 0, 1, 1], [], []>} : vector<4x64xf32>, vector<64x256xf32>, vector<4x256xf32> -> vector<4x256xf32>
    %333 = arith.addf %331, %332 : vector<4x256xf32>
    %334 = arith.negf %333 : vector<4x256xf32>
    %335 = math.exp %334 : vector<4x256xf32>
    %cst_122 = arith.constant 1.000000e+00 : f32
    %336 = vector.broadcast %cst_122 : f32 to vector<4x256xf32>
    %337 = arith.addf %336, %335 : vector<4x256xf32>
    %338 = arith.divf %336, %337 : vector<4x256xf32>
    %cst_123 = arith.constant 2.000000e+00 : f32
    %339 = vector.broadcast %cst_123 : f32 to vector<4x256xf32>
    %340 = arith.mulf %339, %338 : vector<4x256xf32>
    %cst_124 = arith.constant 1.000000e+00 : f32
    %341 = vector.broadcast %cst_124 : f32 to vector<4x256xf32>
    %342 = arith.subf %340, %341 : vector<4x256xf32>
    %343 = arith.select %5, %342, %338 : vector<4x256xi1>, vector<4x256xf32>
    %344 = vector.extract_strided_slice %343 {offsets = [0, 0], sizes = [4, 64], strides = [1, 1]} : vector<4x256xf32> to vector<4x64xf32>
    %345 = vector.extract_strided_slice %343 {offsets = [0, 64], sizes = [4, 64], strides = [1, 1]} : vector<4x256xf32> to vector<4x64xf32>
    %346 = vector.extract_strided_slice %343 {offsets = [0, 128], sizes = [4, 64], strides = [1, 1]} : vector<4x256xf32> to vector<4x64xf32>
    %347 = vector.extract_strided_slice %343 {offsets = [0, 192], sizes = [4, 64], strides = [1, 1]} : vector<4x256xf32> to vector<4x64xf32>
    %348 = arith.mulf %345, %326 : vector<4x64xf32>
    %349 = arith.mulf %344, %346 : vector<4x64xf32>
    %350 = arith.addf %348, %349 : vector<4x64xf32>
    %351 = math.tanh %350 : vector<4x64xf32>
    %352 = arith.mulf %347, %351 : vector<4x64xf32>
    %c24_125 = arith.constant 24 : index
    %c0_126 = arith.constant 0 : index
    %353 = vector.load %arg10[%c24_125, %c0_126] : memref<32x256xf32, #tpu.memory_space<vmem>>, vector<4x256xf32>
    %c4_127 = arith.constant 4 : index
    %c0_128 = arith.constant 0 : index
    %354 = vector.load %arg11[%c4_127, %c0_128] : memref<32x256xf32, #tpu.memory_space<vmem>>, vector<4x256xf32>
    %355 = arith.addf %353, %354 : vector<4x256xf32>
    %cst_129 = arith.constant dense<0.000000e+00> : vector<4x256xf32>
    %356 = tpu.matmul %352, %206, %cst_129 {dimension_numbers = #tpu.dot_dimension_numbers<[1], [0], [0], [1], [0, 0, 1, 1], [], []>} : vector<4x64xf32>, vector<64x256xf32>, vector<4x256xf32> -> vector<4x256xf32>
    %357 = arith.addf %355, %356 : vector<4x256xf32>
    %358 = arith.negf %357 : vector<4x256xf32>
    %359 = math.exp %358 : vector<4x256xf32>
    %cst_130 = arith.constant 1.000000e+00 : f32
    %360 = vector.broadcast %cst_130 : f32 to vector<4x256xf32>
    %361 = arith.addf %360, %359 : vector<4x256xf32>
    %362 = arith.divf %360, %361 : vector<4x256xf32>
    %cst_131 = arith.constant 2.000000e+00 : f32
    %363 = vector.broadcast %cst_131 : f32 to vector<4x256xf32>
    %364 = arith.mulf %363, %362 : vector<4x256xf32>
    %cst_132 = arith.constant 1.000000e+00 : f32
    %365 = vector.broadcast %cst_132 : f32 to vector<4x256xf32>
    %366 = arith.subf %364, %365 : vector<4x256xf32>
    %367 = arith.select %5, %366, %362 : vector<4x256xi1>, vector<4x256xf32>
    %368 = vector.extract_strided_slice %367 {offsets = [0, 0], sizes = [4, 64], strides = [1, 1]} : vector<4x256xf32> to vector<4x64xf32>
    %369 = vector.extract_strided_slice %367 {offsets = [0, 64], sizes = [4, 64], strides = [1, 1]} : vector<4x256xf32> to vector<4x64xf32>
    %370 = vector.extract_strided_slice %367 {offsets = [0, 128], sizes = [4, 64], strides = [1, 1]} : vector<4x256xf32> to vector<4x64xf32>
    %371 = vector.extract_strided_slice %367 {offsets = [0, 192], sizes = [4, 64], strides = [1, 1]} : vector<4x256xf32> to vector<4x64xf32>
    %372 = arith.mulf %369, %350 : vector<4x64xf32>
    %373 = arith.mulf %368, %370 : vector<4x64xf32>
    %374 = arith.addf %372, %373 : vector<4x64xf32>
    %375 = math.tanh %374 : vector<4x64xf32>
    %376 = arith.mulf %371, %375 : vector<4x64xf32>
    %c28_133 = arith.constant 28 : index
    %c0_134 = arith.constant 0 : index
    %377 = vector.load %arg10[%c28_133, %c0_134] : memref<32x256xf32, #tpu.memory_space<vmem>>, vector<4x256xf32>
    %c0_135 = arith.constant 0 : index
    %c0_136 = arith.constant 0 : index
    %378 = vector.load %arg11[%c0_135, %c0_136] : memref<32x256xf32, #tpu.memory_space<vmem>>, vector<4x256xf32>
    %379 = arith.addf %377, %378 : vector<4x256xf32>
    %cst_137 = arith.constant dense<0.000000e+00> : vector<4x256xf32>
    %380 = tpu.matmul %376, %206, %cst_137 {dimension_numbers = #tpu.dot_dimension_numbers<[1], [0], [0], [1], [0, 0, 1, 1], [], []>} : vector<4x64xf32>, vector<64x256xf32>, vector<4x256xf32> -> vector<4x256xf32>
    %381 = arith.addf %379, %380 : vector<4x256xf32>
    %382 = arith.negf %381 : vector<4x256xf32>
    %383 = math.exp %382 : vector<4x256xf32>
    %cst_138 = arith.constant 1.000000e+00 : f32
    %384 = vector.broadcast %cst_138 : f32 to vector<4x256xf32>
    %385 = arith.addf %384, %383 : vector<4x256xf32>
    %386 = arith.divf %384, %385 : vector<4x256xf32>
    %cst_139 = arith.constant 2.000000e+00 : f32
    %387 = vector.broadcast %cst_139 : f32 to vector<4x256xf32>
    %388 = arith.mulf %387, %386 : vector<4x256xf32>
    %cst_140 = arith.constant 1.000000e+00 : f32
    %389 = vector.broadcast %cst_140 : f32 to vector<4x256xf32>
    %390 = arith.subf %388, %389 : vector<4x256xf32>
    %391 = arith.select %5, %390, %386 : vector<4x256xi1>, vector<4x256xf32>
    %392 = vector.extract_strided_slice %391 {offsets = [0, 0], sizes = [4, 64], strides = [1, 1]} : vector<4x256xf32> to vector<4x64xf32>
    %393 = vector.extract_strided_slice %391 {offsets = [0, 64], sizes = [4, 64], strides = [1, 1]} : vector<4x256xf32> to vector<4x64xf32>
    %394 = vector.extract_strided_slice %391 {offsets = [0, 128], sizes = [4, 64], strides = [1, 1]} : vector<4x256xf32> to vector<4x64xf32>
    %395 = vector.extract_strided_slice %391 {offsets = [0, 192], sizes = [4, 64], strides = [1, 1]} : vector<4x256xf32> to vector<4x64xf32>
    %396 = arith.mulf %393, %374 : vector<4x64xf32>
    %397 = arith.mulf %392, %394 : vector<4x64xf32>
    %398 = arith.addf %396, %397 : vector<4x64xf32>
    %399 = math.tanh %398 : vector<4x64xf32>
    %400 = arith.mulf %395, %399 : vector<4x64xf32>
    %401 = arith.select %8, %400, %232 : vector<4x64xi1>, vector<4x64xf32>
    %c0_141 = arith.constant 0 : index
    %c0_142 = arith.constant 0 : index
    %402 = vector.load %arg6[%c0_141, %c0_142] : memref<64x2xf32, #tpu.memory_space<vmem>>, vector<64x2xf32>
    %cst_143 = arith.constant dense<0.000000e+00> : vector<4x2xf32>
    %403 = tpu.matmul %401, %402, %cst_143 {dimension_numbers = #tpu.dot_dimension_numbers<[1], [0], [0], [1], [0, 0, 1, 1], [], []>} : vector<4x64xf32>, vector<64x2xf32>, vector<4x2xf32> -> vector<4x2xf32>
    %c0_144 = arith.constant 0 : index
    %c0_145 = arith.constant 0 : index
    %404 = vector.load %arg7[%c0_144, %c0_145] : memref<1x2xf32, #tpu.memory_space<vmem>>, vector<1x2xf32>
    %405 = vector.broadcast %404 : vector<1x2xf32> to vector<4x2xf32>
    %406 = arith.addf %403, %405 : vector<4x2xf32>
    %c0_146 = arith.constant 0 : index
    %c0_147 = arith.constant 0 : index
    %407 = vector.load %arg8[%c0_146, %c0_147] : memref<4x2xf32, #tpu.memory_space<vmem>>, vector<4x2xf32>
    tpu.vector_store %arg8[%c0_146, %c0_147], %406 {strides = array<i32>} : memref<4x2xf32, #tpu.memory_space<vmem>>, vector<4x2xf32>,
    return
  }
}

</mosaic_0001>

<bundles_post_ra>
// kernel: my_model_forward.1
= control target key start
LH: loop header
LB: loop body
LE: loop exit
PB: predicated region body
PF: predicated region fallthrough
CT: control target
= control target key end

     0   :  { %13 = vsyncpa [#allocation6], 0  ;;  %s3234_s0 = inlined_call_operand.vmem [shape: f32[32,256], index: 0, kind: input, shape index: {}]   ;;  %s3235_s1 = inlined_call_operand.vmem [shape: f32[64,256], index: 1, kind: input, shape index: {}]   ;;  %s3236_s2 = inlined_call_operand.hbm [shape: f32[64,256], index: 2, kind: input, shape index: {}]   ;;  %s3237_s3 = inlined_call_operand.hbm [shape: f32[64,256], index: 3, kind: input, shape index: {}]   ;;  %s3238_s4 = inlined_call_operand.hbm [shape: f32[64,256], index: 4, kind: input, shape index: {}]   ;;  %s3239_s5 = inlined_call_operand.vmem [shape: f32[1,256], index: 5, kind: input, shape index: {}]   ;;  %s3240_s6 = inlined_call_operand.vmem [shape: f32[64,2], index: 6, kind: input, shape index: {}]   ;;  %s3241_s7 = inlined_call_operand.vmem [shape: f32[1,2], index: 7, kind: input, shape index: {}]   ;;  %s3242_s8 = inlined_call_operand.vmem [shape: f32[4,2], index: 8, kind: output, shape index: {}]  }
   0x1   :  { %14 = vsyncpa [#allocation8], 0  ;;  %s36_s29 = sshll.u32 %s3237_s3, 4  ;;  %s2536_s30 = smov [#allocation7]   ;;  %s37_s29 = int_to_ptr.hbm [resolvable:$true] %s36_s29 }
   0x2   :  { %s38_s9 = sshll.u32 %s2536_s30, 4  ;;  %s23_s12 = sshll.u32 %s3236_s2, 4  ;;  %s39_s9 = int_to_ptr.vmem [resolvable:$true] %s38_s9  ;;  %s24_s12 = int_to_ptr.hbm [resolvable:$true] %s23_s12 }
   0x3   :  { %s2537_s13 = smov 256   ;;  %s2538_s14 = smov 16  }
   0x4   :  { %44 = dma.hbm_to_vmem [thread:$0]  %s37_s29, 2048, %s39_s9, [#allocation8], %s2537_s13, %s2537_s13, %s2538_s14  }
   0x5   :  { %s2539_s15 = smov [#allocation5]   ;;  %s49_s19 = sshll.u32 %s3238_s4, 4  ;;  %s50_s19 = int_to_ptr.hbm [resolvable:$true] %s49_s19 }
   0x6   :  { %s25_s16 = sshll.u32 %s2539_s15, 4  ;;  %s2540_s3 = smov [#allocation9]   ;;  %s26_s16 = int_to_ptr.vmem [resolvable:$true] %s25_s16 }
   0x7   :  { %31 = dma.hbm_to_vmem [thread:$0]  %s24_s12, 2048, %s26_s16, [#allocation6], %s2537_s13, %s2537_s13, %s2538_s14  }
   0x8   :  { %s51_s20 = sshll.u32 %s2540_s3, 4  ;;  %s52_s20 = int_to_ptr.vmem [resolvable:$true] %s51_s20 }
   0x9   :  { %57 = dma.hbm_to_vmem [thread:$0]  %s50_s19, 2048, %s52_s20, [#allocation8], %s2537_s13, %s2537_s13, %s2538_s14  }
   0xa   :  { %2532 = dma.done.wait [#allocation6], 2048  }
   0xb   :  { %2533 = vsyncadd [#allocation6], 4294965248 }
   0xc   :  { %2534 = dma.done.wait [#allocation8], 4096  }
   0xd   :  { %2535 = vsyncadd [#allocation8], 4294963200  ;;  %v2600_v0 = vld [vmem:[%s3235_s1 + $0x70] sm:$0xff]  ;;  %v2605_v1 = vld [vmem:[%s3235_s1 + $0x78] sm:$0xff]  ;;  %v2541_v16 = vmov 0.0   ;;  %v76_v31 = vlaneseq  ;;  %s2542_s29 = smov 64  }
   0xe   :  { %v2610_v2 = vld [vmem:[%s3235_s1 + $0x60] sm:$0xff]  ;;  %116 = vmatpush.msra.mxu0 %v2600_v0  ;;  %136 = vmatpush.msra.mxu1 %v2605_v1  ;;  %v2617_v3 = vld [vmem:[%s3235_s1 + $0x68] sm:$0xff]  ;;  %v2622_v4 = vld [vmem:[%s3235_s1 + $0x50] sm:$0xff]  ;;  %vm207_vm9 = vcmask 519168   ;;  %vm104_vm10 = vcmask 523264  }
   0xf   :  { %v2627_v5 = vld [vmem:[%s3235_s1 + $0x58] sm:$0xff]  ;;  %221 = vmatpush.msra.mxu2 %v2600_v0  ;;  %241 = vmatpush.msra.mxu3 %v2605_v1  ;;  %v2636_v6 = vld [vmem:[%s3235_s1 + $0x40] sm:$0xff]  ;;  %v2641_v7 = vld [vmem:[%s3235_s1 + $0x48] sm:$0xff]  ;;  %v2765_v36 = vand.u32 127, %v76_v31 }
  0x10   :  { %117 = vmatpush.msra.mxu0 %v2610_v2  ;;  %137 = vmatpush.msra.mxu1 %v2617_v3  ;;  %v2650_v8 = vld [vmem:[%s3235_s1 + $0x30] sm:$0xff]  ;;  %v2655_v9 = vld [vmem:[%s3235_s1 + $0x38] sm:$0xff]  ;;  %v2664_v10 = vld [vmem:[%s3235_s1 + $0x20] sm:$0xff] }
  0x11   :  { %222 = vmatpush.msra.mxu2 %v2610_v2  ;;  %242 = vmatpush.msra.mxu3 %v2617_v3  ;;  %v2669_v11 = vld [vmem:[%s3235_s1 + $0x28] sm:$0xff]  ;;  %v2678_v12 = vld [vmem:[%s3235_s1 + $0x10] sm:$0xff]  ;;  %v2683_v13 = vld [vmem:[%s3235_s1 + $0x18] sm:$0xff]  ;;  %v2768_v42 = vadd.s32 128, %v2765_v36 }
  0x12   :  { %118 = vmatpush.msra.mxu0 %v2622_v4  ;;  %138 = vmatpush.msra.mxu1 %v2627_v5  ;;  %v2692_v14 = vld [vmem:[%s3235_s1] sm:$0xff]  ;;  %v2697_v15 = vld [vmem:[%s3235_s1 + $0x8] sm:$0xff] }
  0x13   :  { %223 = vmatpush.msra.mxu2 %v2622_v4  ;;  %243 = vmatpush.msra.mxu3 %v2627_v5  ;;  %v102_v17 = vld [vmem:[%s3234_s0] sm:$0xf]  ;;  %v103_v18 = vld [vmem:[%s3234_s0 + $0x8] sm:$0xf]  ;;  %vm82_vm7 = vcmp.lt.s32.totalorder %v2768_v42, 192 }
  0x14   :  { %119 = vmatpush.msra.mxu0 %v2636_v6  ;;  %139 = vmatpush.msra.mxu1 %v2641_v7  ;;  %v209_v62 = vld [vmem:[%s3234_s0] sm:$0xf0] }
  0x15   :  { %224 = vmatpush.msra.mxu2 %v2636_v6  ;;  %244 = vmatpush.msra.mxu3 %v2641_v7  ;;  %v2144_v42 = vld [vmem:[%s3240_s6 + $0x20] sm:$0xff] }
  0x16   :  { %120 = vmatpush.msra.mxu0 %v2650_v8  ;;  %140 = vmatpush.msra.mxu1 %v2655_v9 }
  0x17   :  { %225 = vmatpush.msra.mxu2 %v2650_v8  ;;  %245 = vmatpush.msra.mxu3 %v2655_v9 }
  0x18   :  { %121 = vmatpush.msra.mxu0 %v2664_v10  ;;  %141 = vmatpush.msra.mxu1 %v2669_v11 }
  0x19   :  { %226 = vmatpush.msra.mxu2 %v2664_v10  ;;  %246 = vmatpush.msra.mxu3 %v2669_v11 }
  0x1a   :  { %122 = vmatpush.msra.mxu0 %v2678_v12  ;;  %142 = vmatpush.msra.mxu1 %v2683_v13 }
  0x1b   :  { %227 = vmatpush.msra.mxu2 %v2678_v12  ;;  %247 = vmatpush.msra.mxu3 %v2683_v13 }
  0x1c   :  { %123 = vmatpush.msra.mxu0 %v2692_v14  ;;  %143 = vmatpush.msra.mxu1 %v2697_v15 }
  0x1d   :  { %124 = vmatmul.f32.vlgmr.msra.gmra.mxu0 %v2541_v16  ;;  %144 = vmatmul.f32.vlgmr.msra.gmra.mxu1 %v2541_v16 }
  0x1e   :  { %228 = vmatpush.msra.mxu2 %v2692_v14  ;;  %248 = vmatpush.msra.mxu3 %v2697_v15 }
  0x1f   :  { %338 = vmatpush.msrb.mxu0 %v2600_v0  ;;  %358 = vmatpush.msrb.mxu1 %v2605_v1 }
  0x20   :  { %445 = vmatpush.msrb.mxu2 %v2600_v0  ;;  %465 = vmatpush.msrb.mxu3 %v2605_v1 }
  0x21   :  { %339 = vmatpush.msrb.mxu0 %v2610_v2  ;;  %359 = vmatpush.msrb.mxu1 %v2617_v3 }
  0x22   :  { %446 = vmatpush.msrb.mxu2 %v2610_v2  ;;  %466 = vmatpush.msrb.mxu3 %v2617_v3 }
  0x23   :  { %340 = vmatpush.msrb.mxu0 %v2622_v4  ;;  %360 = vmatpush.msrb.mxu1 %v2627_v5 }
  0x24   :  { %447 = vmatpush.msrb.mxu2 %v2622_v4  ;;  %467 = vmatpush.msrb.mxu3 %v2627_v5 }
  0x25   :  { %341 = vmatpush.msrb.mxu0 %v2636_v6  ;;  %361 = vmatpush.msrb.mxu1 %v2641_v7 }
  0x26   :  { %448 = vmatpush.msrb.mxu2 %v2636_v6  ;;  %468 = vmatpush.msrb.mxu3 %v2641_v7 }
  0x27   :  { %342 = vmatpush.msrb.mxu0 %v2650_v8  ;;  %362 = vmatpush.msrb.mxu1 %v2655_v9 }
  0x28   :  { %449 = vmatpush.msrb.mxu2 %v2650_v8  ;;  %469 = vmatpush.msrb.mxu3 %v2655_v9 }
  0x29   :  { %343 = vmatpush.msrb.mxu0 %v2664_v10  ;;  %363 = vmatpush.msrb.mxu1 %v2669_v11 }
  0x2a   :  { %450 = vmatpush.msrb.mxu2 %v2664_v10  ;;  %470 = vmatpush.msrb.mxu3 %v2669_v11 }
  0x2b   :  { %344 = vmatpush.msrb.mxu0 %v2678_v12  ;;  %364 = vmatpush.msrb.mxu1 %v2683_v13 }
  0x2c   :  { %451 = vmatpush.msrb.mxu2 %v2678_v12  ;;  %471 = vmatpush.msrb.mxu3 %v2683_v13 }
  0x2d   :  { %345 = vmatpush.msrb.mxu0 %v2692_v14  ;;  %365 = vmatpush.msrb.mxu1 %v2697_v15 }
  0x2e   :  { %452 = vmatpush.msrb.mxu2 %v2692_v14  ;;  %472 = vmatpush.msrb.mxu3 %v2697_v15 }
  0x2f   :  { %561 = vmatpush.msra.mxu0 %v2600_v0  ;;  %581 = vmatpush.msra.mxu1 %v2605_v1 }
  0x31   :  { %562 = vmatpush.msra.mxu0 %v2610_v2  ;;  %582 = vmatpush.msra.mxu1 %v2617_v3 }
  0x33   :  { %563 = vmatpush.msra.mxu0 %v2622_v4  ;;  %583 = vmatpush.msra.mxu1 %v2627_v5 }
  0x35   :  { %564 = vmatpush.msra.mxu0 %v2636_v6  ;;  %584 = vmatpush.msra.mxu1 %v2641_v7 }
  0x37   :  { %565 = vmatpush.msra.mxu0 %v2650_v8  ;;  %585 = vmatpush.msra.mxu1 %v2655_v9 }
  0x39   :  { %566 = vmatpush.msra.mxu0 %v2664_v10  ;;  %586 = vmatpush.msra.mxu1 %v2669_v11 }
  0x3b   :  { %567 = vmatpush.msra.mxu0 %v2678_v12  ;;  %587 = vmatpush.msra.mxu1 %v2683_v13 }
  0x3d   :  { %568 = vmatpush.msra.mxu0 %v2692_v14  ;;  %588 = vmatpush.msra.mxu1 %v2697_v15 }
  0x9a   :  { %v125_v19 = vpop.f32.mrf.mxu0  ;;  %v145_v20 = vpop.f32.mrf.mxu1 }
  0x9b   :  { %v148_v21 = vadd.f32 %v125_v19, %v102_v17  ;;  %v149_v22 = vadd.f32 %v145_v20, %v103_v18  ;;  %v210_v17 = vld [vmem:[%s3234_s0 + $0x8] sm:$0xf0] }
  0x9d   :  { %v2183_v23 = vmul.f32 -1.442695, %v148_v21  ;;  %v2184_v24 = vmul.f32 -1.442695, %v149_v22 }
  0x9f   :  { %2300 = vpow2.f32 %v2183_v23 }
  0xa0   :  { %2302 = vpow2.f32 %v2184_v24 }
  0xa5   :  { %v2301_v25 = vpop.eup %2300 }
  0xa6   :  { %v2303_v26 = vpop.eup %2302  ;;  %v156_v27 = vadd.f32 1.0, %v2301_v25 }
  0xa7   :  { %v157_v28 = vadd.f32 1.0, %v2303_v26 }
  0xa8   :  { %2304 = vrcp.f32 %v156_v27  ;;  %v169_v45 = vand.u32 2147483648, %v156_v27  ;;  %vm163_vm5 = vweird.f32 %v156_v27  ;;  %v167_v47 = vand.u32 2147483647, %v156_v27 }
  0xa9   :  { %2306 = vrcp.f32 %v157_v28  ;;  %v184_v38 = vand.u32 2147483648, %v157_v28  ;;  %v182_v40 = vand.u32 2147483647, %v157_v28  ;;  %vm178_vm1 = vweird.f32 %v157_v28 }
  0xaa   :  { %v170_v51 = vor.u32 1.1754944e-38, %v169_v45  ;;  %vm168_vm8 = vcmp.eq.f32.partialorder %v167_v47, 8.507059e+37 }
  0xab   :  { %v185_v44 = vor.u32 1.1754944e-38, %v184_v38  ;;  %vm183_vm4 = vcmp.eq.f32.partialorder %v182_v40, 8.507059e+37 }
  0xae   :  { %v2305_v29 = vpop.eup %2304 }
  0xaf   :  { %v2307_v30 = vpop.eup %2306  ;;  %v159_v32 = vmul.f32 %v2305_v29, %v156_v27  ;;  %vm164_vm2 = vweird.f32 %v2305_v29 }
  0xb0   :  { %v174_v33 = vmul.f32 %v2307_v30, %v157_v28  ;;  %vm179_vm0 = vweird.f32 %v2307_v30  ;;  %vm165_vm6 = vmor %vm163_vm5, %vm164_vm2 }
  0xb1   :  { %v160_v34 = vsub.f32 1.0, %v159_v32  ;;  %vm180_vm3 = vmor %vm178_vm1, %vm179_vm0 }
  0xb2   :  { %v175_v35 = vsub.f32 1.0, %v174_v33 }
  0xb3   :  { %v161_v37 = vmul.f32 %v2305_v29, %v160_v34 }
  0xb4   :  { %v176_v39 = vmul.f32 %v2307_v30, %v175_v35 }
  0xb5   :  { %v162_v43 = vadd.f32 %v2305_v29, %v161_v37 }
  0xb6   :  { %v177_v41 = vadd.f32 %v2307_v30, %v176_v39 }
  0xb7   :  { %v166_v50 = vsel %vm165_vm6, %v2305_v29, %v162_v43 }
  0xb8   :  { %v181_v46 = vsel %vm180_vm3, %v2307_v30, %v177_v41  ;;  %v171_v53 = vsel %vm168_vm8, %v170_v51, %v166_v50 }
  0xb9   :  { %v186_v48 = vsel %vm183_vm4, %v185_v44, %v181_v46  ;;  %v194_v56 = vmul.f32 0.0, %v171_v53 }
  0xba   :  { %v189_v49 = vmul.f32 2.0, %v186_v48 }
  0xbc   :  { %v2186_v52 = vadd.f32 -1.0, %v189_v49 }
  0xbe   :  { %v193_v54 = vsel %vm82_vm7, %v2186_v52, %v186_v48 }
  0xbf   :  { %v195_v55 = vmul.f32 %v193_v54, %v171_v53 }
  0xc1   :  { %197 = vrot.lane.b32.xlu0 %v195_v55, %s2542_s29 }
 0x133   :  { %v198_v57 = vpop.permute.xlu0 %197 }
 0x134   :  { %v2774_v58 = vadd.f32 %v198_v57, %v194_v56 }
 0x136   :  { %2308 = vtanh.f32 %v2774_v58  ;;  %v306_v46 = vrot.slane %v2774_v58, 4 }
 0x13c   :  { %v2309_v59 = vpop.eup %2308 }
 0x13d   :  { %v202_v60 = vmul.f32 %v2309_v59, %v193_v54 }
 0x13f   :  { %204 = vrot.lane.b32.xlu0 %v202_v60, %s2542_s29 }
 0x1b1   :  { %v205_v61 = vpop.permute.xlu0 %204 }
 0x1b2   :  { %208 = vst.msk [vmem:[#allocation2] sm:$0xf] %vm207_vm9, %v205_v61  ;;  %2187 = vmatmul.msk.f32.vlgmr.msra.gmra.mxu2 %vm104_vm10, %v205_v61  ;;  %2188 = vmatmul.msk.f32.vlgmr.msra.gmra.mxu3 %vm104_vm10, %v205_v61 }
 0x1b3   :  { %668 = vmatpush.msra.mxu2 %v2600_v0  ;;  %688 = vmatpush.msra.mxu3 %v2605_v1 }
 0x1b5   :  { %669 = vmatpush.msra.mxu2 %v2610_v2  ;;  %689 = vmatpush.msra.mxu3 %v2617_v3 }
 0x1b7   :  { %670 = vmatpush.msra.mxu2 %v2622_v4  ;;  %690 = vmatpush.msra.mxu3 %v2627_v5 }
 0x1b9   :  { %671 = vmatpush.msra.mxu2 %v2636_v6  ;;  %691 = vmatpush.msra.mxu3 %v2641_v7 }
 0x1bb   :  { %672 = vmatpush.msra.mxu2 %v2650_v8  ;;  %692 = vmatpush.msra.mxu3 %v2655_v9 }
 0x1bd   :  { %673 = vmatpush.msra.mxu2 %v2664_v10  ;;  %693 = vmatpush.msra.mxu3 %v2669_v11 }
 0x1bf   :  { %674 = vmatpush.msra.mxu2 %v2678_v12  ;;  %694 = vmatpush.msra.mxu3 %v2683_v13 }
 0x1c1   :  { %675 = vmatpush.msra.mxu2 %v2692_v14  ;;  %695 = vmatpush.msra.mxu3 %v2697_v15 }
 0x235   :  { %v230_v63 = vpop.f32.mrf.mxu2  ;;  %v250_v18 = vpop.f32.mrf.mxu3 }
 0x236   :  { %v255_v19 = vrot.slane %v230_v63, 4  ;;  %v256_v20 = vrot.slane %v250_v18, 4  ;;  %v323_v63 = vld [vmem:[%s3234_s0 + $0x10] sm:$0xf] }
 0x238   :  { %v259_v21 = vadd.f32 %v255_v19, %v209_v62  ;;  %v260_v22 = vadd.f32 %v256_v20, %v210_v17  ;;  %v324_v17 = vld [vmem:[%s3234_s0 + $0x18] sm:$0xf] }
 0x23a   :  { %v2189_v23 = vmul.f32 -1.442695, %v259_v21  ;;  %v2190_v24 = vmul.f32 -1.442695, %v260_v22 }
 0x23c   :  { %2310 = vpow2.f32 %v2189_v23 }
 0x23d   :  { %2312 = vpow2.f32 %v2190_v24 }
 0x242   :  { %v2311_v25 = vpop.eup %2310 }
 0x243   :  { %v2313_v26 = vpop.eup %2312  ;;  %v267_v27 = vadd.f32 1.0, %v2311_v25 }
 0x244   :  { %v268_v28 = vadd.f32 1.0, %v2313_v26 }
 0x245   :  { %2314 = vrcp.f32 %v267_v27  ;;  %v280_v34 = vand.u32 2147483648, %v267_v27  ;;  %v278_v38 = vand.u32 2147483647, %v267_v27  ;;  %vm274_vm13 = vweird.f32 %v267_v27 }
 0x246   :  { %2316 = vrcp.f32 %v268_v28  ;;  %v295_v39 = vand.u32 2147483648, %v268_v28  ;;  %v293_v41 = vand.u32 2147483647, %v268_v28  ;;  %vm289_vm15 = vweird.f32 %v268_v28 }
 0x247   :  { %v281_v44 = vor.u32 1.1754944e-38, %v280_v34  ;;  %vm279_vm0 = vcmp.eq.f32.partialorder %v278_v38, 8.507059e+37 }
 0x248   :  { %v296_v48 = vor.u32 1.1754944e-38, %v295_v39  ;;  %vm294_vm2 = vcmp.eq.f32.partialorder %v293_v41, 8.507059e+37 }
 0x24b   :  { %v2315_v29 = vpop.eup %2314 }
 0x24c   :  { %v2317_v30 = vpop.eup %2316  ;;  %v270_v31 = vmul.f32 %v2315_v29, %v267_v27  ;;  %vm275_vm11 = vweird.f32 %v2315_v29 }
 0x24d   :  { %v285_v32 = vmul.f32 %v2317_v30, %v268_v28  ;;  %vm290_vm12 = vweird.f32 %v2317_v30  ;;  %vm276_vm14 = vmor %vm274_vm13, %vm275_vm11 }
 0x24e   :  { %v271_v33 = vsub.f32 1.0, %v270_v31  ;;  %vm291_vm1 = vmor %vm289_vm15, %vm290_vm12 }
 0x24f   :  { %v286_v35 = vsub.f32 1.0, %v285_v32 }
 0x250   :  { %v272_v37 = vmul.f32 %v2315_v29, %v271_v33 }
 0x251   :  { %v287_v40 = vmul.f32 %v2317_v30, %v286_v35 }
 0x252   :  { %v273_v43 = vadd.f32 %v2315_v29, %v272_v37 }
 0x253   :  { %v288_v45 = vadd.f32 %v2317_v30, %v287_v40 }
 0x254   :  { %v277_v47 = vsel %vm276_vm14, %v2315_v29, %v273_v43 }
 0x255   :  { %v282_v49 = vsel %vm279_vm0, %v281_v44, %v277_v47  ;;  %v292_v50 = vsel %vm291_vm1, %v2317_v30, %v288_v45 }
 0x256   :  { %v297_v51 = vsel %vm294_vm2, %v296_v48, %v292_v50  ;;  %v308_v52 = vmul.f32 %v306_v46, %v282_v49 }
 0x257   :  { %v300_v53 = vmul.f32 2.0, %v297_v51 }
 0x259   :  { %v2192_v54 = vadd.f32 -1.0, %v300_v53 }
 0x25b   :  { %v304_v55 = vsel %vm82_vm7, %v2192_v54, %v297_v51 }
 0x25c   :  { %v309_v56 = vmul.f32 %v304_v55, %v282_v49 }
 0x25e   :  { %311 = vrot.lane.b32.xlu1 %v309_v56, %s2542_s29 }
 0x2d0   :  { %v312_v57 = vpop.permute.xlu1 %311 }
 0x2d1   :  { %v2807_v59 = vadd.f32 %v312_v57, %v308_v52 }
 0x2d3   :  { %2318 = vtanh.f32 %v2807_v59  ;;  %v417_v45 = vrot.slane %v2807_v59, 4 }
 0x2d9   :  { %v2319_v58 = vpop.eup %2318 }
 0x2da   :  { %v2810_v60 = vmul.f32 %v2319_v58, %v304_v55 }
 0x2dc   :  { %v325_v61 = vrot.slane %v2810_v60, 4 }
 0x2de   :  { %326 = vrot.lane.b32.xlu1 %v325_v61, %s2542_s29 }
 0x350   :  { %v327_v62 = vpop.permute.xlu1 %326 }
 0x351   :  { %2193 = vmatmul.msk.f32.vlgmr.msrb.gmra.mxu0 %vm104_vm10, %v327_v62  ;;  %2194 = vmatmul.msk.f32.vlgmr.msrb.gmra.mxu1 %vm104_vm10, %v327_v62 }
 0x352   :  { %784 = vmatpush.msrb.mxu0 %v2600_v0  ;;  %804 = vmatpush.msrb.mxu1 %v2605_v1 }
 0x354   :  { %785 = vmatpush.msrb.mxu0 %v2610_v2  ;;  %805 = vmatpush.msrb.mxu1 %v2617_v3 }
 0x356   :  { %786 = vmatpush.msrb.mxu0 %v2622_v4  ;;  %806 = vmatpush.msrb.mxu1 %v2627_v5 }
 0x358   :  { %787 = vmatpush.msrb.mxu0 %v2636_v6  ;;  %807 = vmatpush.msrb.mxu1 %v2641_v7 }
 0x35a   :  { %788 = vmatpush.msrb.mxu0 %v2650_v8  ;;  %808 = vmatpush.msrb.mxu1 %v2655_v9 }
 0x35c   :  { %789 = vmatpush.msrb.mxu0 %v2664_v10  ;;  %809 = vmatpush.msrb.mxu1 %v2669_v11 }
 0x35e   :  { %790 = vmatpush.msrb.mxu0 %v2678_v12  ;;  %810 = vmatpush.msrb.mxu1 %v2683_v13 }
 0x360   :  { %791 = vmatpush.msrb.mxu0 %v2692_v14  ;;  %811 = vmatpush.msrb.mxu1 %v2697_v15 }
 0x3ce   :  { %v347_v18 = vpop.f32.mrf.mxu0  ;;  %v367_v19 = vpop.f32.mrf.mxu1 }
 0x3cf   :  { %v370_v20 = vadd.f32 %v347_v18, %v323_v63  ;;  %v371_v21 = vadd.f32 %v367_v19, %v324_v17 }
 0x3d1   :  { %v2195_v22 = vmul.f32 -1.442695, %v370_v20  ;;  %v2196_v23 = vmul.f32 -1.442695, %v371_v21 }
 0x3d3   :  { %2320 = vpow2.f32 %v2195_v22 }
 0x3d4   :  { %2322 = vpow2.f32 %v2196_v23 }
 0x3d9   :  { %v2321_v24 = vpop.eup %2320 }
 0x3da   :  { %v2323_v25 = vpop.eup %2322  ;;  %v378_v26 = vadd.f32 1.0, %v2321_v24 }
 0x3db   :  { %v379_v27 = vadd.f32 1.0, %v2323_v25 }
 0x3dc   :  { %2324 = vrcp.f32 %v378_v26  ;;  %v391_v33 = vand.u32 2147483648, %v378_v26  ;;  %v389_v37 = vand.u32 2147483647, %v378_v26  ;;  %vm385_vm5 = vweird.f32 %v378_v26 }
 0x3dd   :  { %2326 = vrcp.f32 %v379_v27  ;;  %v406_v38 = vand.u32 2147483648, %v379_v27  ;;  %v404_v40 = vand.u32 2147483647, %v379_v27  ;;  %vm400_vm8 = vweird.f32 %v379_v27 }
 0x3de   :  { %v392_v43 = vor.u32 1.1754944e-38, %v391_v33  ;;  %vm390_vm11 = vcmp.eq.f32.partialorder %v389_v37, 8.507059e+37 }
 0x3df   :  { %v407_v47 = vor.u32 1.1754944e-38, %v406_v38  ;;  %vm405_vm13 = vcmp.eq.f32.partialorder %v404_v40, 8.507059e+37 }
 0x3e2   :  { %v2325_v28 = vpop.eup %2324 }
 0x3e3   :  { %v2327_v29 = vpop.eup %2326  ;;  %v381_v30 = vmul.f32 %v2325_v28, %v378_v26  ;;  %vm386_vm3 = vweird.f32 %v2325_v28 }
 0x3e4   :  { %v396_v31 = vmul.f32 %v2327_v29, %v379_v27  ;;  %vm401_vm4 = vweird.f32 %v2327_v29  ;;  %vm387_vm6 = vmor %vm385_vm5, %vm386_vm3 }
 0x3e5   :  { %v382_v32 = vsub.f32 1.0, %v381_v30  ;;  %vm402_vm12 = vmor %vm400_vm8, %vm401_vm4 }
 0x3e6   :  { %v397_v34 = vsub.f32 1.0, %v396_v31 }
 0x3e7   :  { %v383_v35 = vmul.f32 %v2325_v28, %v382_v32 }
 0x3e8   :  { %v398_v39 = vmul.f32 %v2327_v29, %v397_v34 }
 0x3e9   :  { %v384_v41 = vadd.f32 %v2325_v28, %v383_v35 }
 0x3ea   :  { %v399_v44 = vadd.f32 %v2327_v29, %v398_v39 }
 0x3eb   :  { %v388_v46 = vsel %vm387_vm6, %v2325_v28, %v384_v41 }
 0x3ec   :  { %v393_v48 = vsel %vm390_vm11, %v392_v43, %v388_v46  ;;  %v403_v49 = vsel %vm402_vm12, %v2327_v29, %v399_v44 }
 0x3ed   :  { %v408_v50 = vsel %vm405_vm13, %v407_v47, %v403_v49  ;;  %v419_v51 = vmul.f32 %v417_v45, %v393_v48  ;;  %v546_v47 = vld [vmem:[%s3234_s0 + $0x20] sm:$0xf] }
 0x3ee   :  { %v411_v52 = vmul.f32 2.0, %v408_v50 }
 0x3f0   :  { %v2198_v53 = vadd.f32 -1.0, %v411_v52 }
 0x3f2   :  { %v415_v54 = vsel %vm82_vm7, %v2198_v53, %v408_v50 }
 0x3f3   :  { %v420_v55 = vmul.f32 %v415_v54, %v393_v48  ;;  %v547_v48 = vld [vmem:[%s3234_s0 + $0x28] sm:$0xf] }
 0x3f5   :  { %422 = vrot.lane.b32.xlu2 %v420_v55, %s2542_s29 }
 0x44f   :  { %v423_v56 = vpop.permute.xlu2 %422 }
 0x450   :  { %v2842_v57 = vadd.f32 %v423_v56, %v419_v51 }
 0x452   :  { %2328 = vtanh.f32 %v2842_v57  ;;  %v530_v28 = vrot.slane %v2842_v57, 4 }
 0x458   :  { %v2329_v59 = vpop.eup %2328 }
 0x459   :  { %v427_v58 = vmul.f32 %v2329_v59, %v415_v54 }
 0x45b   :  { %429 = vrot.lane.b32.xlu2 %v427_v58, %s2542_s29 }
 0x4b5   :  { %v430_v61 = vpop.permute.xlu2 %429 }
 0x4b6   :  { %432 = vst.msk [vmem:[#allocation2 + $0x8] sm:$0xf] %vm207_vm9, %v430_v61  ;;  %2199 = vmatmul.msk.f32.vlgmr.msrb.gmra.mxu2 %vm104_vm10, %v430_v61  ;;  %2200 = vmatmul.msk.f32.vlgmr.msrb.gmra.mxu3 %vm104_vm10, %v430_v61 }
 0x4b7   :  { %891 = vmatpush.msrb.mxu2 %v2600_v0  ;;  %911 = vmatpush.msrb.mxu3 %v2605_v1  ;;  %v433_v0 = vld [vmem:[%s3234_s0 + $0x10] sm:$0xf0] }
 0x4b9   :  { %892 = vmatpush.msrb.mxu2 %v2610_v2  ;;  %912 = vmatpush.msrb.mxu3 %v2617_v3  ;;  %v434_v2 = vld [vmem:[%s3234_s0 + $0x18] sm:$0xf0] }
 0x4bb   :  { %893 = vmatpush.msrb.mxu2 %v2622_v4  ;;  %913 = vmatpush.msrb.mxu3 %v2627_v5 }
 0x4bd   :  { %894 = vmatpush.msrb.mxu2 %v2636_v6  ;;  %914 = vmatpush.msrb.mxu3 %v2641_v7 }
 0x4bf   :  { %895 = vmatpush.msrb.mxu2 %v2650_v8  ;;  %915 = vmatpush.msrb.mxu3 %v2655_v9 }
 0x4c1   :  { %896 = vmatpush.msrb.mxu2 %v2664_v10  ;;  %916 = vmatpush.msrb.mxu3 %v2669_v11 }
 0x4c3   :  { %897 = vmatpush.msrb.mxu2 %v2678_v12  ;;  %917 = vmatpush.msrb.mxu3 %v2683_v13 }
 0x4c5   :  { %898 = vmatpush.msrb.mxu2 %v2692_v14  ;;  %918 = vmatpush.msrb.mxu3 %v2697_v15 }
 0x539   :  { %v454_v1 = vpop.f32.mrf.mxu2  ;;  %v474_v3 = vpop.f32.mrf.mxu3 }
 0x53a   :  { %v479_v4 = vrot.slane %v454_v1, 4  ;;  %v480_v5 = vrot.slane %v474_v3, 4 }
 0x53c   :  { %v483_v6 = vadd.f32 %v479_v4, %v433_v0  ;;  %v484_v7 = vadd.f32 %v480_v5, %v434_v2 }
 0x53e   :  { %v2201_v8 = vmul.f32 -1.442695, %v483_v6  ;;  %v2202_v9 = vmul.f32 -1.442695, %v484_v7 }
 0x540   :  { %2330 = vpow2.f32 %v2201_v8 }
 0x541   :  { %2332 = vpow2.f32 %v2202_v9 }
 0x546   :  { %v2331_v10 = vpop.eup %2330 }
 0x547   :  { %v2333_v11 = vpop.eup %2332  ;;  %v491_v12 = vadd.f32 1.0, %v2331_v10 }
 0x548   :  { %v492_v13 = vadd.f32 1.0, %v2333_v11 }
 0x549   :  { %2334 = vrcp.f32 %v491_v12  ;;  %v504_v18 = vand.u32 2147483648, %v491_v12  ;;  %v502_v21 = vand.u32 2147483647, %v491_v12  ;;  %vm498_vm0 = vweird.f32 %v491_v12 }
 0x54a   :  { %2336 = vrcp.f32 %v492_v13  ;;  %v519_v22 = vand.u32 2147483648, %v492_v13  ;;  %v517_v24 = vand.u32 2147483647, %v492_v13  ;;  %vm513_vm2 = vweird.f32 %v492_v13 }
 0x54b   :  { %v505_v26 = vor.u32 1.1754944e-38, %v504_v18  ;;  %vm503_vm3 = vcmp.eq.f32.partialorder %v502_v21, 8.507059e+37 }
 0x54c   :  { %v520_v30 = vor.u32 1.1754944e-38, %v519_v22  ;;  %vm518_vm5 = vcmp.eq.f32.partialorder %v517_v24, 8.507059e+37 }
 0x54f   :  { %v2335_v14 = vpop.eup %2334 }
 0x550   :  { %v2337_v15 = vpop.eup %2336  ;;  %v494_v62 = vmul.f32 %v2335_v14, %v491_v12  ;;  %vm499_vm14 = vweird.f32 %v2335_v14 }
 0x551   :  { %v509_v63 = vmul.f32 %v2337_v15, %v492_v13  ;;  %vm514_vm15 = vweird.f32 %v2337_v15  ;;  %vm500_vm1 = vmor %vm498_vm0, %vm499_vm14 }
 0x552   :  { %v495_v17 = vsub.f32 1.0, %v494_v62  ;;  %vm515_vm4 = vmor %vm513_vm2, %vm514_vm15 }
 0x553   :  { %v510_v19 = vsub.f32 1.0, %v509_v63 }
 0x554   :  { %v496_v20 = vmul.f32 %v2335_v14, %v495_v17 }
 0x555   :  { %v511_v23 = vmul.f32 %v2337_v15, %v510_v19 }
 0x556   :  { %v497_v25 = vadd.f32 %v2335_v14, %v496_v20 }
 0x557   :  { %v512_v27 = vadd.f32 %v2337_v15, %v511_v23 }
 0x558   :  { %v501_v29 = vsel %vm500_vm1, %v2335_v14, %v497_v25 }
 0x559   :  { %v506_v31 = vsel %vm503_vm3, %v505_v26, %v501_v29  ;;  %v516_v32 = vsel %vm515_vm4, %v2337_v15, %v512_v27 }
 0x55a   :  { %v521_v33 = vsel %vm518_vm5, %v520_v30, %v516_v32  ;;  %v532_v34 = vmul.f32 %v530_v28, %v506_v31  ;;  %v656_v28 = vld [vmem:[%s3234_s0 + $0x20] sm:$0xf0]  ;;  %v657_v30 = vld [vmem:[%s3234_s0 + $0x28] sm:$0xf0] }
 0x55b   :  { %v524_v35 = vmul.f32 2.0, %v521_v33 }
 0x55d   :  { %v2204_v37 = vadd.f32 -1.0, %v524_v35 }
 0x55f   :  { %v528_v38 = vsel %vm82_vm7, %v2204_v37, %v521_v33 }
 0x560   :  { %v533_v39 = vmul.f32 %v528_v38, %v506_v31 }
 0x562   :  { %535 = vrot.lane.b32.xlu0 %v533_v39, %s2542_s29 }
 0x5d4   :  { %v536_v40 = vpop.permute.xlu0 %535 }
 0x5d5   :  { %v538_v41 = vadd.f32 %v536_v40, %v532_v34 }
 0x5d7   :  { %2338 = vtanh.f32 %v538_v41  ;;  %v640_v13 = vrot.slane %v538_v41, 4 }
 0x5dd   :  { %v2339_v43 = vpop.eup %2338 }
 0x5de   :  { %v2875_v44 = vmul.f32 %v2339_v43, %v528_v38 }
 0x5e0   :  { %v548_v45 = vrot.slane %v2875_v44, 4 }
 0x5e2   :  { %549 = vrot.lane.b32.xlu1 %v548_v45, %s2542_s29 }
 0x654   :  { %v550_v46 = vpop.permute.xlu1 %549 }
 0x655   :  { %2205 = vmatmul.msk.f32.vlgmr.msra.gmra.mxu0 %vm104_vm10, %v550_v46  ;;  %2206 = vmatmul.msk.f32.vlgmr.msra.gmra.mxu1 %vm104_vm10, %v550_v46 }
 0x6d2   :  { %v570_v49 = vpop.f32.mrf.mxu0  ;;  %v590_v50 = vpop.f32.mrf.mxu1 }
 0x6d3   :  { %v593_v51 = vadd.f32 %v570_v49, %v546_v47  ;;  %v594_v52 = vadd.f32 %v590_v50, %v547_v48 }
 0x6d5   :  { %v2207_v53 = vmul.f32 -1.442695, %v593_v51  ;;  %v2208_v54 = vmul.f32 -1.442695, %v594_v52 }
 0x6d7   :  { %2340 = vpow2.f32 %v2207_v53 }
 0x6d8   :  { %2342 = vpow2.f32 %v2208_v54 }
 0x6dd   :  { %v2341_v55 = vpop.eup %2340 }
 0x6de   :  { %v2343_v56 = vpop.eup %2342  ;;  %v601_v57 = vadd.f32 1.0, %v2341_v55 }
 0x6df   :  { %v602_v59 = vadd.f32 1.0, %v2343_v56 }
 0x6e0   :  { %2344 = vrcp.f32 %v601_v57  ;;  %v614_v4 = vand.u32 2147483648, %v601_v57  ;;  %v612_v6 = vand.u32 2147483647, %v601_v57  ;;  %vm608_vm11 = vweird.f32 %v601_v57 }
 0x6e1   :  { %2346 = vrcp.f32 %v602_v59  ;;  %v629_v7 = vand.u32 2147483648, %v602_v59  ;;  %v627_v9 = vand.u32 2147483647, %v602_v59  ;;  %vm623_vm13 = vweird.f32 %v602_v59 }
 0x6e2   :  { %v615_v11 = vor.u32 1.1754944e-38, %v614_v4  ;;  %vm613_vm14 = vcmp.eq.f32.partialorder %v612_v6, 8.507059e+37 }
 0x6e3   :  { %v630_v15 = vor.u32 1.1754944e-38, %v629_v7  ;;  %vm628_vm0 = vcmp.eq.f32.partialorder %v627_v9, 8.507059e+37 }
 0x6e6   :  { %v2345_v58 = vpop.eup %2344 }
 0x6e7   :  { %v2347_v61 = vpop.eup %2346  ;;  %v604_v0 = vmul.f32 %v2345_v58, %v601_v57  ;;  %vm609_vm6 = vweird.f32 %v2345_v58 }
 0x6e8   :  { %v619_v1 = vmul.f32 %v2347_v61, %v602_v59  ;;  %vm624_vm8 = vweird.f32 %v2347_v61  ;;  %vm610_vm12 = vmor %vm608_vm11, %vm609_vm6 }
 0x6e9   :  { %v605_v2 = vsub.f32 1.0, %v604_v0  ;;  %vm625_vm15 = vmor %vm623_vm13, %vm624_vm8 }
 0x6ea   :  { %v620_v3 = vsub.f32 1.0, %v619_v1 }
 0x6eb   :  { %v606_v5 = vmul.f32 %v2345_v58, %v605_v2 }
 0x6ec   :  { %v621_v8 = vmul.f32 %v2347_v61, %v620_v3 }
 0x6ed   :  { %v607_v10 = vadd.f32 %v2345_v58, %v606_v5 }
 0x6ee   :  { %v622_v12 = vadd.f32 %v2347_v61, %v621_v8 }
 0x6ef   :  { %v611_v14 = vsel %vm610_vm12, %v2345_v58, %v607_v10 }
 0x6f0   :  { %v616_v62 = vsel %vm613_vm14, %v615_v11, %v611_v14  ;;  %v626_v63 = vsel %vm625_vm15, %v2347_v61, %v622_v12 }
 0x6f1   :  { %v631_v17 = vsel %vm628_vm0, %v630_v15, %v626_v63  ;;  %v642_v18 = vmul.f32 %v640_v13, %v616_v62  ;;  %v770_v63 = vld [vmem:[%s3234_s0 + $0x38] sm:$0xf] }
 0x6f2   :  { %v634_v19 = vmul.f32 2.0, %v631_v17 }
 0x6f4   :  { %v2210_v20 = vadd.f32 -1.0, %v634_v19 }
 0x6f6   :  { %v638_v21 = vsel %vm82_vm7, %v2210_v20, %v631_v17 }
 0x6f7   :  { %v643_v22 = vmul.f32 %v638_v21, %v616_v62  ;;  %v769_v62 = vld [vmem:[%s3234_s0 + $0x30] sm:$0xf] }
 0x6f9   :  { %645 = vrot.lane.b32.xlu2 %v643_v22, %s2542_s29 }
 0x753   :  { %v646_v23 = vpop.permute.xlu2 %645 }
 0x754   :  { %v648_v24 = vadd.f32 %v646_v23, %v642_v18 }
 0x756   :  { %2348 = vtanh.f32 %v648_v24  ;;  %v753_v61 = vrot.slane %v648_v24, 4 }
 0x75c   :  { %v2349_v25 = vpop.eup %2348 }
 0x75d   :  { %v650_v26 = vmul.f32 %v2349_v25, %v638_v21 }
 0x75f   :  { %652 = vrot.lane.b32.xlu0 %v650_v26, %s2542_s29 }
 0x7d1   :  { %v653_v27 = vpop.permute.xlu0 %652 }
 0x7d2   :  { %655 = vst.msk [vmem:[#allocation2 + $0x10] sm:$0xf] %vm207_vm9, %v653_v27  ;;  %2211 = vmatmul.msk.f32.vlgmr.msra.gmra.mxu2 %vm104_vm10, %v653_v27  ;;  %2212 = vmatmul.msk.f32.vlgmr.msra.gmra.mxu3 %vm104_vm10, %v653_v27 }
 0x855   :  { %v677_v29 = vpop.f32.mrf.mxu2  ;;  %v697_v31 = vpop.f32.mrf.mxu3 }
 0x856   :  { %v702_v32 = vrot.slane %v677_v29, 4  ;;  %v703_v33 = vrot.slane %v697_v31, 4 }
 0x858   :  { %v706_v34 = vadd.f32 %v702_v32, %v656_v28  ;;  %v707_v35 = vadd.f32 %v703_v33, %v657_v30 }
 0x85a   :  { %v2213_v37 = vmul.f32 -1.442695, %v706_v34  ;;  %v2214_v38 = vmul.f32 -1.442695, %v707_v35 }
 0x85c   :  { %2350 = vpow2.f32 %v2213_v37 }
 0x85d   :  { %2352 = vpow2.f32 %v2214_v38 }
 0x862   :  { %v2351_v39 = vpop.eup %2350 }
 0x863   :  { %v2353_v40 = vpop.eup %2352  ;;  %v714_v41 = vadd.f32 1.0, %v2351_v39 }
 0x864   :  { %v715_v43 = vadd.f32 1.0, %v2353_v40 }
 0x865   :  { %2354 = vrcp.f32 %v714_v41  ;;  %v727_v50 = vand.u32 2147483648, %v714_v41  ;;  %v725_v53 = vand.u32 2147483647, %v714_v41  ;;  %vm721_vm3 = vweird.f32 %v714_v41 }
 0x866   :  { %2356 = vrcp.f32 %v715_v43  ;;  %v742_v54 = vand.u32 2147483648, %v715_v43  ;;  %v740_v56 = vand.u32 2147483647, %v715_v43  ;;  %vm736_vm5 = vweird.f32 %v715_v43 }
 0x867   :  { %v728_v59 = vor.u32 1.1754944e-38, %v727_v50  ;;  %vm726_vm6 = vcmp.eq.f32.partialorder %v725_v53, 8.507059e+37 }
 0x868   :  { %v743_v1 = vor.u32 1.1754944e-38, %v742_v54  ;;  %vm741_vm11 = vcmp.eq.f32.partialorder %v740_v56, 8.507059e+37  ;;  %v1010_v56 = vld [vmem:[#allocation5 + $0x70] sm:$0xff] }
 0x869   :  { %1038 = vmatpush.msra.mxu0 %v1010_v56 }
 0x86b   :  { %v2355_v45 = vpop.eup %2354 }
 0x86c   :  { %v2357_v46 = vpop.eup %2356  ;;  %v717_v47 = vmul.f32 %v2355_v45, %v714_v41  ;;  %vm722_vm1 = vweird.f32 %v2355_v45 }
 0x86d   :  { %v732_v48 = vmul.f32 %v2357_v46, %v715_v43  ;;  %vm737_vm2 = vweird.f32 %v2357_v46  ;;  %vm723_vm4 = vmor %vm721_vm3, %vm722_vm1 }
 0x86e   :  { %v718_v49 = vsub.f32 1.0, %v717_v47  ;;  %vm738_vm8 = vmor %vm736_vm5, %vm737_vm2 }
 0x86f   :  { %v733_v51 = vsub.f32 1.0, %v732_v48 }
 0x870   :  { %v719_v52 = vmul.f32 %v2355_v45, %v718_v49 }
 0x871   :  { %v734_v55 = vmul.f32 %v2357_v46, %v733_v51 }
 0x872   :  { %v720_v57 = vadd.f32 %v2355_v45, %v719_v52 }
 0x873   :  { %v735_v58 = vadd.f32 %v2357_v46, %v734_v55 }
 0x874   :  { %v724_v0 = vsel %vm723_vm4, %v2355_v45, %v720_v57  ;;  %v1011_v57 = vld [vmem:[#allocation5 + $0x78] sm:$0xff]  ;;  %vm321_vm4 = vcmask 523268  }
 0x875   :  { %v729_v2 = vsel %vm726_vm6, %v728_v59, %v724_v0  ;;  %v739_v3 = vsel %vm738_vm8, %v2357_v46, %v735_v58  ;;  %1067 = vmatpush.msra.mxu1 %v1011_v57  ;;  %v1008_v59 = vld [vmem:[#allocation5 + $0x60] sm:$0xff]  ;;  %v1009_v58 = vld [vmem:[#allocation5 + $0x68] sm:$0xff]  ;;  %v1007_v0 = vld [vmem:[#allocation5 + $0x58] sm:$0xff] }
 0x876   :  { %v744_v4 = vsel %vm741_vm11, %v743_v1, %v739_v3  ;;  %v755_v5 = vmul.f32 %v753_v61, %v729_v2  ;;  %v1006_v61 = vld [vmem:[#allocation5 + $0x50] sm:$0xff]  ;;  %1039 = vmatpush.msra.mxu0 %v1008_v59  ;;  %v1004_v1 = vld [vmem:[#allocation5 + $0x40] sm:$0xff] }
 0x877   :  { %v747_v6 = vmul.f32 2.0, %v744_v4  ;;  %1068 = vmatpush.msra.mxu1 %v1009_v58  ;;  %v1002_v3 = vld [vmem:[#allocation5 + $0x30] sm:$0xff] }
 0x878   :  { %1040 = vmatpush.msra.mxu0 %v1006_v61 }
 0x879   :  { %v2216_v7 = vadd.f32 -1.0, %v747_v6  ;;  %1069 = vmatpush.msra.mxu1 %v1007_v0  ;;  %v998_v6 = vld [vmem:[#allocation5 + $0x10] sm:$0xff] }
 0x87a   :  { %1041 = vmatpush.msra.mxu0 %v1004_v1 }
 0x87b   :  { %v751_v8 = vsel %vm82_vm7, %v2216_v7, %v744_v4  ;;  %v1003_v4 = vld [vmem:[#allocation5 + $0x38] sm:$0xff] }
 0x87c   :  { %v756_v9 = vmul.f32 %v751_v8, %v729_v2  ;;  %v1005_v2 = vld [vmem:[#allocation5 + $0x48] sm:$0xff]  ;;  %1042 = vmatpush.msra.mxu0 %v1002_v3  ;;  %v999_v7 = vld [vmem:[#allocation5 + $0x18] sm:$0xff] }
 0x87d   :  { %1070 = vmatpush.msra.mxu1 %v1005_v2 }
 0x87e   :  { %758 = vrot.lane.b32.xlu1 %v756_v9, %s2542_s29  ;;  %v997_v9 = vld [vmem:[#allocation5 + $0x8] sm:$0xff] }
 0x87f   :  { %1071 = vmatpush.msra.mxu1 %v1003_v4 }
 0x8f0   :  { %v759_v10 = vpop.permute.xlu1 %758 }
 0x8f1   :  { %v761_v11 = vadd.f32 %v759_v10, %v755_v5  ;;  %v1000_v5 = vld [vmem:[#allocation5 + $0x20] sm:$0xff]  ;;  %v1110_v10 = vld [vmem:[#allocation7 + $0x70] sm:$0xff] }
 0x8f2   :  { %1043 = vmatpush.msra.mxu0 %v1000_v5  ;;  %1120 = vmatpush.msra.mxu2 %v1110_v10 }
 0x8f3   :  { %2358 = vtanh.f32 %v761_v11  ;;  %v863_v45 = vrot.slane %v761_v11, 4  ;;  %v1111_v11 = vld [vmem:[#allocation7 + $0x78] sm:$0xff] }
 0x8f4   :  { %1044 = vmatpush.msra.mxu0 %v998_v6  ;;  %1149 = vmatpush.msra.mxu3 %v1111_v11 }
 0x8f9   :  { %v2359_v12 = vpop.eup %2358 }
 0x8fa   :  { %v2903_v13 = vmul.f32 %v2359_v12, %v751_v8  ;;  %v996_v8 = vld [vmem:[#allocation5] sm:$0xff] }
 0x8fb   :  { %1045 = vmatpush.msra.mxu0 %v996_v8  ;;  %v1108_v12 = vld [vmem:[#allocation7 + $0x60] sm:$0xff] }
 0x8fc   :  { %v771_v14 = vrot.slane %v2903_v13, 4  ;;  %1121 = vmatpush.msra.mxu2 %v1108_v12 }
 0x8fe   :  { %772 = vrot.lane.b32.xlu2 %v771_v14, %s2542_s29  ;;  %v1109_v14 = vld [vmem:[#allocation7 + $0x68] sm:$0xff] }
 0x8ff   :  { %1150 = vmatpush.msra.mxu3 %v1109_v14 }
 0x958   :  { %v773_v15 = vpop.permute.xlu2 %772 }
 0x959   :  { %2217 = vmatmul.msk.f32.vlgmr.msrb.gmra.mxu0 %vm104_vm10, %v773_v15  ;;  %2218 = vmatmul.msk.f32.vlgmr.msrb.gmra.mxu1 %vm104_vm10, %v773_v15  ;;  %v1106_v15 = vld [vmem:[#allocation7 + $0x50] sm:$0xff] }
 0x95a   :  { %1122 = vmatpush.msra.mxu2 %v1106_v15 }
 0x9d6   :  { %v793_v17 = vpop.f32.mrf.mxu0  ;;  %v813_v18 = vpop.f32.mrf.mxu1 }
 0x9d7   :  { %v816_v19 = vadd.f32 %v793_v17, %v769_v62  ;;  %v817_v20 = vadd.f32 %v813_v18, %v770_v63  ;;  %v1107_v62 = vld [vmem:[#allocation7 + $0x58] sm:$0xff]  ;;  %v1104_v63 = vld [vmem:[#allocation7 + $0x40] sm:$0xff]  ;;  %v1105_v17 = vld [vmem:[#allocation7 + $0x48] sm:$0xff] }
 0x9d8   :  { %1151 = vmatpush.msra.mxu3 %v1107_v62  ;;  %1123 = vmatpush.msra.mxu2 %v1104_v63 }
 0x9d9   :  { %v2219_v21 = vmul.f32 -1.442695, %v816_v19  ;;  %v2220_v22 = vmul.f32 -1.442695, %v817_v20 }
 0x9da   :  { %1152 = vmatpush.msra.mxu3 %v1105_v17 }
 0x9db   :  { %2360 = vpow2.f32 %v2219_v21 }
 0x9dc   :  { %2362 = vpow2.f32 %v2220_v22 }
 0x9e1   :  { %v2361_v23 = vpop.eup %2360 }
 0x9e2   :  { %v2363_v24 = vpop.eup %2362  ;;  %v824_v25 = vadd.f32 1.0, %v2361_v23 }
 0x9e3   :  { %v825_v26 = vadd.f32 1.0, %v2363_v24  ;;  %v1102_v24 = vld [vmem:[#allocation7 + $0x30] sm:$0xff] }
 0x9e4   :  { %2364 = vrcp.f32 %v824_v25  ;;  %v837_v33 = vand.u32 2147483648, %v824_v25  ;;  %v835_v35 = vand.u32 2147483647, %v824_v25  ;;  %vm831_vm14 = vweird.f32 %v824_v25  ;;  %1124 = vmatpush.msra.mxu2 %v1102_v24 }
 0x9e5   :  { %2366 = vrcp.f32 %v825_v26  ;;  %v852_v37 = vand.u32 2147483648, %v825_v26  ;;  %v850_v39 = vand.u32 2147483647, %v825_v26  ;;  %vm846_vm0 = vweird.f32 %v825_v26 }
 0x9e6   :  { %v838_v41 = vor.u32 1.1754944e-38, %v837_v33  ;;  %vm836_vm1 = vcmp.eq.f32.partialorder %v835_v35, 8.507059e+37  ;;  %v1012_v33 = vld [vmem:[%s3239_s5] sm:$0x3] }
 0x9e7   :  { %v853_v47 = vor.u32 1.1754944e-38, %v852_v37  ;;  %vm851_vm3 = vcmp.eq.f32.partialorder %v850_v39, 8.507059e+37  ;;  %v2940_v35 = vperm.slane %v1012_v33, 1 }
 0x9ea   :  { %v2365_v27 = vpop.eup %2364 }
 0x9eb   :  { %v2367_v28 = vpop.eup %2366  ;;  %v827_v29 = vmul.f32 %v2365_v27, %v824_v25  ;;  %vm832_vm12 = vweird.f32 %v2365_v27  ;;  %v1103_v25 = vld [vmem:[#allocation7 + $0x38] sm:$0xff] }
 0x9ec   :  { %v842_v30 = vmul.f32 %v2367_v28, %v825_v26  ;;  %vm847_vm13 = vweird.f32 %v2367_v28  ;;  %vm833_vm15 = vmor %vm831_vm14, %vm832_vm12  ;;  %v1100_v26 = vld [vmem:[#allocation7 + $0x20] sm:$0xff]  ;;  %1153 = vmatpush.msra.mxu3 %v1103_v25 }
 0x9ed   :  { %v828_v31 = vsub.f32 1.0, %v827_v29  ;;  %vm848_vm2 = vmor %vm846_vm0, %vm847_vm13  ;;  %v1099_v29 = vld [vmem:[#allocation7 + $0x18] sm:$0xff]  ;;  %1125 = vmatpush.msra.mxu2 %v1100_v26 }
 0x9ee   :  { %v843_v32 = vsub.f32 1.0, %v842_v30  ;;  %v1096_v30 = vld [vmem:[#allocation7] sm:$0xff] }
 0x9ef   :  { %v829_v34 = vmul.f32 %v2365_v27, %v828_v31  ;;  %v1097_v31 = vld [vmem:[#allocation7 + $0x8] sm:$0xff] }
 0x9f0   :  { %v844_v38 = vmul.f32 %v2367_v28, %v843_v32 }
 0x9f1   :  { %v830_v40 = vadd.f32 %v2365_v27, %v829_v34  ;;  %v2938_v34 = vperm.slane %v1012_v33, 0 }
 0x9f2   :  { %v845_v43 = vadd.f32 %v2367_v28, %v844_v38 }
 0x9f3   :  { %v834_v46 = vsel %vm833_vm15, %v2365_v27, %v830_v40  ;;  %v1101_v27 = vld [vmem:[#allocation7 + $0x28] sm:$0xff] }
 0x9f4   :  { %v839_v48 = vsel %vm836_vm1, %v838_v41, %v834_v46  ;;  %v849_v49 = vsel %vm848_vm2, %v2367_v28, %v845_v43  ;;  %v1098_v28 = vld [vmem:[#allocation7 + $0x10] sm:$0xff]  ;;  %1154 = vmatpush.msra.mxu3 %v1101_v27  ;;  %v880_v46 = vld [vmem:[%s3234_s0 + $0x38] sm:$0xf0] }
 0x9f5   :  { %v854_v50 = vsel %vm851_vm3, %v853_v47, %v849_v49  ;;  %v865_v51 = vmul.f32 %v863_v45, %v839_v48  ;;  %1126 = vmatpush.msra.mxu2 %v1098_v28  ;;  %v879_v43 = vld [vmem:[%s3234_s0 + $0x30] sm:$0xf0] }
 0x9f6   :  { %v857_v52 = vmul.f32 2.0, %v854_v50  ;;  %1155 = vmatpush.msra.mxu3 %v1099_v29 }
 0x9f7   :  { %1127 = vmatpush.msra.mxu2 %v1096_v30 }
 0x9f8   :  { %v2222_v53 = vadd.f32 -1.0, %v857_v52  ;;  %1156 = vmatpush.msra.mxu3 %v1097_v31  ;;  %v2964_v31 = vld [vmem:[#allocation9 + $0x68] sm:$0xff] }
 0x9fa   :  { %v861_v54 = vsel %vm82_vm7, %v2222_v53, %v854_v50 }
 0x9fb   :  { %v866_v55 = vmul.f32 %v861_v54, %v839_v48 }
 0x9fd   :  { %868 = vrot.lane.b32.xlu0 %v866_v55, %s2542_s29 }
 0xa05   :  { %318 = vrot.lane.b32.xlu0 %v2810_v60, %s2542_s29  ;;  %v1001_v60 = vld [vmem:[#allocation5 + $0x28] sm:$0xff] }
 0xa06   :  { %1072 = vmatpush.msra.mxu1 %v1001_v60 }
 0xa08   :  { %1073 = vmatpush.msra.mxu1 %v999_v7 }
 0xa0a   :  { %1074 = vmatpush.msra.mxu1 %v997_v9 }
 0xa6f   :  { %v869_v18 = vpop.permute.xlu0 %868 }
 0xa70   :  { %v2920_v19 = vadd.f32 %v869_v18, %v865_v51 }
 0xa72   :  { %2368 = vtanh.f32 %v2920_v19 }
 0xa77   :  { %v319_v20 = vpop.permute.xlu0 %318 }
 0xa78   :  { %v2369_v21 = vpop.eup %2368  ;;  %322 = vst.msk [vmem:[#allocation2] sm:$0xf0] %vm321_vm4, %v319_v20  ;;  %v976_v20 = vrot.slane %v2920_v19, 4  ;;  %v2962_v19 = vld [vmem:[#allocation9 + $0x78] sm:$0xff] }
 0xa79   :  { %v873_v22 = vmul.f32 %v2369_v21, %v861_v54  ;;  %1234 = vmatpush.msrb.mxu1 %v2962_v19 }
 0xa7b   :  { %875 = vrot.lane.b32.xlu1 %v873_v22, %s2542_s29  ;;  %1235 = vmatpush.msrb.mxu1 %v2964_v31 }
 0xa7f   :  { %v992_v23 = vld [vmem:[#allocation2] sm:$0xff] }
 0xa80   :  { %2229 = vmatmul.msk.f32.vlgmr.msra.gmra.mxu0 %vm104_vm10, %v992_v23  ;;  %2233 = vmatmul.msk.f32.vlgmr.msra.gmra.mxu1 %vm104_vm10, %v992_v23 }
 0xa83   :  { %542 = vrot.lane.b32.xlu1 %v2875_v44, %s2542_s29 }
 0xaed   :  { %v876_v32 = vpop.permute.xlu1 %875 }
 0xaee   :  { %878 = vst.msk [vmem:[#allocation2 + $0x18] sm:$0xf] %vm207_vm9, %v876_v32  ;;  %2223 = vmatmul.msk.f32.vlgmr.msrb.gmra.mxu2 %vm104_vm10, %v876_v32  ;;  %2224 = vmatmul.msk.f32.vlgmr.msrb.gmra.mxu3 %vm104_vm10, %v876_v32  ;;  %v2966_v32 = vld [vmem:[#allocation9 + $0x70] sm:$0xff] }
 0xaef   :  { %1214 = vmatpush.msrb.mxu0 %v2966_v32  ;;  %1346 = vmatpush.msrb.mxu3 %v2962_v19 }
 0xaf0   :  { %1326 = vmatpush.msrb.mxu2 %v2966_v32 }
 0xaf1   :  { %1347 = vmatpush.msrb.mxu3 %v2964_v31 }
 0xaf5   :  { %v543_v44 = vpop.permute.xlu1 %542 }
 0xaf6   :  { %545 = vst.msk [vmem:[#allocation2 + $0x8] sm:$0xf0] %vm321_vm4, %v543_v44  ;;  %2237 = vmatmul.msk.f32.vlgmr.msra.gmra.mxu2 %vm104_vm10, %v992_v23  ;;  %2241 = vmatmul.msk.f32.vlgmr.msra.gmra.mxu3 %vm104_vm10, %v992_v23 }
 0xafd   :  { %v1047_v37 = vpop.f32.mrf.mxu0  ;;  %v1076_v38 = vpop.f32.mrf.mxu1  ;;  %v993_v39 = vld [vmem:[#allocation2 + $0x8] sm:$0xff] }
 0xafe   :  { %v1048_v40 = vadd.f32 %v1047_v37, %v2938_v34  ;;  %v1077_v41 = vadd.f32 %v1076_v38, %v2940_v35  ;;  %2230 = vmatmul.msk.f32.gmra.mxu0 %vm104_vm10, %v993_v39  ;;  %2234 = vmatmul.msk.f32.gmra.mxu1 %vm104_vm10, %v993_v39 }
 0xaff   :  { %2238 = vmatmul.msk.f32.gmra.mxu2 %vm104_vm10, %v993_v39  ;;  %2242 = vmatmul.msk.f32.gmra.mxu3 %vm104_vm10, %v993_v39 }
 0xb00   :  { %1088 = vst [vmem:[#allocation3 + $0x30] sm:$0xff] %v1048_v40  ;;  %v2980_v40 = vld [vmem:[#allocation9 + $0x58] sm:$0xff] }
 0xb01   :  { %1089 = vst [vmem:[#allocation3] sm:$0xff] %v1077_v41  ;;  %v2982_v41 = vld [vmem:[#allocation9 + $0x60] sm:$0xff]  ;;  %1236 = vmatpush.msrb.mxu1 %v2980_v40  ;;  %1348 = vmatpush.msrb.mxu3 %v2980_v40 }
 0xb02   :  { %1215 = vmatpush.msrb.mxu0 %v2982_v41  ;;  %1327 = vmatpush.msrb.mxu2 %v2982_v41 }
 0xb71   :  { %v900_v45 = vpop.f32.mrf.mxu2  ;;  %v920_v47 = vpop.f32.mrf.mxu3 }
 0xb72   :  { %v925_v48 = vrot.slane %v900_v45, 4  ;;  %v926_v49 = vrot.slane %v920_v47, 4  ;;  %v2988_v45 = vld [vmem:[#allocation9 + $0x50] sm:$0xff]  ;;  %v2998_v47 = vld [vmem:[#allocation9 + $0x40] sm:$0xff] }
 0xb73   :  { %1216 = vmatpush.msrb.mxu0 %v2988_v45  ;;  %1328 = vmatpush.msrb.mxu2 %v2988_v45 }
 0xb74   :  { %v929_v50 = vadd.f32 %v925_v48, %v879_v43  ;;  %v930_v51 = vadd.f32 %v926_v49, %v880_v46  ;;  %v2984_v43 = vld [vmem:[#allocation9 + $0x48] sm:$0xff]  ;;  %v2996_v46 = vld [vmem:[#allocation9 + $0x38] sm:$0xff]  ;;  %v3008_v49 = vld [vmem:[#allocation9 + $0x30] sm:$0xff] }
 0xb75   :  { %1237 = vmatpush.msrb.mxu1 %v2984_v43  ;;  %1349 = vmatpush.msrb.mxu3 %v2984_v43  ;;  %v3000_v48 = vld [vmem:[#allocation9 + $0x28] sm:$0xff] }
 0xb76   :  { %v2225_v52 = vmul.f32 -1.442695, %v929_v50  ;;  %v2226_v53 = vmul.f32 -1.442695, %v930_v51  ;;  %1217 = vmatpush.msrb.mxu0 %v2998_v47  ;;  %1329 = vmatpush.msrb.mxu2 %v2998_v47  ;;  %v3010_v50 = vld [vmem:[#allocation9 + $0x18] sm:$0xff]  ;;  %v3012_v51 = vld [vmem:[#allocation9 + $0x20] sm:$0xff] }
 0xb77   :  { %1238 = vmatpush.msrb.mxu1 %v2996_v46  ;;  %1350 = vmatpush.msrb.mxu3 %v2996_v46 }
 0xb78   :  { %2370 = vpow2.f32 %v2225_v52  ;;  %1218 = vmatpush.msrb.mxu0 %v3008_v49  ;;  %1330 = vmatpush.msrb.mxu2 %v3008_v49  ;;  %v3020_v52 = vld [vmem:[#allocation9 + $0x8] sm:$0xff] }
 0xb79   :  { %2372 = vpow2.f32 %v2226_v53  ;;  %v1129_v54 = vpop.f32.mrf.mxu2  ;;  %v1158_v55 = vpop.f32.mrf.mxu3  ;;  %1239 = vmatpush.msrb.mxu1 %v3000_v48  ;;  %1351 = vmatpush.msrb.mxu3 %v3000_v48  ;;  %v3022_v53 = vld [vmem:[#allocation9 + $0x10] sm:$0xff] }
 0xb7a   :  { %1170 = vst [vmem:[#allocation4] sm:$0xff] %v1129_v54  ;;  %1219 = vmatpush.msrb.mxu0 %v3012_v51  ;;  %1331 = vmatpush.msrb.mxu2 %v3012_v51  ;;  %v3024_v54 = vld [vmem:[#allocation9] sm:$0xff] }
 0xb7b   :  { %1171 = vst [vmem:[#allocation4 + $0x18] sm:$0xff] %v1158_v55  ;;  %v1050_v56 = vpop.f32.mrf.mxu0  ;;  %v1079_v57 = vpop.f32.mrf.mxu1  ;;  %1240 = vmatpush.msrb.mxu1 %v3010_v50  ;;  %1352 = vmatpush.msrb.mxu3 %v3010_v50 }
 0xb7c   :  { %v1051_v59 = vadd.f32 %v1050_v56, %v2938_v34  ;;  %v1080_v58 = vadd.f32 %v1079_v57, %v2940_v35  ;;  %1220 = vmatpush.msrb.mxu0 %v3022_v53  ;;  %1332 = vmatpush.msrb.mxu2 %v3022_v53 }
 0xb7d   :  { %1241 = vmatpush.msrb.mxu1 %v3020_v52  ;;  %1353 = vmatpush.msrb.mxu3 %v3020_v52 }
 0xb7e   :  { %v2371_v61 = vpop.eup %2370  ;;  %1090 = vst [vmem:[#allocation3 + $0x18] sm:$0xff] %v1051_v59  ;;  %1221 = vmatpush.msrb.mxu0 %v3024_v54  ;;  %1333 = vmatpush.msrb.mxu2 %v3024_v54 }
 0xb7f   :  { %v2373_v0 = vpop.eup %2372  ;;  %v937_v1 = vadd.f32 1.0, %v2371_v61  ;;  %1091 = vst [vmem:[#allocation3 + $0x10] sm:$0xff] %v1080_v58  ;;  %1468 = vmatpush.msra.mxu1 %v2962_v19  ;;  %1583 = vmatpush.msra.mxu3 %v2962_v19 }
 0xb80   :  { %v938_v2 = vadd.f32 1.0, %v2373_v0  ;;  %1448 = vmatpush.msra.mxu0 %v2966_v32  ;;  %1563 = vmatpush.msra.mxu2 %v2966_v32 }
 0xb81   :  { %2374 = vrcp.f32 %v937_v1  ;;  %v950_v9 = vand.u32 2147483648, %v937_v1  ;;  %v948_v12 = vand.u32 2147483647, %v937_v1  ;;  %vm944_vm6 = vweird.f32 %v937_v1  ;;  %1469 = vmatpush.msra.mxu1 %v2964_v31  ;;  %1584 = vmatpush.msra.mxu3 %v2964_v31 }
 0xb82   :  { %2376 = vrcp.f32 %v938_v2  ;;  %v1132_v3 = vpop.f32.mrf.mxu2  ;;  %v1161_v4 = vpop.f32.mrf.mxu3  ;;  %v965_v14 = vand.u32 2147483648, %v938_v2  ;;  %v963_v62 = vand.u32 2147483647, %v938_v2  ;;  %vm959_vm11 = vweird.f32 %v938_v2  ;;  %1449 = vmatpush.msra.mxu0 %v2982_v41  ;;  %1564 = vmatpush.msra.mxu2 %v2982_v41 }
 0xb83   :  { %1172 = vst [vmem:[#allocation4 + $0x10] sm:$0xff] %v1132_v3  ;;  %v951_v17 = vor.u32 1.1754944e-38, %v950_v9  ;;  %vm949_vm12 = vcmp.eq.f32.partialorder %v948_v12, 8.507059e+37  ;;  %1470 = vmatpush.msra.mxu1 %v2980_v40  ;;  %1585 = vmatpush.msra.mxu3 %v2980_v40  ;;  %v1194_v9 = vld [vmem:[#allocation3 + $0x30] sm:$0xf] }
 0xb84   :  { %1173 = vst [vmem:[#allocation4 + $0x20] sm:$0xff] %v1161_v4  ;;  %v966_v22 = vor.u32 1.1754944e-38, %v965_v14  ;;  %vm964_vm14 = vcmp.eq.f32.partialorder %v963_v62, 8.507059e+37  ;;  %1450 = vmatpush.msra.mxu0 %v2988_v45  ;;  %1565 = vmatpush.msra.mxu2 %v2988_v45  ;;  %v1195_v14 = vld [vmem:[#allocation3] sm:$0xf] }
 0xb85   :  { %1471 = vmatpush.msra.mxu1 %v2984_v43  ;;  %1586 = vmatpush.msra.mxu3 %v2984_v43 }
 0xb86   :  { %1451 = vmatpush.msra.mxu0 %v2998_v47  ;;  %1566 = vmatpush.msra.mxu2 %v2998_v47 }
 0xb87   :  { %v2375_v5 = vpop.eup %2374  ;;  %1472 = vmatpush.msra.mxu1 %v2996_v46  ;;  %1587 = vmatpush.msra.mxu3 %v2996_v46 }
 0xb88   :  { %v2377_v60 = vpop.eup %2376  ;;  %v940_v6 = vmul.f32 %v2375_v5, %v937_v1  ;;  %vm945_vm9 = vweird.f32 %v2375_v5  ;;  %1452 = vmatpush.msra.mxu0 %v3008_v49  ;;  %1567 = vmatpush.msra.mxu2 %v3008_v49 }
 0xb89   :  { %v955_v7 = vmul.f32 %v2377_v60, %v938_v2  ;;  %vm960_vm5 = vweird.f32 %v2377_v60  ;;  %vm946_vm8 = vmor %vm944_vm6, %vm945_vm9  ;;  %1473 = vmatpush.msra.mxu1 %v3000_v48  ;;  %1588 = vmatpush.msra.mxu3 %v3000_v48 }
 0xb8a   :  { %v941_v8 = vsub.f32 1.0, %v940_v6  ;;  %vm961_vm13 = vmor %vm959_vm11, %vm960_vm5  ;;  %1453 = vmatpush.msra.mxu0 %v3012_v51  ;;  %1568 = vmatpush.msra.mxu2 %v3012_v51 }
 0xb8b   :  { %v956_v10 = vsub.f32 1.0, %v955_v7  ;;  %1474 = vmatpush.msra.mxu1 %v3010_v50  ;;  %1589 = vmatpush.msra.mxu3 %v3010_v50 }
 0xb8c   :  { %v942_v11 = vmul.f32 %v2375_v5, %v941_v8  ;;  %1454 = vmatpush.msra.mxu0 %v3022_v53  ;;  %1569 = vmatpush.msra.mxu2 %v3022_v53 }
 0xb8d   :  { %v957_v15 = vmul.f32 %v2377_v60, %v956_v10  ;;  %1475 = vmatpush.msra.mxu1 %v3020_v52  ;;  %1590 = vmatpush.msra.mxu3 %v3020_v52 }
 0xb8e   :  { %v943_v63 = vadd.f32 %v2375_v5, %v942_v11  ;;  %1455 = vmatpush.msra.mxu0 %v3024_v54  ;;  %1570 = vmatpush.msra.mxu2 %v3024_v54 }
 0xb8f   :  { %v958_v18 = vadd.f32 %v2377_v60, %v957_v15 }
 0xb90   :  { %v947_v21 = vsel %vm946_vm8, %v2375_v5, %v943_v63 }
 0xb91   :  { %v952_v23 = vsel %vm949_vm12, %v951_v17, %v947_v21  ;;  %v962_v24 = vsel %vm961_vm13, %v2377_v60, %v958_v18 }
 0xb92   :  { %v967_v25 = vsel %vm964_vm14, %v966_v22, %v962_v24  ;;  %v978_v26 = vmul.f32 %v976_v20, %v952_v23 }
 0xb93   :  { %v970_v27 = vmul.f32 2.0, %v967_v25 }
 0xb95   :  { %v2228_v28 = vadd.f32 -1.0, %v970_v27 }
 0xb97   :  { %v974_v29 = vsel %vm82_vm7, %v2228_v28, %v967_v25 }
 0xb98   :  { %v979_v30 = vmul.f32 %v974_v29, %v952_v23 }
 0xb9a   :  { %981 = vrot.lane.b32.xlu2 %v979_v30, %s2542_s29 }
 0xba2   :  { %765 = vrot.lane.b32.xlu2 %v2903_v13, %s2542_s29 }
 0xbf4   :  { %v982_v44 = vpop.permute.xlu2 %981 }
 0xbf5   :  { %v984_v13 = vadd.f32 %v982_v44, %v978_v26 }
 0xbf7   :  { %2378 = vtanh.f32 %v984_v13 }
 0xbfc   :  { %v766_v33 = vpop.permute.xlu2 %765 }
 0xbfd   :  { %v2379_v37 = vpop.eup %2378  ;;  %768 = vst.msk [vmem:[#allocation2 + $0x10] sm:$0xf0] %vm321_vm4, %v766_v33 }
 0xbfe   :  { %v986_v38 = vmul.f32 %v2379_v37, %v974_v29 }
 0xc00   :  { %988 = vrot.lane.b32.xlu0 %v986_v38, %s2542_s29 }
 0xc04   :  { %v994_v39 = vld [vmem:[#allocation2 + $0x10] sm:$0xff] }
 0xc05   :  { %2231 = vmatmul.msk.f32.gmra.mxu0 %vm104_vm10, %v994_v39  ;;  %2235 = vmatmul.msk.f32.gmra.mxu1 %vm104_vm10, %v994_v39 }
 0xc06   :  { %2239 = vmatmul.msk.f32.gmra.mxu2 %vm104_vm10, %v994_v39  ;;  %2243 = vmatmul.msk.f32.gmra.mxu3 %vm104_vm10, %v994_v39 }
 0xc72   :  { %v989_v55 = vpop.permute.xlu0 %988 }
 0xc73   :  { %991 = vst.msk [vmem:[#allocation2 + $0x18] sm:$0xf0] %vm321_vm4, %v989_v55 }
 0xc7a   :  { %v995_v56 = vld [vmem:[#allocation2 + $0x18] sm:$0xff] }
 0xc7b   :  { %2232 = vmatmul.msk.f32.gmra.mxu0 %vm104_vm10, %v995_v56  ;;  %2236 = vmatmul.msk.f32.gmra.mxu1 %vm104_vm10, %v995_v56 }
 0xc7c   :  { %2240 = vmatmul.msk.f32.gmra.mxu2 %vm104_vm10, %v995_v56  ;;  %2244 = vmatmul.msk.f32.gmra.mxu3 %vm104_vm10, %v995_v56 }
 0xc82   :  { %v1053_v57 = vpop.f32.mrf.mxu0  ;;  %v1082_v59 = vpop.f32.mrf.mxu1 }
 0xc83   :  { %v1054_v58 = vadd.f32 %v1053_v57, %v2938_v34  ;;  %v1083_v61 = vadd.f32 %v1082_v59, %v2940_v35  ;;  %1222 = vmatmul.f32.vlgmr.msrb.gmra.mxu0 %v2541_v16  ;;  %1242 = vmatmul.f32.vlgmr.msrb.gmra.mxu1 %v2541_v16 }
 0xc84   :  { %1685 = vmatpush.msrb.mxu0 %v2966_v32  ;;  %1705 = vmatpush.msrb.mxu1 %v2962_v19 }
 0xc85   :  { %1092 = vst [vmem:[#allocation3 + $0x8] sm:$0xff] %v1054_v58 }
 0xc86   :  { %1093 = vst [vmem:[#allocation3 + $0x20] sm:$0xff] %v1083_v61  ;;  %1686 = vmatpush.msrb.mxu0 %v2982_v41  ;;  %1706 = vmatpush.msrb.mxu1 %v2964_v31 }
 0xc88   :  { %1687 = vmatpush.msrb.mxu0 %v2988_v45  ;;  %1707 = vmatpush.msrb.mxu1 %v2980_v40 }
 0xc89   :  { %v1135_v0 = vpop.f32.mrf.mxu2  ;;  %v1164_v1 = vpop.f32.mrf.mxu3 }
 0xc8a   :  { %1174 = vst [vmem:[#allocation4 + $0x28] sm:$0xff] %v1135_v0  ;;  %1688 = vmatpush.msrb.mxu0 %v2998_v47  ;;  %1708 = vmatpush.msrb.mxu1 %v2984_v43 }
 0xc8b   :  { %1175 = vst [vmem:[#allocation4 + $0x8] sm:$0xff] %v1164_v1 }
 0xc8c   :  { %1689 = vmatpush.msrb.mxu0 %v3008_v49  ;;  %1709 = vmatpush.msrb.mxu1 %v2996_v46 }
 0xc8e   :  { %1690 = vmatpush.msrb.mxu0 %v3012_v51  ;;  %1710 = vmatpush.msrb.mxu1 %v3000_v48 }
 0xc90   :  { %1691 = vmatpush.msrb.mxu0 %v3022_v53  ;;  %1711 = vmatpush.msrb.mxu1 %v3010_v50 }
 0xc92   :  { %1692 = vmatpush.msrb.mxu0 %v3024_v54  ;;  %1712 = vmatpush.msrb.mxu1 %v3020_v52 }
 0xcf8   :  { %v1056_v16 = vpop.f32.mrf.mxu0  ;;  %v1085_v2 = vpop.f32.mrf.mxu1 }
 0xcf9   :  { %v1057_v3 = vadd.f32 %v1056_v16, %v2938_v34  ;;  %v1086_v4 = vadd.f32 %v1085_v2, %v2940_v35 }
 0xcfb   :  { %1094 = vst [vmem:[#allocation3 + $0x28] sm:$0xff] %v1057_v3 }
 0xcfc   :  { %1095 = vst [vmem:[#allocation3 + $0x38] sm:$0xff] %v1086_v4 }
 0xcff   :  { %v1138_v5 = vpop.f32.mrf.mxu2  ;;  %v1167_v60 = vpop.f32.mrf.mxu3 }
 0xd00   :  { %1176 = vst [vmem:[#allocation4 + $0x30] sm:$0xff] %v1138_v5  ;;  %v1223_v10 = vpop.f32.mrf.mxu0  ;;  %v1243_v15 = vpop.f32.mrf.mxu1 }
 0xd01   :  { %1177 = vst [vmem:[#allocation4 + $0x38] sm:$0xff] %v1167_v60 }
 0xd07   :  { %v1196_v6 = vld [vmem:[#allocation4 + $0x30] sm:$0xf0] }
 0xd08   :  { %v1200_v7 = vrot.slane %v1196_v6, 4  ;;  %v1197_v8 = vld [vmem:[#allocation4 + $0x38] sm:$0xf0] }
 0xd09   :  { %v1201_v11 = vrot.slane %v1197_v8, 4  ;;  %v1303_v8 = vld [vmem:[#allocation4 + $0x30] sm:$0xf] }
 0xd0a   :  { %v1204_v12 = vadd.f32 %v1200_v7, %v1194_v9  ;;  %v1304_v9 = vld [vmem:[#allocation4 + $0x38] sm:$0xf] }
 0xd0b   :  { %v1205_v62 = vadd.f32 %v1201_v11, %v1195_v14  ;;  %v1308_v11 = vrot.slane %v1304_v9, 4 }
 0xd0c   :  { %v1246_v63 = vadd.f32 %v1223_v10, %v1204_v12  ;;  %v1307_v10 = vrot.slane %v1303_v8, 4  ;;  %v1301_v12 = vld [vmem:[#allocation3 + $0x30] sm:$0xf0] }
 0xd0d   :  { %v1247_v34 = vadd.f32 %v1243_v15, %v1205_v62  ;;  %v1302_v15 = vld [vmem:[#allocation3] sm:$0xf0] }
 0xd0e   :  { %v2245_v17 = vmul.f32 -1.442695, %v1246_v63  ;;  %v1311_v63 = vadd.f32 %v1307_v10, %v1301_v12 }
 0xd0f   :  { %v2246_v35 = vmul.f32 -1.442695, %v1247_v34 }
 0xd10   :  { %2380 = vpow2.f32 %v2245_v17  ;;  %v1312_v17 = vadd.f32 %v1308_v11, %v1302_v15 }
 0xd11   :  { %2382 = vpow2.f32 %v2246_v35 }
 0xd16   :  { %v2381_v18 = vpop.eup %2380 }
 0xd17   :  { %v2383_v20 = vpop.eup %2382  ;;  %v1254_v21 = vadd.f32 1.0, %v2381_v18 }
 0xd18   :  { %v1255_v22 = vadd.f32 1.0, %v2383_v20 }
 0xd19   :  { %2384 = vrcp.f32 %v1254_v21  ;;  %v1267_v39 = vand.u32 2147483648, %v1254_v21  ;;  %vm1261_vm4 = vweird.f32 %v1254_v21  ;;  %v1265_v56 = vand.u32 2147483647, %v1254_v21 }
 0xd1a   :  { %2386 = vrcp.f32 %v1255_v22  ;;  %v1282_v30 = vand.u32 2147483648, %v1255_v22  ;;  %v1280_v13 = vand.u32 2147483647, %v1255_v22  ;;  %vm1276_vm0 = vweird.f32 %v1255_v22 }
 0xd1b   :  { %v1268_v61 = vor.u32 1.1754944e-38, %v1267_v39  ;;  %vm1266_vm5 = vcmp.eq.f32.partialorder %v1265_v56, 8.507059e+37 }
 0xd1c   :  { %v1283_v38 = vor.u32 1.1754944e-38, %v1282_v30  ;;  %vm1281_vm3 = vcmp.eq.f32.partialorder %v1280_v13, 8.507059e+37 }
 0xd1f   :  { %v2385_v23 = vpop.eup %2384 }
 0xd20   :  { %v2387_v24 = vpop.eup %2386  ;;  %v1257_v25 = vmul.f32 %v2385_v23, %v1254_v21  ;;  %vm1262_vm1 = vweird.f32 %v2385_v23 }
 0xd21   :  { %v1272_v26 = vmul.f32 %v2387_v24, %v1255_v22  ;;  %vm1277_vm15 = vweird.f32 %v2387_v24  ;;  %vm1263_vm9 = vmor %vm1261_vm4, %vm1262_vm1 }
 0xd22   :  { %v1258_v27 = vsub.f32 1.0, %v1257_v25  ;;  %vm1278_vm2 = vmor %vm1276_vm0, %vm1277_vm15 }
 0xd23   :  { %v1273_v28 = vsub.f32 1.0, %v1272_v26 }
 0xd24   :  { %v1259_v29 = vmul.f32 %v2385_v23, %v1258_v27 }
 0xd25   :  { %v1274_v44 = vmul.f32 %v2387_v24, %v1273_v28 }
 0xd26   :  { %v1260_v37 = vadd.f32 %v2385_v23, %v1259_v29 }
 0xd27   :  { %v1275_v33 = vadd.f32 %v2387_v24, %v1274_v44 }
 0xd28   :  { %v1264_v58 = vsel %vm1263_vm9, %v2385_v23, %v1260_v37 }
 0xd29   :  { %v1279_v55 = vsel %vm1278_vm2, %v2387_v24, %v1275_v33  ;;  %v1269_v1 = vsel %vm1266_vm5, %v1268_v61, %v1264_v58 }
 0xd2a   :  { %v1284_v57 = vsel %vm1281_vm3, %v1283_v38, %v1279_v55  ;;  %v1292_v3 = vmul.f32 0.0, %v1269_v1 }
 0xd2b   :  { %v1287_v59 = vmul.f32 2.0, %v1284_v57 }
 0xd2d   :  { %v2248_v0 = vadd.f32 -1.0, %v1287_v59 }
 0xd2f   :  { %v1291_v16 = vsel %vm82_vm7, %v2248_v0, %v1284_v57 }
 0xd30   :  { %v1293_v2 = vmul.f32 %v1291_v16, %v1269_v1 }
 0xd32   :  { %1295 = vrot.lane.b32.xlu1 %v1293_v2, %s2542_s29 }
 0xda4   :  { %v1296_v4 = vpop.permute.xlu1 %1295 }
 0xda5   :  { %v3094_v5 = vadd.f32 %v1296_v4, %v1292_v3 }
 0xda7   :  { %2388 = vtanh.f32 %v3094_v5  ;;  %v1411_v61 = vrot.slane %v3094_v5, 4 }
 0xdad   :  { %v2389_v60 = vpop.eup %2388 }
 0xdae   :  { %v1300_v6 = vmul.f32 %v2389_v60, %v1291_v16 }
 0xdb0   :  { %1314 = vrot.lane.b32.xlu2 %v1300_v6, %s2542_s29 }
 0xe0a   :  { %v3098_v7 = vpop.permute.xlu2 %1314 }
 0xe0b   :  { %2249 = vmatmul.msk.f32.vlgmr.msrb.gmra.mxu2 %vm104_vm10, %v3098_v7  ;;  %2250 = vmatmul.msk.f32.vlgmr.msrb.gmra.mxu3 %vm104_vm10, %v3098_v7 }
 0xe0c   :  { %1800 = vmatpush.msrb.mxu2 %v2966_v32  ;;  %1820 = vmatpush.msrb.mxu3 %v2962_v19 }
 0xe0e   :  { %1801 = vmatpush.msrb.mxu2 %v2982_v41  ;;  %1821 = vmatpush.msrb.mxu3 %v2964_v31 }
 0xe10   :  { %1802 = vmatpush.msrb.mxu2 %v2988_v45  ;;  %1822 = vmatpush.msrb.mxu3 %v2980_v40 }
 0xe12   :  { %1803 = vmatpush.msrb.mxu2 %v2998_v47  ;;  %1823 = vmatpush.msrb.mxu3 %v2984_v43 }
 0xe14   :  { %1804 = vmatpush.msrb.mxu2 %v3008_v49  ;;  %1824 = vmatpush.msrb.mxu3 %v2996_v46 }
 0xe16   :  { %1805 = vmatpush.msrb.mxu2 %v3012_v51  ;;  %1825 = vmatpush.msrb.mxu3 %v3000_v48 }
 0xe18   :  { %1806 = vmatpush.msrb.mxu2 %v3022_v53  ;;  %1826 = vmatpush.msrb.mxu3 %v3010_v50 }
 0xe1a   :  { %1807 = vmatpush.msrb.mxu2 %v3024_v54  ;;  %1827 = vmatpush.msrb.mxu3 %v3020_v52 }
 0xe8e   :  { %v1335_v14 = vpop.f32.mrf.mxu2  ;;  %v1355_v62 = vpop.f32.mrf.mxu3 }
 0xe8f   :  { %v1360_v34 = vrot.slane %v1335_v14, 4  ;;  %v1361_v35 = vrot.slane %v1355_v62, 4  ;;  %v1424_v62 = vld [vmem:[#allocation4 + $0x28] sm:$0xf0] }
 0xe91   :  { %v1364_v18 = vadd.f32 %v1360_v34, %v1311_v63  ;;  %v1365_v20 = vadd.f32 %v1361_v35, %v1312_v17  ;;  %v1425_v63 = vld [vmem:[#allocation4 + $0x8] sm:$0xf0]  ;;  %v1428_v34 = vrot.slane %v1424_v62, 4  ;;  %v1422_v35 = vld [vmem:[#allocation3 + $0x18] sm:$0xf] }
 0xe92   :  { %v1429_v17 = vrot.slane %v1425_v63, 4 }
 0xe93   :  { %v2251_v21 = vmul.f32 -1.442695, %v1364_v18  ;;  %v2252_v22 = vmul.f32 -1.442695, %v1365_v20  ;;  %v1423_v18 = vld [vmem:[#allocation3 + $0x10] sm:$0xf]  ;;  %v1432_v20 = vadd.f32 %v1428_v34, %v1422_v35 }
 0xe95   :  { %2390 = vpow2.f32 %v2251_v21  ;;  %v1433_v21 = vadd.f32 %v1429_v17, %v1423_v18 }
 0xe96   :  { %2392 = vpow2.f32 %v2252_v22 }
 0xe9b   :  { %v2391_v23 = vpop.eup %2390 }
 0xe9c   :  { %v2393_v24 = vpop.eup %2392  ;;  %v1372_v25 = vadd.f32 1.0, %v2391_v23 }
 0xe9d   :  { %v1373_v26 = vadd.f32 1.0, %v2393_v24 }
 0xe9e   :  { %2394 = vrcp.f32 %v1372_v25  ;;  %v1385_v13 = vand.u32 2147483648, %v1372_v25  ;;  %v1383_v38 = vand.u32 2147483647, %v1372_v25  ;;  %vm1379_vm11 = vweird.f32 %v1372_v25 }
 0xe9f   :  { %2396 = vrcp.f32 %v1373_v26  ;;  %v1400_v39 = vand.u32 2147483648, %v1373_v26  ;;  %v1398_v56 = vand.u32 2147483647, %v1373_v26  ;;  %vm1394_vm13 = vweird.f32 %v1373_v26 }
 0xea0   :  { %v1386_v59 = vor.u32 1.1754944e-38, %v1385_v13  ;;  %vm1384_vm14 = vcmp.eq.f32.partialorder %v1383_v38, 8.507059e+37 }
 0xea1   :  { %v1401_v1 = vor.u32 1.1754944e-38, %v1400_v39  ;;  %vm1399_vm0 = vcmp.eq.f32.partialorder %v1398_v56, 8.507059e+37 }
 0xea4   :  { %v2395_v27 = vpop.eup %2394 }
 0xea5   :  { %v2397_v28 = vpop.eup %2396  ;;  %v1375_v29 = vmul.f32 %v2395_v27, %v1372_v25  ;;  %vm1380_vm6 = vweird.f32 %v2395_v27 }
 0xea6   :  { %v1390_v30 = vmul.f32 %v2397_v28, %v1373_v26  ;;  %vm1395_vm8 = vweird.f32 %v2397_v28  ;;  %vm1381_vm12 = vmor %vm1379_vm11, %vm1380_vm6 }
 0xea7   :  { %v1376_v44 = vsub.f32 1.0, %v1375_v29  ;;  %vm1396_vm15 = vmor %vm1394_vm13, %vm1395_vm8 }
 0xea8   :  { %v1391_v33 = vsub.f32 1.0, %v1390_v30 }
 0xea9   :  { %v1377_v37 = vmul.f32 %v2395_v27, %v1376_v44 }
 0xeaa   :  { %v1392_v55 = vmul.f32 %v2397_v28, %v1391_v33 }
 0xeab   :  { %v1378_v57 = vadd.f32 %v2395_v27, %v1377_v37 }
 0xeac   :  { %v1393_v58 = vadd.f32 %v2397_v28, %v1392_v55 }
 0xead   :  { %v1382_v0 = vsel %vm1381_vm12, %v2395_v27, %v1378_v57 }
 0xeae   :  { %v1387_v16 = vsel %vm1384_vm14, %v1386_v59, %v1382_v0  ;;  %v1397_v2 = vsel %vm1396_vm15, %v2397_v28, %v1393_v58 }
 0xeaf   :  { %v1402_v3 = vsel %vm1399_vm0, %v1401_v1, %v1397_v2  ;;  %v1413_v4 = vmul.f32 %v1411_v61, %v1387_v16 }
 0xeb0   :  { %v1405_v60 = vmul.f32 2.0, %v1402_v3 }
 0xeb2   :  { %v2254_v6 = vadd.f32 -1.0, %v1405_v60 }
 0xeb4   :  { %v1409_v8 = vsel %vm82_vm7, %v2254_v6, %v1402_v3 }
 0xeb5   :  { %v1414_v9 = vmul.f32 %v1409_v8, %v1387_v16 }
 0xeb7   :  { %1416 = vrot.lane.b32.xlu0 %v1414_v9, %s2542_s29 }
 0xf29   :  { %v1417_v10 = vpop.permute.xlu0 %1416 }
 0xf2a   :  { %v3124_v11 = vadd.f32 %v1417_v10, %v1413_v4 }
 0xf2c   :  { %2398 = vtanh.f32 %v3124_v11  ;;  %v1527_v3 = vrot.slane %v3124_v11, 4 }
 0xf32   :  { %v2399_v5 = vpop.eup %2398 }
 0xf33   :  { %v1421_v12 = vmul.f32 %v2399_v5, %v1409_v8 }
 0xf35   :  { %v1435_v14 = vrot.slane %v1421_v12, 4 }
 0xf37   :  { %1436 = vrot.lane.b32.xlu1 %v1435_v14, %s2542_s29 }
 0xfa9   :  { %v1437_v15 = vpop.permute.xlu1 %1436 }
 0xfaa   :  { %2255 = vmatmul.msk.f32.vlgmr.msra.gmra.mxu0 %vm104_vm10, %v1437_v15  ;;  %2256 = vmatmul.msk.f32.vlgmr.msra.gmra.mxu1 %vm104_vm10, %v1437_v15 }
 0xfab   :  { %1922 = vmatpush.msra.mxu0 %v2966_v32  ;;  %1942 = vmatpush.msra.mxu1 %v2962_v19 }
 0xfad   :  { %1923 = vmatpush.msra.mxu0 %v2982_v41  ;;  %1943 = vmatpush.msra.mxu1 %v2964_v31 }
 0xfaf   :  { %1924 = vmatpush.msra.mxu0 %v2988_v45  ;;  %1944 = vmatpush.msra.mxu1 %v2980_v40 }
 0xfb1   :  { %1925 = vmatpush.msra.mxu0 %v2998_v47  ;;  %1945 = vmatpush.msra.mxu1 %v2984_v43 }
 0xfb3   :  { %1926 = vmatpush.msra.mxu0 %v3008_v49  ;;  %1946 = vmatpush.msra.mxu1 %v2996_v46 }
 0xfb5   :  { %1927 = vmatpush.msra.mxu0 %v3012_v51  ;;  %1947 = vmatpush.msra.mxu1 %v3000_v48 }
 0xfb7   :  { %1928 = vmatpush.msra.mxu0 %v3022_v53  ;;  %1948 = vmatpush.msra.mxu1 %v3010_v50 }
 0xfb9   :  { %1929 = vmatpush.msra.mxu0 %v3024_v54  ;;  %1949 = vmatpush.msra.mxu1 %v3020_v52 }
0x1027   :  { %v1457_v22 = vpop.f32.mrf.mxu0  ;;  %v1477_v23 = vpop.f32.mrf.mxu1 }
0x1028   :  { %v1480_v24 = vadd.f32 %v1457_v22, %v1432_v20  ;;  %v1481_v25 = vadd.f32 %v1477_v23, %v1433_v21 }
0x102a   :  { %v2257_v26 = vmul.f32 -1.442695, %v1480_v24  ;;  %v2258_v27 = vmul.f32 -1.442695, %v1481_v25 }
0x102c   :  { %2400 = vpow2.f32 %v2257_v26 }
0x102d   :  { %2402 = vpow2.f32 %v2258_v27 }
0x1032   :  { %v2401_v28 = vpop.eup %2400 }
0x1033   :  { %v2403_v29 = vpop.eup %2402  ;;  %v1488_v30 = vadd.f32 1.0, %v2401_v28 }
0x1034   :  { %v1489_v44 = vadd.f32 1.0, %v2403_v29 }
0x1035   :  { %2404 = vrcp.f32 %v1488_v30  ;;  %v1501_v56 = vand.u32 2147483648, %v1488_v30  ;;  %v1499_v59 = vand.u32 2147483647, %v1488_v30  ;;  %vm1495_vm3 = vweird.f32 %v1488_v30 }
0x1036   :  { %2406 = vrcp.f32 %v1489_v44  ;;  %v1516_v58 = vand.u32 2147483648, %v1489_v44  ;;  %v1514_v0 = vand.u32 2147483647, %v1489_v44  ;;  %vm1510_vm9 = vweird.f32 %v1489_v44 }
0x1037   :  { %v1502_v16 = vor.u32 1.1754944e-38, %v1501_v56  ;;  %vm1500_vm5 = vcmp.eq.f32.partialorder %v1499_v59, 8.507059e+37 }
0x1038   :  { %v1517_v60 = vor.u32 1.1754944e-38, %v1516_v58  ;;  %vm1515_vm8 = vcmp.eq.f32.partialorder %v1514_v0, 8.507059e+37 }
0x103b   :  { %v2405_v13 = vpop.eup %2404 }
0x103c   :  { %v2407_v33 = vpop.eup %2406  ;;  %v1491_v37 = vmul.f32 %v2405_v13, %v1488_v30  ;;  %vm1496_vm1 = vweird.f32 %v2405_v13 }
0x103d   :  { %v1506_v38 = vmul.f32 %v2407_v33, %v1489_v44  ;;  %vm1511_vm2 = vweird.f32 %v2407_v33  ;;  %vm1497_vm4 = vmor %vm1495_vm3, %vm1496_vm1 }
0x103e   :  { %v1492_v39 = vsub.f32 1.0, %v1491_v37  ;;  %vm1512_vm6 = vmor %vm1510_vm9, %vm1511_vm2 }
0x103f   :  { %v1507_v55 = vsub.f32 1.0, %v1506_v38 }
0x1040   :  { %v1493_v57 = vmul.f32 %v2405_v13, %v1492_v39 }
0x1041   :  { %v1508_v61 = vmul.f32 %v2407_v33, %v1507_v55 }
0x1042   :  { %v1494_v1 = vadd.f32 %v2405_v13, %v1493_v57 }
0x1043   :  { %v1509_v2 = vadd.f32 %v2407_v33, %v1508_v61 }
0x1044   :  { %v1498_v4 = vsel %vm1497_vm4, %v2405_v13, %v1494_v1 }
0x1045   :  { %v1503_v6 = vsel %vm1500_vm5, %v1502_v16, %v1498_v4  ;;  %v1513_v8 = vsel %vm1512_vm6, %v2407_v33, %v1509_v2 }
0x1046   :  { %v1518_v9 = vsel %vm1515_vm8, %v1517_v60, %v1513_v8  ;;  %v1529_v10 = vmul.f32 %v1527_v3, %v1503_v6 }
0x1047   :  { %v1521_v5 = vmul.f32 2.0, %v1518_v9 }
0x1049   :  { %v2260_v12 = vadd.f32 -1.0, %v1521_v5  ;;  %v1661_v5 = vld [vmem:[#allocation4 + $0x10] sm:$0xf0] }
0x104b   :  { %v1525_v14 = vsel %vm82_vm7, %v2260_v12, %v1518_v9  ;;  %v1662_v12 = vld [vmem:[#allocation4 + $0x20] sm:$0xf0] }
0x104c   :  { %v1530_v15 = vmul.f32 %v1525_v14, %v1503_v6 }
0x104e   :  { %1532 = vrot.lane.b32.xlu2 %v1530_v15, %s2542_s29  ;;  %v1660_v15 = vld [vmem:[#allocation3 + $0x20] sm:$0xf] }
0x10a8   :  { %v1533_v62 = vpop.permute.xlu2 %1532 }
0x10a9   :  { %v3150_v63 = vadd.f32 %v1533_v62, %v1529_v10  ;;  %v1665_v62 = vrot.slane %v1661_v5, 4 }
0x10ab   :  { %2408 = vtanh.f32 %v3150_v63  ;;  %v1648_v55 = vrot.slane %v3150_v63, 4  ;;  %v1666_v63 = vrot.slane %v1662_v12, 4 }
0x10b1   :  { %v2409_v11 = vpop.eup %2408 }
0x10b2   :  { %v1537_v34 = vmul.f32 %v2409_v11, %v1525_v14  ;;  %v1659_v14 = vld [vmem:[#allocation3 + $0x8] sm:$0xf] }
0x10b3   :  { %v1669_v11 = vadd.f32 %v1665_v62, %v1659_v14 }
0x10b4   :  { %1551 = vrot.lane.b32.xlu0 %v1537_v34, %s2542_s29  ;;  %v1670_v34 = vadd.f32 %v1666_v63, %v1660_v15 }
0x1126   :  { %v1552_v17 = vpop.permute.xlu0 %1551 }
0x1127   :  { %2261 = vmatmul.msk.f32.vlgmr.msra.gmra.mxu2 %vm104_vm10, %v1552_v17  ;;  %2262 = vmatmul.msk.f32.vlgmr.msra.gmra.mxu3 %vm104_vm10, %v1552_v17 }
0x1128   :  { %2037 = vmatpush.msra.mxu2 %v2966_v32  ;;  %2057 = vmatpush.msra.mxu3 %v2962_v19  ;;  %v1540_v19 = vld [vmem:[#allocation4 + $0x28] sm:$0xf] }
0x1129   :  { %v1544_v32 = vrot.slane %v1540_v19, 4 }
0x112a   :  { %2038 = vmatpush.msra.mxu2 %v2982_v41  ;;  %2058 = vmatpush.msra.mxu3 %v2964_v31  ;;  %v1541_v31 = vld [vmem:[#allocation4 + $0x8] sm:$0xf]  ;;  %v1538_v41 = vld [vmem:[#allocation3 + $0x18] sm:$0xf0] }
0x112c   :  { %2039 = vmatpush.msra.mxu2 %v2988_v45  ;;  %2059 = vmatpush.msra.mxu3 %v2980_v40  ;;  %v1545_v40 = vrot.slane %v1541_v31, 4  ;;  %v1539_v45 = vld [vmem:[#allocation3 + $0x10] sm:$0xf0] }
0x112e   :  { %2040 = vmatpush.msra.mxu2 %v2998_v47  ;;  %2060 = vmatpush.msra.mxu3 %v2984_v43  ;;  %v1548_v47 = vadd.f32 %v1544_v32, %v1538_v41 }
0x1130   :  { %2041 = vmatpush.msra.mxu2 %v3008_v49  ;;  %2061 = vmatpush.msra.mxu3 %v2996_v46 }
0x1132   :  { %2042 = vmatpush.msra.mxu2 %v3012_v51  ;;  %2062 = vmatpush.msra.mxu3 %v3000_v48  ;;  %v1549_v51 = vadd.f32 %v1545_v40, %v1539_v45 }
0x1134   :  { %2043 = vmatpush.msra.mxu2 %v3022_v53  ;;  %2063 = vmatpush.msra.mxu3 %v3010_v50 }
0x1136   :  { %2044 = vmatpush.msra.mxu2 %v3024_v54  ;;  %2064 = vmatpush.msra.mxu3 %v3020_v52 }
0x11aa   :  { %v1572_v43 = vpop.f32.mrf.mxu2  ;;  %v1592_v46 = vpop.f32.mrf.mxu3 }
0x11ab   :  { %v1597_v49 = vrot.slane %v1572_v43, 4  ;;  %v1598_v48 = vrot.slane %v1592_v46, 4 }
0x11ad   :  { %v1601_v35 = vadd.f32 %v1597_v49, %v1548_v47  ;;  %v1602_v53 = vadd.f32 %v1598_v48, %v1549_v51 }
0x11af   :  { %v2263_v18 = vmul.f32 -1.442695, %v1601_v35  ;;  %v2264_v50 = vmul.f32 -1.442695, %v1602_v53 }
0x11b1   :  { %2410 = vpow2.f32 %v2263_v18 }
0x11b2   :  { %2412 = vpow2.f32 %v2264_v50 }
0x11b7   :  { %v2411_v54 = vpop.eup %2410 }
0x11b8   :  { %v2413_v52 = vpop.eup %2412  ;;  %v1609_v20 = vadd.f32 1.0, %v2411_v54 }
0x11b9   :  { %v1610_v21 = vadd.f32 1.0, %v2413_v52 }
0x11ba   :  { %2414 = vrcp.f32 %v1609_v20  ;;  %v1622_v27 = vand.u32 2147483648, %v1609_v20  ;;  %v1620_v30 = vand.u32 2147483647, %v1609_v20  ;;  %vm1616_vm13 = vweird.f32 %v1609_v20 }
0x11bb   :  { %2416 = vrcp.f32 %v1610_v21  ;;  %v1637_v44 = vand.u32 2147483648, %v1610_v21  ;;  %v1635_v33 = vand.u32 2147483647, %v1610_v21  ;;  %vm1631_vm15 = vweird.f32 %v1610_v21 }
0x11bc   :  { %v1623_v38 = vor.u32 1.1754944e-38, %v1622_v27  ;;  %vm1621_vm0 = vcmp.eq.f32.partialorder %v1620_v30, 8.507059e+37 }
0x11bd   :  { %v1638_v57 = vor.u32 1.1754944e-38, %v1637_v44  ;;  %vm1636_vm2 = vcmp.eq.f32.partialorder %v1635_v33, 8.507059e+37 }
0x11c0   :  { %v2415_v22 = vpop.eup %2414 }
0x11c1   :  { %v2417_v23 = vpop.eup %2416  ;;  %v1612_v24 = vmul.f32 %v2415_v22, %v1609_v20  ;;  %vm1617_vm11 = vweird.f32 %v2415_v22 }
0x11c2   :  { %v1627_v25 = vmul.f32 %v2417_v23, %v1610_v21  ;;  %vm1632_vm12 = vweird.f32 %v2417_v23  ;;  %vm1618_vm14 = vmor %vm1616_vm13, %vm1617_vm11 }
0x11c3   :  { %v1613_v26 = vsub.f32 1.0, %v1612_v24  ;;  %vm1633_vm1 = vmor %vm1631_vm15, %vm1632_vm12 }
0x11c4   :  { %v1628_v28 = vsub.f32 1.0, %v1627_v25 }
0x11c5   :  { %v1614_v29 = vmul.f32 %v2415_v22, %v1613_v26 }
0x11c6   :  { %v1629_v13 = vmul.f32 %v2417_v23, %v1628_v28 }
0x11c7   :  { %v1615_v37 = vadd.f32 %v2415_v22, %v1614_v29 }
0x11c8   :  { %v1630_v39 = vadd.f32 %v2417_v23, %v1629_v13 }
0x11c9   :  { %v1619_v56 = vsel %vm1618_vm14, %v2415_v22, %v1615_v37 }
0x11ca   :  { %v1624_v59 = vsel %vm1621_vm0, %v1623_v38, %v1619_v56  ;;  %v1634_v58 = vsel %vm1633_vm1, %v2417_v23, %v1630_v39 }
0x11cb   :  { %v1639_v61 = vsel %vm1636_vm2, %v1638_v57, %v1634_v58  ;;  %v1650_v0 = vmul.f32 %v1648_v55, %v1624_v59 }
0x11cc   :  { %v1642_v1 = vmul.f32 2.0, %v1639_v61 }
0x11ce   :  { %v2266_v16 = vadd.f32 -1.0, %v1642_v1  ;;  %v1775_v1 = vld [vmem:[#allocation3 + $0x8] sm:$0xf0] }
0x11d0   :  { %v1646_v2 = vsel %vm82_vm7, %v2266_v16, %v1639_v61  ;;  %v1777_v61 = vld [vmem:[#allocation4 + $0x10] sm:$0xf]  ;;  %v1776_v16 = vld [vmem:[#allocation3 + $0x20] sm:$0xf0] }
0x11d1   :  { %v1651_v3 = vmul.f32 %v1646_v2, %v1624_v59 }
0x11d3   :  { %1653 = vrot.lane.b32.xlu1 %v1651_v3, %s2542_s29 }
0x1245   :  { %v1654_v4 = vpop.permute.xlu1 %1653 }
0x1246   :  { %v1656_v60 = vadd.f32 %v1654_v4, %v1650_v0  ;;  %v1778_v0 = vld [vmem:[#allocation4 + $0x20] sm:$0xf] }
0x1247   :  { %v1782_v3 = vrot.slane %v1778_v0, 4 }
0x1248   :  { %2418 = vtanh.f32 %v1656_v60  ;;  %v1764_v26 = vrot.slane %v1656_v60, 4 }
0x124e   :  { %v2419_v6 = vpop.eup %2418 }
0x124f   :  { %v1658_v8 = vmul.f32 %v2419_v6, %v1646_v2  ;;  %v1781_v2 = vrot.slane %v1777_v61, 4 }
0x1251   :  { %v1672_v9 = vrot.slane %v1658_v8, 4  ;;  %v1785_v6 = vadd.f32 %v1781_v2, %v1775_v1 }
0x1253   :  { %1673 = vrot.lane.b32.xlu2 %v1672_v9, %s2542_s29  ;;  %v1786_v9 = vadd.f32 %v1782_v3, %v1776_v16 }
0x12ad   :  { %v1674_v10 = vpop.permute.xlu2 %1673 }
0x12ae   :  { %2267 = vmatmul.msk.f32.vlgmr.msrb.gmra.mxu0 %vm104_vm10, %v1674_v10  ;;  %2268 = vmatmul.msk.f32.vlgmr.msrb.gmra.mxu1 %vm104_vm10, %v1674_v10 }
0x132b   :  { %v1694_v17 = vpop.f32.mrf.mxu0  ;;  %v1714_v19 = vpop.f32.mrf.mxu1 }
0x132c   :  { %v1717_v31 = vadd.f32 %v1694_v17, %v1669_v11  ;;  %v1718_v32 = vadd.f32 %v1714_v19, %v1670_v34 }
0x132e   :  { %v2269_v40 = vmul.f32 -1.442695, %v1717_v31  ;;  %v2270_v41 = vmul.f32 -1.442695, %v1718_v32 }
0x1330   :  { %2420 = vpow2.f32 %v2269_v40 }
0x1331   :  { %2422 = vpow2.f32 %v2270_v41 }
0x1336   :  { %v2421_v43 = vpop.eup %2420 }
0x1337   :  { %v2423_v45 = vpop.eup %2422  ;;  %v1725_v46 = vadd.f32 1.0, %v2421_v43 }
0x1338   :  { %v1726_v47 = vadd.f32 1.0, %v2423_v45 }
0x1339   :  { %2424 = vrcp.f32 %v1725_v46  ;;  %v1738_v50 = vand.u32 2147483648, %v1725_v46  ;;  %v1736_v52 = vand.u32 2147483647, %v1725_v46  ;;  %vm1732_vm9 = vweird.f32 %v1725_v46 }
0x133a   :  { %2426 = vrcp.f32 %v1726_v47  ;;  %v1753_v20 = vand.u32 2147483648, %v1726_v47  ;;  %v1751_v22 = vand.u32 2147483647, %v1726_v47  ;;  %vm1747_vm6 = vweird.f32 %v1726_v47 }
0x133b   :  { %v1739_v24 = vor.u32 1.1754944e-38, %v1738_v50  ;;  %vm1737_vm8 = vcmp.eq.f32.partialorder %v1736_v52, 8.507059e+37 }
0x133c   :  { %v1754_v28 = vor.u32 1.1754944e-38, %v1753_v20  ;;  %vm1752_vm12 = vcmp.eq.f32.partialorder %v1751_v22, 8.507059e+37 }
0x133f   :  { %v2425_v49 = vpop.eup %2424 }
0x1340   :  { %v2427_v51 = vpop.eup %2426  ;;  %v1728_v48 = vmul.f32 %v2425_v49, %v1725_v46  ;;  %vm1733_vm3 = vweird.f32 %v2425_v49 }
0x1341   :  { %v1743_v35 = vmul.f32 %v2427_v51, %v1726_v47  ;;  %vm1748_vm4 = vweird.f32 %v2427_v51  ;;  %vm1734_vm5 = vmor %vm1732_vm9, %vm1733_vm3 }
0x1342   :  { %v1729_v53 = vsub.f32 1.0, %v1728_v48  ;;  %vm1749_vm11 = vmor %vm1747_vm6, %vm1748_vm4 }
0x1343   :  { %v1744_v18 = vsub.f32 1.0, %v1743_v35 }
0x1344   :  { %v1730_v54 = vmul.f32 %v2425_v49, %v1729_v53 }
0x1345   :  { %v1745_v21 = vmul.f32 %v2427_v51, %v1744_v18 }
0x1346   :  { %v1731_v23 = vadd.f32 %v2425_v49, %v1730_v54 }
0x1347   :  { %v1746_v25 = vadd.f32 %v2427_v51, %v1745_v21 }
0x1348   :  { %v1735_v27 = vsel %vm1734_vm5, %v2425_v49, %v1731_v23 }
0x1349   :  { %v1740_v29 = vsel %vm1737_vm8, %v1739_v24, %v1735_v27  ;;  %v1750_v30 = vsel %vm1749_vm11, %v2427_v51, %v1746_v25 }
0x134a   :  { %v1755_v44 = vsel %vm1752_vm12, %v1754_v28, %v1750_v30  ;;  %v1766_v13 = vmul.f32 %v1764_v26, %v1740_v29 }
0x134b   :  { %v1758_v33 = vmul.f32 2.0, %v1755_v44 }
0x134d   :  { %v2272_v37 = vadd.f32 -1.0, %v1758_v33  ;;  %v1898_v33 = vld [vmem:[#allocation4] sm:$0xf0] }
0x134f   :  { %v1762_v38 = vsel %vm82_vm7, %v2272_v37, %v1755_v44  ;;  %v1899_v37 = vld [vmem:[#allocation4 + $0x18] sm:$0xf0] }
0x1350   :  { %v1767_v39 = vmul.f32 %v1762_v38, %v1740_v29 }
0x1352   :  { %1769 = vrot.lane.b32.xlu0 %v1767_v39, %s2542_s29  ;;  %v1897_v39 = vld [vmem:[#allocation3 + $0x38] sm:$0xf] }
0x13c4   :  { %v1770_v55 = vpop.permute.xlu0 %1769 }
0x13c5   :  { %v1772_v56 = vadd.f32 %v1770_v55, %v1766_v13  ;;  %v1902_v55 = vrot.slane %v1898_v33, 4 }
0x13c7   :  { %2428 = vtanh.f32 %v1772_v56  ;;  %v1885_v18 = vrot.slane %v1772_v56, 4  ;;  %v1903_v56 = vrot.slane %v1899_v37, 4 }
0x13cd   :  { %v2429_v57 = vpop.eup %2428 }
0x13ce   :  { %v1774_v59 = vmul.f32 %v2429_v57, %v1762_v38  ;;  %v1896_v38 = vld [vmem:[#allocation3 + $0x28] sm:$0xf] }
0x13cf   :  { %v1906_v57 = vadd.f32 %v1902_v55, %v1896_v38 }
0x13d0   :  { %1788 = vrot.lane.b32.xlu1 %v1774_v59, %s2542_s29  ;;  %v1907_v59 = vadd.f32 %v1903_v56, %v1897_v39 }
0x1442   :  { %v1789_v58 = vpop.permute.xlu1 %1788 }
0x1443   :  { %2273 = vmatmul.msk.f32.vlgmr.msrb.gmra.mxu2 %vm104_vm10, %v1789_v58  ;;  %2274 = vmatmul.msk.f32.vlgmr.msrb.gmra.mxu3 %vm104_vm10, %v1789_v58 }
0x14c6   :  { %v1809_v4 = vpop.f32.mrf.mxu2  ;;  %v1829_v60 = vpop.f32.mrf.mxu3 }
0x14c7   :  { %v1834_v8 = vrot.slane %v1809_v4, 4  ;;  %v1835_v10 = vrot.slane %v1829_v60, 4 }
0x14c9   :  { %v1838_v5 = vadd.f32 %v1834_v8, %v1785_v6  ;;  %v1839_v12 = vadd.f32 %v1835_v10, %v1786_v9 }
0x14cb   :  { %v2275_v14 = vmul.f32 -1.442695, %v1838_v5  ;;  %v2276_v15 = vmul.f32 -1.442695, %v1839_v12 }
0x14cd   :  { %2430 = vpow2.f32 %v2275_v14 }
0x14ce   :  { %2432 = vpow2.f32 %v2276_v15 }
0x14d3   :  { %v2431_v62 = vpop.eup %2430 }
0x14d4   :  { %v2433_v63 = vpop.eup %2432  ;;  %v1846_v11 = vadd.f32 1.0, %v2431_v62 }
0x14d5   :  { %v1847_v34 = vadd.f32 1.0, %v2433_v63 }
0x14d6   :  { %2434 = vrcp.f32 %v1846_v11  ;;  %v1859_v41 = vand.u32 2147483648, %v1846_v11  ;;  %v1857_v46 = vand.u32 2147483647, %v1846_v11  ;;  %vm1853_vm15 = vweird.f32 %v1846_v11 }
0x14d7   :  { %2436 = vrcp.f32 %v1847_v34  ;;  %v1874_v47 = vand.u32 2147483648, %v1847_v34  ;;  %v1872_v51 = vand.u32 2147483647, %v1847_v34  ;;  %vm1868_vm1 = vweird.f32 %v1847_v34 }
0x14d8   :  { %v1860_v35 = vor.u32 1.1754944e-38, %v1859_v41  ;;  %vm1858_vm2 = vcmp.eq.f32.partialorder %v1857_v46, 8.507059e+37 }
0x14d9   :  { %v1875_v54 = vor.u32 1.1754944e-38, %v1874_v47  ;;  %vm1873_vm4 = vcmp.eq.f32.partialorder %v1872_v51, 8.507059e+37 }
0x14dc   :  { %v2435_v17 = vpop.eup %2434 }
0x14dd   :  { %v2437_v19 = vpop.eup %2436  ;;  %v1849_v31 = vmul.f32 %v2435_v17, %v1846_v11  ;;  %vm1854_vm13 = vweird.f32 %v2435_v17 }
0x14de   :  { %v1864_v32 = vmul.f32 %v2437_v19, %v1847_v34  ;;  %vm1869_vm14 = vweird.f32 %v2437_v19  ;;  %vm1855_vm0 = vmor %vm1853_vm15, %vm1854_vm13 }
0x14df   :  { %v1850_v40 = vsub.f32 1.0, %v1849_v31  ;;  %vm1870_vm3 = vmor %vm1868_vm1, %vm1869_vm14 }
0x14e0   :  { %v1865_v43 = vsub.f32 1.0, %v1864_v32 }
0x14e1   :  { %v1851_v45 = vmul.f32 %v2435_v17, %v1850_v40 }
0x14e2   :  { %v1866_v49 = vmul.f32 %v2437_v19, %v1865_v43 }
0x14e3   :  { %v1852_v48 = vadd.f32 %v2435_v17, %v1851_v45 }
0x14e4   :  { %v1867_v53 = vadd.f32 %v2437_v19, %v1866_v49 }
0x14e5   :  { %v1856_v50 = vsel %vm1855_vm0, %v2435_v17, %v1852_v48 }
0x14e6   :  { %v1861_v52 = vsel %vm1858_vm2, %v1860_v35, %v1856_v50  ;;  %v1871_v20 = vsel %vm1870_vm3, %v2437_v19, %v1867_v53 }
0x14e7   :  { %v1876_v21 = vsel %vm1873_vm4, %v1875_v54, %v1871_v20  ;;  %v1887_v22 = vmul.f32 %v1885_v18, %v1861_v52 }
0x14e8   :  { %v1879_v23 = vmul.f32 2.0, %v1876_v21 }
0x14ea   :  { %v2278_v24 = vadd.f32 -1.0, %v1879_v23  ;;  %v2012_v23 = vld [vmem:[#allocation3 + $0x28] sm:$0xf0] }
0x14ec   :  { %v1883_v25 = vsel %vm82_vm7, %v2278_v24, %v1876_v21  ;;  %v2014_v21 = vld [vmem:[#allocation4] sm:$0xf]  ;;  %v2013_v24 = vld [vmem:[#allocation3 + $0x38] sm:$0xf0] }
0x14ed   :  { %v1888_v26 = vmul.f32 %v1883_v25, %v1861_v52 }
0x14ef   :  { %1890 = vrot.lane.b32.xlu2 %v1888_v26, %s2542_s29 }
0x1549   :  { %v1891_v27 = vpop.permute.xlu2 %1890 }
0x154a   :  { %v1893_v28 = vadd.f32 %v1891_v27, %v1887_v22  ;;  %v2015_v22 = vld [vmem:[#allocation4 + $0x18] sm:$0xf] }
0x154b   :  { %v2019_v26 = vrot.slane %v2015_v22, 4 }
0x154c   :  { %2438 = vtanh.f32 %v1893_v28  ;;  %v2001_v40 = vrot.slane %v1893_v28, 4 }
0x1552   :  { %v2439_v29 = vpop.eup %2438 }
0x1553   :  { %v1895_v30 = vmul.f32 %v2439_v29, %v1883_v25  ;;  %v2018_v25 = vrot.slane %v2014_v21, 4 }
0x1555   :  { %v1909_v44 = vrot.slane %v1895_v30, 4  ;;  %v2022_v29 = vadd.f32 %v2018_v25, %v2012_v23 }
0x1557   :  { %1910 = vrot.lane.b32.xlu0 %v1909_v44, %s2542_s29  ;;  %v2023_v44 = vadd.f32 %v2019_v26, %v2013_v24 }
0x15c9   :  { %v1911_v13 = vpop.permute.xlu0 %1910 }
0x15ca   :  { %2279 = vmatmul.msk.f32.vlgmr.msra.gmra.mxu0 %vm104_vm10, %v1911_v13  ;;  %2280 = vmatmul.msk.f32.vlgmr.msra.gmra.mxu1 %vm104_vm10, %v1911_v13 }
0x1647   :  { %v1931_v58 = vpop.f32.mrf.mxu0  ;;  %v1951_v61 = vpop.f32.mrf.mxu1 }
0x1648   :  { %v1954_v0 = vadd.f32 %v1931_v58, %v1906_v57  ;;  %v1955_v1 = vadd.f32 %v1951_v61, %v1907_v59 }
0x164a   :  { %v2281_v16 = vmul.f32 -1.442695, %v1954_v0  ;;  %v2282_v2 = vmul.f32 -1.442695, %v1955_v1 }
0x164c   :  { %2440 = vpow2.f32 %v2281_v16 }
0x164d   :  { %2442 = vpow2.f32 %v2282_v2 }
0x1652   :  { %v2441_v3 = vpop.eup %2440 }
0x1653   :  { %v2443_v4 = vpop.eup %2442  ;;  %v1962_v60 = vadd.f32 1.0, %v2441_v3 }
0x1654   :  { %v1963_v6 = vadd.f32 1.0, %v2443_v4 }
0x1655   :  { %2444 = vrcp.f32 %v1962_v60  ;;  %v1975_v15 = vand.u32 2147483648, %v1962_v60  ;;  %v1973_v63 = vand.u32 2147483647, %v1962_v60  ;;  %vm1969_vm6 = vweird.f32 %v1962_v60 }
0x1656   :  { %2446 = vrcp.f32 %v1963_v6  ;;  %v1990_v11 = vand.u32 2147483648, %v1963_v6  ;;  %v1988_v17 = vand.u32 2147483647, %v1963_v6  ;;  %vm1984_vm11 = vweird.f32 %v1963_v6 }
0x1657   :  { %v1976_v31 = vor.u32 1.1754944e-38, %v1975_v15  ;;  %vm1974_vm12 = vcmp.eq.f32.partialorder %v1973_v63, 8.507059e+37 }
0x1658   :  { %v1991_v43 = vor.u32 1.1754944e-38, %v1990_v11  ;;  %vm1989_vm14 = vcmp.eq.f32.partialorder %v1988_v17, 8.507059e+37 }
0x165b   :  { %v2445_v8 = vpop.eup %2444 }
0x165c   :  { %v2447_v9 = vpop.eup %2446  ;;  %v1965_v10 = vmul.f32 %v2445_v8, %v1962_v60  ;;  %vm1970_vm9 = vweird.f32 %v2445_v8 }
0x165d   :  { %v1980_v5 = vmul.f32 %v2447_v9, %v1963_v6  ;;  %vm1985_vm5 = vweird.f32 %v2447_v9  ;;  %vm1971_vm8 = vmor %vm1969_vm6, %vm1970_vm9  ;;  %vm2175_vm6 = vcmask 11264  }
0x165e   :  { %v1966_v12 = vsub.f32 1.0, %v1965_v10  ;;  %vm1986_vm13 = vmor %vm1984_vm11, %vm1985_vm5 }
0x165f   :  { %v1981_v14 = vsub.f32 1.0, %v1980_v5 }
0x1660   :  { %v1967_v62 = vmul.f32 %v2445_v8, %v1966_v12 }
0x1661   :  { %v1982_v34 = vmul.f32 %v2447_v9, %v1981_v14 }
0x1662   :  { %v1968_v19 = vadd.f32 %v2445_v8, %v1967_v62 }
0x1663   :  { %v1983_v32 = vadd.f32 %v2447_v9, %v1982_v34 }
0x1664   :  { %v1972_v41 = vsel %vm1971_vm8, %v2445_v8, %v1968_v19 }
0x1665   :  { %v1977_v45 = vsel %vm1974_vm12, %v1976_v31, %v1972_v41  ;;  %v1987_v46 = vsel %vm1986_vm13, %v2447_v9, %v1983_v32  ;;  %v2147_v41 = vld [vmem:[%s3240_s6 + $0x38] sm:$0xff] }
0x1666   :  { %v1992_v47 = vsel %vm1989_vm14, %v1991_v43, %v1987_v46  ;;  %v2003_v49 = vmul.f32 %v2001_v40, %v1977_v45  ;;  %v2146_v43 = vld [vmem:[%s3240_s6 + $0x30] sm:$0xff]  ;;  %2163 = vmatpush.msrb.mxu0 %v2147_v41  ;;  %v2143_v46 = vld [vmem:[%s3240_s6 + $0x18] sm:$0xff] }
0x1667   :  { %v1995_v51 = vmul.f32 2.0, %v1992_v47 }
0x1668   :  { %2164 = vmatpush.msrb.mxu0 %v2146_v43 }
0x1669   :  { %v2284_v48 = vadd.f32 -1.0, %v1995_v51 }
0x166b   :  { %v1999_v35 = vsel %vm82_vm7, %v2284_v48, %v1992_v47  ;;  %v2142_v47 = vld [vmem:[%s3240_s6 + $0x10] sm:$0xff] }
0x166c   :  { %v2004_v53 = vmul.f32 %v1999_v35, %v1977_v45  ;;  %v2145_v45 = vld [vmem:[%s3240_s6 + $0x28] sm:$0xff] }
0x166d   :  { %2165 = vmatpush.msrb.mxu0 %v2145_v45 }
0x166e   :  { %2006 = vrot.lane.b32.xlu1 %v2004_v53, %s2542_s29 }
0x166f   :  { %2166 = vmatpush.msrb.mxu0 %v2144_v42 }
0x1671   :  { %2167 = vmatpush.msrb.mxu0 %v2143_v46 }
0x1673   :  { %2168 = vmatpush.msrb.mxu0 %v2142_v47 }
0x16e0   :  { %v2007_v18 = vpop.permute.xlu1 %2006 }
0x16e1   :  { %v2009_v50 = vadd.f32 %v2007_v18, %v2003_v49  ;;  %v2141_v49 = vld [vmem:[%s3240_s6 + $0x8] sm:$0xff] }
0x16e2   :  { %2169 = vmatpush.msrb.mxu0 %v2141_v49 }
0x16e3   :  { %2448 = vtanh.f32 %v2009_v50  ;;  %v2122_v14 = vrot.slane %v2009_v50, 4  ;;  %v2140_v50 = vld [vmem:[%s3240_s6] sm:$0xff] }
0x16e4   :  { %2170 = vmatpush.msrb.mxu0 %v2140_v50 }
0x16e9   :  { %v2449_v54 = vpop.eup %2448 }
0x16ea   :  { %v2011_v52 = vmul.f32 %v2449_v54, %v1999_v35 }
0x16ec   :  { %2025 = vrot.lane.b32.xlu2 %v2011_v52, %s2542_s29 }
0x1746   :  { %v2026_v20 = vpop.permute.xlu2 %2025 }
0x1747   :  { %2285 = vmatmul.msk.f32.vlgmr.msra.gmra.mxu2 %vm104_vm10, %v2026_v20  ;;  %2286 = vmatmul.msk.f32.vlgmr.msra.gmra.mxu3 %vm104_vm10, %v2026_v20  ;;  %v2299_v20 = vld [vmem:[%s3241_s7] ss:$0 sm:$0xff] }
0x17ca   :  { %v2046_v27 = vpop.f32.mrf.mxu2  ;;  %v2066_v28 = vpop.f32.mrf.mxu3 }
0x17cb   :  { %v2071_v30 = vrot.slane %v2046_v27, 4  ;;  %v2072_v13 = vrot.slane %v2066_v28, 4 }
0x17cd   :  { %v2075_v33 = vadd.f32 %v2071_v30, %v2022_v29  ;;  %v2076_v37 = vadd.f32 %v2072_v13, %v2023_v44 }
0x17cf   :  { %v2287_v38 = vmul.f32 -1.442695, %v2075_v33  ;;  %v2288_v39 = vmul.f32 -1.442695, %v2076_v37 }
0x17d1   :  { %2450 = vpow2.f32 %v2287_v38 }
0x17d2   :  { %2452 = vpow2.f32 %v2288_v39 }
0x17d7   :  { %v2451_v55 = vpop.eup %2450 }
0x17d8   :  { %v2453_v56 = vpop.eup %2452  ;;  %v2083_v57 = vadd.f32 1.0, %v2451_v55 }
0x17d9   :  { %v2084_v59 = vadd.f32 1.0, %v2453_v56 }
0x17da   :  { %2454 = vrcp.f32 %v2083_v57  ;;  %v2096_v3 = vand.u32 2147483648, %v2083_v57  ;;  %v2094_v60 = vand.u32 2147483647, %v2083_v57  ;;  %vm2090_vm1 = vweird.f32 %v2083_v57 }
0x17db   :  { %2456 = vrcp.f32 %v2084_v59  ;;  %v2111_v6 = vand.u32 2147483648, %v2084_v59  ;;  %v2109_v9 = vand.u32 2147483647, %v2084_v59  ;;  %vm2105_vm3 = vweird.f32 %v2084_v59 }
0x17dc   :  { %v2097_v5 = vor.u32 1.1754944e-38, %v2096_v3  ;;  %vm2095_vm4 = vcmp.eq.f32.partialorder %v2094_v60, 8.507059e+37 }
0x17dd   :  { %v2112_v62 = vor.u32 1.1754944e-38, %v2111_v6  ;;  %vm2110_vm5 = vcmp.eq.f32.partialorder %v2109_v9, 8.507059e+37 }
0x17e0   :  { %v2455_v58 = vpop.eup %2454 }
0x17e1   :  { %v2457_v61 = vpop.eup %2456  ;;  %v2086_v0 = vmul.f32 %v2455_v58, %v2083_v57  ;;  %vm2091_vm15 = vweird.f32 %v2455_v58 }
0x17e2   :  { %v2101_v1 = vmul.f32 %v2457_v61, %v2084_v59  ;;  %vm2106_vm0 = vweird.f32 %v2457_v61  ;;  %vm2092_vm2 = vmor %vm2090_vm1, %vm2091_vm15 }
0x17e3   :  { %v2087_v16 = vsub.f32 1.0, %v2086_v0  ;;  %vm2107_vm9 = vmor %vm2105_vm3, %vm2106_vm0 }
0x17e4   :  { %v2102_v2 = vsub.f32 1.0, %v2101_v1 }
0x17e5   :  { %v2088_v4 = vmul.f32 %v2455_v58, %v2087_v16 }
0x17e6   :  { %v2103_v8 = vmul.f32 %v2457_v61, %v2102_v2 }
0x17e7   :  { %v2089_v10 = vadd.f32 %v2455_v58, %v2088_v4 }
0x17e8   :  { %v2104_v12 = vadd.f32 %v2457_v61, %v2103_v8 }
0x17e9   :  { %v2093_v15 = vsel %vm2092_vm2, %v2455_v58, %v2089_v10 }
0x17ea   :  { %v2098_v63 = vsel %vm2095_vm4, %v2097_v5, %v2093_v15  ;;  %v2108_v11 = vsel %vm2107_vm9, %v2457_v61, %v2104_v12 }
0x17eb   :  { %v2113_v34 = vsel %vm2110_vm5, %v2112_v62, %v2108_v11  ;;  %v2124_v17 = vmul.f32 %v2122_v14, %v2098_v63 }
0x17ec   :  { %v2116_v19 = vmul.f32 2.0, %v2113_v34 }
0x17ee   :  { %v2290_v31 = vadd.f32 -1.0, %v2116_v19 }
0x17f0   :  { %v2120_v32 = vsel %vm82_vm7, %v2290_v31, %v2113_v34  ;;  %vm85_vm7 = vcmp.lt.s32.totalorder %v2765_v36, 32 }
0x17f1   :  { %v2125_v40 = vmul.f32 %v2120_v32, %v2098_v63 }
0x17f3   :  { %2127 = vrot.lane.b32.xlu0 %v2125_v40, %s2542_s29 }
0x1865   :  { %v2128_v51 = vpop.permute.xlu0 %2127 }
0x1866   :  { %v2130_v48 = vadd.f32 %v2128_v51, %v2124_v17 }
0x1868   :  { %2458 = vtanh.f32 %v2130_v48 }
0x186e   :  { %v2459_v35 = vpop.eup %2458 }
0x186f   :  { %v2132_v53 = vmul.f32 %v2459_v35, %v2120_v32 }
0x1871   :  { %v2134_v18 = vrot.slane %v2132_v53, 4 }
0x1873   :  { %2135 = vrot.lane.b32.xlu1 %v2134_v18, %s2542_s29 }
0x18e5   :  { %v2136_v54 = vpop.permute.xlu1 %2135 }
0x18e6   :  { %v2139_v52 = vsel %vm85_vm7, %v2136_v54, %v3098_v7 }
0x18e7   :  { %2291 = vmatmul.msk.f32.vlgmr.msrb.gmra.mxu0 %vm104_vm10, %v2139_v52 }
0x1964   :  { %v2172_v21 = vpop.f32.mrf.mxu0 }
0x1965   :  { %v2173_v22 = vadd.f32 %v2299_v20, %v2172_v21 }
0x1967   :  { %2176 = vst.msk [vmem:[%s3242_s8] sm:$0xf] %vm2175_vm6, %v2173_v22 }
0x1968   :  { %2181 = vsyncpa [#allocation6], 1 }
0x1969   :  { %2182 = vsyncpa [#allocation8], 1 }

</bundles_post_ra>
